<compile_context>
chip_gen: v6e
topology: v6e:2x2x1
jax: 0.10.0
libtpu: 0.0.40
codegen_flags: <defaults>
</compile_context>

<pallas_src>
import functools
import numpy as np
import jax
import jax.numpy as jnp
from jax.experimental import pallas as pl
from jax.experimental.pallas import tpu as pltpu


# ------------------------- host-side helpers -------------------------

def _pick_tile(m, rows_per_step, budget_bytes=8 << 20):
    """Largest spatial tile: the whole axis if it fits the VMEM budget, else the
    largest multiple of 128 dividing m that fits (f32, double-buffered)."""
    limit = max(128, budget_bytes // (rows_per_step * 4 * 2))
    if m <= limit:
        return m
    best = 0
    t = 128
    while t <= limit:
        if m % t == 0:
            best = t
        t += 128
    # TODO(synk): pad m when no 128-multiple divisor fits the budget.
    return best if best else m


def _bilinear_axis_weights(in_size, out_size):
    # One axis of F.interpolate(mode='bilinear', align_corners=False).
    scale = in_size / out_size
    src = (np.arange(out_size) + 0.5) * scale - 0.5
    src = np.maximum(src, 0.0)                       # PyTorch clamps below 0
    i0 = np.minimum(np.floor(src).astype(np.int64), in_size - 1)
    i1 = np.minimum(i0 + 1, in_size - 1)
    l1 = (src - i0).astype(np.float32)
    l0 = 1.0 - l1
    mat = np.zeros((out_size, in_size), dtype=np.float32)
    mat[np.arange(out_size), i0] += l0
    mat[np.arange(out_size), i1] += l1
    return mat                                       # [out_size, in_size]


def _selection_mats(c_in, h, w, hc, wc):
    # cselT[w_idx, dj*wc + j] = 1  iff  w_idx == 2*j + dj   (stride-2 column taps)
    cselT = np.zeros((w, 3 * wc), np.float32)
    for dj in range(3):
        for j in range(wc):
            cselT[2 * j + dj, dj * wc + j] = 1.0
    # rsel[di*(c*hc) + ch*hc + i, ch*h + r] = 1  iff  r == 2*i + di
    rsel = np.zeros((3 * c_in * hc, c_in * h), np.float32)
    for di in range(3):
        for ch in range(c_in):
            for i in range(hc):
                rsel[di * c_in * hc + ch * hc + i, ch * h + 2 * i + di] = 1.0
    return rsel, cselT


def _row_pick_mats(f, hp):
    # psel[u, g, g*hp + u] = 1 : picks row u of every channel block of (f*hp, .)
    psel = np.zeros((hp, f, f * hp), np.float32)
    for u in range(hp):
        for g in range(f):
            psel[u, g, g * hp + u] = 1.0
    return psel


# ------------------------- Pallas kernels -------------------------

def _mid_kernel(x_ref, csel_ref, rsel_ref, w2k_ref, b2k_ref, w3k_ref, b3k_ref,
                psel_ref, up_ref, o_ref, *, f, c_in, hc, wc, hp, wp):
    # Fused (per batch): conv2(3x3,s2, conv1 folded in) + maxpool(7,3)
    # + conv3(3x3,p1) + bilinear upsample -> lane-dense [f, H*W] output.
    dot = functools.partial(jnp.dot, preferred_element_type=jnp.float32)

    # stride-2 3x3 im2col of x via two selection matmuls (no strided loads)
    xc = dot(x_ref[...], csel_ref[...])              # [c*H, 3*wc]
    xT = dot(rsel_ref[...], xc)                      # [3*c*hc, 3*wc], rows (di, ch, i)

    # conv2 (with conv1 folded): 9 MXU matmuls against kron(w2', I_hc) weights
    c2 = jnp.zeros((f * hc, wc), jnp.float32)        # rows (g, i)
    for di in range(3):
        for dj in range(3):
            tap = xT[di * c_in * hc:(di + 1) * c_in * hc,
                     dj * wc:(dj + 1) * wc]          # [c*hc, wc], rows (ch, i)
            c2 = c2 + dot(w2k_ref[di * 3 + dj], tap)
    c2 = c2 + b2k_ref[...]

    # maxpool(7, stride 3): direct window maxes per channel (no one-hot scatter)
    slabs = []
    for g in range(f):
        slab = c2[g * hc:(g + 1) * hc, :]            # [hc, wc]
        rmax = jnp.concatenate(
            [jnp.max(slab[3 * i:3 * i + 7, :], axis=0, keepdims=True)
             for i in range(hp)], axis=0)            # [hp, wc]
        vmax = jnp.concatenate(
            [jnp.max(rmax[:, 3 * j:3 * j + 7], axis=1, keepdims=True)
             for j in range(wp)], axis=1)            # [hp, wp]
        zr = jnp.zeros((1, wp), jnp.float32)
        zc = jnp.zeros((hp + 2, 1), jnp.float32)
        vp = jnp.concatenate([zr, vmax, zr], axis=0)
        slabs.append(jnp.concatenate([zc, vp, zc], axis=1))   # [hp+2, wp+2]
    vpad = jnp.concatenate(slabs, axis=0)            # [f*(hp+2), wp+2], rows (ch, r)

    # conv3 (3x3, pad 1): 9 MXU matmuls against kron(w3_tap, row-shift) weights
    c3 = jnp.zeros((f * hp, wp), jnp.float32)        # rows (g, u)
    for di in range(3):
        for dj in range(3):
            c3 = c3 + dot(w3k_ref[di * 3 + dj], vpad[:, dj:dj + wp])
    c3 = c3 + b3k_ref[...]

    # separable bilinear upsample, emitted as lane-dense [f, H*W] matmuls
    out = dot(dot(psel_ref[0], c3), up_ref[0])
    for u in range(1, hp):
        out = out + dot(dot(psel_ref[u], c3), up_ref[u])
    o_ref[...] = out


def _final_kernel(x_ref, c3u_ref, wx_ref, w4_ref, b_ref, o_ref):
    # x * sigmoid( (w4@wf@w1)@x + w4@c3_up + b_fused )  -- all lane-dense
    xv = x_ref[...]                                            # [c, TM]
    c4 = (jnp.dot(wx_ref[...], xv, preferred_element_type=jnp.float32)
          + jnp.dot(w4_ref[...], c3u_ref[...], preferred_element_type=jnp.float32)
          + b_ref[...])
    o_ref[...] = xv * jax.nn.sigmoid(c4)


# ------------------------- pallas_call wrappers -------------------------

def _mid_fused(x_chw, csel, rsel, w2k, b2k, w3k, b3k, psel, up, dims):
    f, c_in, h, w, hc, wc, hp, wp = dims
    n = x_chw.shape[0]
    m = h * w
    kernel = functools.partial(_mid_kernel, f=f, c_in=c_in,
                               hc=hc, wc=wc, hp=hp, wp=wp)
    return pl.pallas_call(
        kernel,
        out_shape=jax.ShapeDtypeStruct((n, f, m), jnp.float32),
        grid=(n,),
        in_specs=[pl.BlockSpec((None, c_in * h, w), lambda b: (b, 0, 0)),
                  pl.BlockSpec((w, 3 * wc), lambda b: (0, 0)),
                  pl.BlockSpec((3 * c_in * hc, c_in * h), lambda b: (0, 0)),
                  pl.BlockSpec((9, f * hc, c_in * hc), lambda b: (0, 0, 0)),
                  pl.BlockSpec((f * hc, 1), lambda b: (0, 0)),
                  pl.BlockSpec((9, f * hp, f * (hp + 2)), lambda b: (0, 0, 0)),
                  pl.BlockSpec((f * hp, 1), lambda b: (0, 0)),
                  pl.BlockSpec((hp, f, f * hp), lambda b: (0, 0, 0)),
                  pl.BlockSpec((hp, wp, m), lambda b: (0, 0, 0))],
        out_specs=pl.BlockSpec((None, f, m), lambda b: (b, 0, 0)),
        compiler_params=pltpu.CompilerParams(
            dimension_semantics=("parallel",),
            vmem_limit_bytes=32 * 1024 * 1024),
    )(x_chw, csel, rsel, w2k, b2k, w3k, b3k, psel, up)


def _final_fused(x3, c3u, wx, w4, b_all):
    n, c, m = x3.shape
    f = c3u.shape[1]
    tm = _pick_tile(m, rows_per_step=2 * c + f)
    return pl.pallas_call(
        _final_kernel,
        out_shape=jax.ShapeDtypeStruct((n, c, m), jnp.float32),
        grid=(n, m // tm),
        in_specs=[pl.BlockSpec((None, c, tm), lambda b, i: (b, 0, i)),
                  pl.BlockSpec((None, f, tm), lambda b, i: (b, 0, i)),
                  pl.BlockSpec((c, c), lambda b, i: (0, 0)),
                  pl.BlockSpec((c, f), lambda b, i: (0, 0)),
                  pl.BlockSpec((c, 1), lambda b, i: (0, 0))],
        out_specs=pl.BlockSpec((None, c, tm), lambda b, i: (b, 0, i)),
        compiler_params=pltpu.CompilerParams(
            dimension_semantics=("parallel", "parallel"),
            vmem_limit_bytes=32 * 1024 * 1024),
    )(x3, c3u, wx, w4, b_all)


# ------------------------- ESA forward -------------------------

def esa_forward(x_nchw, params):
    n, c, h, w = x_nchw.shape
    f = params['w1'].shape[0]
    hc, wc = (h - 3) // 2 + 1, (w - 3) // 2 + 1
    assert hc >= 7 and wc >= 7, "input too small for maxpool(7, stride 3)"
    hp, wp = (hc - 7) // 3 + 1, (wc - 7) // 3 + 1
    m = h * w
    hi = jax.lax.Precision.HIGHEST

    x = x_nchw.astype(jnp.float32)
    x_chw = x.reshape(n, c * h, w)       # free reshape of the contiguous NCHW buffer
    x3 = x.reshape(n, c, m)              # free reshape

    w1, b1 = params['w1'], params['b1']
    w2, b2 = params['w2'], params['b2']
    w3, b3 = params['w3'], params['b3']
    wf, bf = params['wf'], params['bf']
    w4, b4 = params['w4'], params['b4']

    # fold conv1 into conv2 (mid path) and into conv_f/conv4 (gate path)
    w2p = jnp.einsum('gcij,ck->gkij', w2, w1, precision=hi)           # [f, c, 3, 3]
    b2e = b2 + jnp.einsum('gcij,c->g', w2, b1, precision=hi)          # [f]
    wx = jnp.dot(w4, jnp.dot(wf, w1, precision=hi), precision=hi)     # [c, c]
    b_all = (jnp.dot(w4, jnp.dot(wf, b1, precision=hi) + bf, precision=hi)
             + b4).reshape(c, 1)

    # block/kron weight matrices consumed by the fused mid kernel
    eye_hc = jnp.eye(hc, dtype=jnp.float32)
    w2k = jnp.stack([jnp.kron(w2p[:, :, di, dj], eye_hc)
                     for di in range(3) for dj in range(3)], axis=0)  # [9, f*hc, c*hc]
    b2k = jnp.repeat(b2e, hc).reshape(f * hc, 1)

    shifts = []
    for di in range(3):
        s = np.zeros((hp, hp + 2), np.float32)
        s[np.arange(hp), np.arange(hp) + di] = 1.0
        shifts.append(s)
    w3k = jnp.stack([jnp.kron(w3[:, :, di, dj], jnp.asarray(shifts[di]))
                     for di in range(3) for dj in range(3)], axis=0)  # [9, f*hp, f*(hp+2)]
    b3k = jnp.repeat(b3, hp).reshape(f * hp, 1)

    # shape-only selection / interpolation constants
    rsel, cselT = _selection_mats(c, h, w, hc, wc)
    psel = _row_pick_mats(f, hp)
    a_mat = _bilinear_axis_weights(hp, h)            # [h, hp]
    b_mat = _bilinear_axis_weights(wp, w)            # [w, wp]
    up = np.kron(a_mat, b_mat).T.reshape(hp, wp, m)  # up[u, v, y*w+x] = A[y,u]*B[x,v]

    c3u = _mid_fused(x_chw, jnp.asarray(cselT), jnp.asarray(rsel),
                     w2k, b2k, w3k, b3k, jnp.asarray(psel), jnp.asarray(up),
                     (f, c, h, w, hc, wc, hp, wp))   # [n, f, h*w]

    out3 = _final_fused(x3, c3u, wx, w4, b_all)      # [n, c, h*w]
    return out3.reshape(n, c, h, w)


# ------------------------- parameters -------------------------

def init_esa_params(key, esa_channels, n_feats):
    f = esa_channels
    ks = jax.random.split(key, 10)

    def wmat(k, shape, fan_in):
        return jax.random.normal(k, shape, jnp.float32) / np.sqrt(fan_in)

    return dict(
        w1=wmat(ks[0], (f, n_feats), n_feats),
        b1=0.1 * jax.random.normal(ks[1], (f,), jnp.float32),
        w2=wmat(ks[2], (f, f, 3, 3), f * 9),
        b2=0.1 * jax.random.normal(ks[3], (f,), jnp.float32),
        w3=wmat(ks[4], (f, f, 3, 3), f * 9),
        b3=0.1 * jax.random.normal(ks[5], (f,), jnp.float32),
        wf=wmat(ks[6], (f, f), f),
        bf=0.1 * jax.random.normal(ks[7], (f,), jnp.float32),
        w4=wmat(ks[8], (n_feats, f), f),
        b4=0.1 * jax.random.normal(ks[9], (n_feats,), jnp.float32),
    )


# ------------------------- pure-JAX reference (unfolded params) -------------------------

def esa_reference(x, params, a_mat, bt_mat):
    n, c, h, w = x.shape
    f = params['w1'].shape[0]
    hi = jax.lax.Precision.HIGHEST
    c1_ = (jnp.einsum('fc,nchw->nfhw', params['w1'], x, precision=hi)
           + params['b1'].reshape(1, f, 1, 1))
    c1 = jax.lax.conv_general_dilated(
        c1_, params['w2'], (2, 2), 'VALID',
        dimension_numbers=('NCHW', 'OIHW', 'NCHW'), precision=hi)
    c1 = c1 + params['b2'].reshape(1, f, 1, 1)
    v_max = jax.lax.reduce_window(c1, -jnp.inf, jax.lax.max,
                                  (1, 1, 7, 7), (1, 1, 3, 3), 'VALID')
    c3 = jax.lax.conv_general_dilated(
        v_max, params['w3'], (1, 1), ((1, 1), (1, 1)),
        dimension_numbers=('NCHW', 'OIHW', 'NCHW'), precision=hi)
    c3 = c3 + params['b3'].reshape(1, f, 1, 1)
    c3_up = jnp.einsum('iu,ncuv,vj->ncij', a_mat, c3, bt_mat, precision=hi)
    cf = (jnp.einsum('gc,nchw->nghw', params['wf'], c1_, precision=hi)
          + params['bf'].reshape(1, f, 1, 1))
    c4 = (jnp.einsum('gc,nchw->nghw', params['w4'], c3_up + cf, precision=hi)
          + params['b4'].reshape(1, c, 1, 1))
    return x * jax.nn.sigmoid(c4)


# ------------------------- main -------------------------

if __name__ == "__main__":
    key = jax.random.PRNGKey(0)
    kx, kp = jax.random.split(key)

    batch, n_feats, height, width = 2, 8, 32, 32   # spatial >= 17 for conv2+pool
    esa_channels = 4

    x = jax.random.normal(kx, (batch, n_feats, height, width), jnp.float32)
    params = init_esa_params(kp, esa_channels, n_feats)

    out = jax.block_until_ready(jax.jit(esa_forward)(x, params))
    assert out.shape == x.shape, (out.shape, x.shape)
    assert bool(jnp.all(jnp.isfinite(out)))

    # correctness vs a pure-JAX/XLA reference of the original (unfolded) forward
    hcc, wcc = (height - 3) // 2 + 1, (width - 3) // 2 + 1
    hpp, wpp = (hcc - 7) // 3 + 1, (wcc - 7) // 3 + 1
    a_mat = jnp.asarray(_bilinear_axis_weights(hpp, height))
    bt_mat = jnp.asarray(_bilinear_axis_weights(wpp, width).T)
    ref = esa_reference(x, params, a_mat, bt_mat)
    err = float(jnp.max(jnp.abs(out - ref)))
    assert err < 5e-2, f"mismatch vs reference: max abs err {err}"
    print("KERNEL_OK")
</pallas_src>

<mosaic_0001>
module attributes {stable_mosaic.version = 11 : i64} {
  func.func @_mid_kernel(%arg0: i32, %arg1: memref<1x256x32xf32, #tpu.memory_space<vmem>>, %arg2: memref<32x45xf32, #tpu.memory_space<vmem>>, %arg3: memref<360x256xf32, #tpu.memory_space<vmem>>, %arg4: memref<9x60x120xf32, #tpu.memory_space<vmem>>, %arg5: memref<60x1xf32, #tpu.memory_space<vmem>>, %arg6: memref<9x12x20xf32, #tpu.memory_space<vmem>>, %arg7: memref<12x1xf32, #tpu.memory_space<vmem>>, %arg8: memref<3x4x12xf32, #tpu.memory_space<vmem>>, %arg9: memref<3x3x1024xf32, #tpu.memory_space<vmem>>, %arg10: memref<1x4x1024xf32, #tpu.memory_space<vmem>>) attributes {dimension_semantics = [#tpu.dimension_semantics<parallel>], iteration_bounds = array<i64: 2>, scalar_prefetch = 0 : i64, scratch_operands = 0 : i64, tpu.core_type = #tpu.core_type<tc>, window_params = [{transform_indices = @transform_0, window_bounds = array<i64: 1, 256, 32>}, {pipeline_mode = #tpu.pipeline_mode<synchronous>, transform_indices = @transform_1, window_bounds = array<i64: 32, 45>}, {pipeline_mode = #tpu.pipeline_mode<synchronous>, transform_indices = @transform_2, window_bounds = array<i64: 360, 256>}, {pipeline_mode = #tpu.pipeline_mode<synchronous>, transform_indices = @transform_3, window_bounds = array<i64: 9, 60, 120>}, {pipeline_mode = #tpu.pipeline_mode<synchronous>, transform_indices = @transform_4, window_bounds = array<i64: 60, 1>}, {pipeline_mode = #tpu.pipeline_mode<synchronous>, transform_indices = @transform_5, window_bounds = array<i64: 9, 12, 20>}, {pipeline_mode = #tpu.pipeline_mode<synchronous>, transform_indices = @transform_6, window_bounds = array<i64: 12, 1>}, {pipeline_mode = #tpu.pipeline_mode<synchronous>, transform_indices = @transform_7, window_bounds = array<i64: 3, 4, 12>}, {pipeline_mode = #tpu.pipeline_mode<synchronous>, transform_indices = @transform_8, window_bounds = array<i64: 3, 3, 1024>}, {transform_indices = @transform_9, window_bounds = array<i64: 1, 4, 1024>}]} {
    %c0 = arith.constant 0 : index
    %c0_0 = arith.constant 0 : index
    %c0_1 = arith.constant 0 : index
    %0 = vector.load %arg1[%c0, %c0_0, %c0_1] : memref<1x256x32xf32, #tpu.memory_space<vmem>>, vector<1x256x32xf32>
    %1 = vector.shape_cast %0 : vector<1x256x32xf32> to vector<256x32xf32>
    %c0_2 = arith.constant 0 : index
    %c0_3 = arith.constant 0 : index
    %2 = vector.load %arg2[%c0_2, %c0_3] : memref<32x45xf32, #tpu.memory_space<vmem>>, vector<32x45xf32>
    %cst = arith.constant dense<0.000000e+00> : vector<256x45xf32>
    %3 = tpu.matmul %1, %2, %cst {dimension_numbers = #tpu.dot_dimension_numbers<[1], [0], [0], [1], [0, 0, 1, 1], [], []>} : vector<256x32xf32>, vector<32x45xf32>, vector<256x45xf32> -> vector<256x45xf32>
    %c0_4 = arith.constant 0 : index
    %c0_5 = arith.constant 0 : index
    %4 = vector.load %arg3[%c0_4, %c0_5] : memref<360x256xf32, #tpu.memory_space<vmem>>, vector<360x256xf32>
    %cst_6 = arith.constant dense<0.000000e+00> : vector<360x45xf32>
    %5 = tpu.matmul %4, %3, %cst_6 {dimension_numbers = #tpu.dot_dimension_numbers<[1], [0], [0], [1], [0, 0, 1, 1], [], []>} : vector<360x256xf32>, vector<256x45xf32>, vector<360x45xf32> -> vector<360x45xf32>
    %cst_7 = arith.constant 0.000000e+00 : f32
    %6 = vector.broadcast %cst_7 : f32 to vector<60x15xf32>
    %7 = vector.extract_strided_slice %5 {offsets = [0, 0], sizes = [120, 15], strides = [1, 1]} : vector<360x45xf32> to vector<120x15xf32>
    %c0_8 = arith.constant 0 : index
    %c0_9 = arith.constant 0 : index
    %c0_10 = arith.constant 0 : index
    %8 = vector.load %arg4[%c0_8, %c0_9, %c0_10] : memref<9x60x120xf32, #tpu.memory_space<vmem>>, vector<1x60x120xf32>
    %9 = vector.shape_cast %8 : vector<1x60x120xf32> to vector<60x120xf32>
    %cst_11 = arith.constant dense<0.000000e+00> : vector<60x15xf32>
    %10 = tpu.matmul %9, %7, %cst_11 {dimension_numbers = #tpu.dot_dimension_numbers<[1], [0], [0], [1], [0, 0, 1, 1], [], []>} : vector<60x120xf32>, vector<120x15xf32>, vector<60x15xf32> -> vector<60x15xf32>
    %11 = arith.addf %6, %10 : vector<60x15xf32>
    %12 = vector.extract_strided_slice %5 {offsets = [0, 15], sizes = [120, 15], strides = [1, 1]} : vector<360x45xf32> to vector<120x15xf32>
    %c1 = arith.constant 1 : index
    %c0_12 = arith.constant 0 : index
    %c0_13 = arith.constant 0 : index
    %13 = vector.load %arg4[%c1, %c0_12, %c0_13] : memref<9x60x120xf32, #tpu.memory_space<vmem>>, vector<1x60x120xf32>
    %14 = vector.shape_cast %13 : vector<1x60x120xf32> to vector<60x120xf32>
    %cst_14 = arith.constant dense<0.000000e+00> : vector<60x15xf32>
    %15 = tpu.matmul %14, %12, %cst_14 {dimension_numbers = #tpu.dot_dimension_numbers<[1], [0], [0], [1], [0, 0, 1, 1], [], []>} : vector<60x120xf32>, vector<120x15xf32>, vector<60x15xf32> -> vector<60x15xf32>
    %16 = arith.addf %11, %15 : vector<60x15xf32>
    %17 = vector.extract_strided_slice %5 {offsets = [0, 30], sizes = [120, 15], strides = [1, 1]} : vector<360x45xf32> to vector<120x15xf32>
    %c2 = arith.constant 2 : index
    %c0_15 = arith.constant 0 : index
    %c0_16 = arith.constant 0 : index
    %18 = vector.load %arg4[%c2, %c0_15, %c0_16] : memref<9x60x120xf32, #tpu.memory_space<vmem>>, vector<1x60x120xf32>
    %19 = vector.shape_cast %18 : vector<1x60x120xf32> to vector<60x120xf32>
    %cst_17 = arith.constant dense<0.000000e+00> : vector<60x15xf32>
    %20 = tpu.matmul %19, %17, %cst_17 {dimension_numbers = #tpu.dot_dimension_numbers<[1], [0], [0], [1], [0, 0, 1, 1], [], []>} : vector<60x120xf32>, vector<120x15xf32>, vector<60x15xf32> -> vector<60x15xf32>
    %21 = arith.addf %16, %20 : vector<60x15xf32>
    %22 = vector.extract_strided_slice %5 {offsets = [120, 0], sizes = [120, 15], strides = [1, 1]} : vector<360x45xf32> to vector<120x15xf32>
    %c3 = arith.constant 3 : index
    %c0_18 = arith.constant 0 : index
    %c0_19 = arith.constant 0 : index
    %23 = vector.load %arg4[%c3, %c0_18, %c0_19] : memref<9x60x120xf32, #tpu.memory_space<vmem>>, vector<1x60x120xf32>
    %24 = vector.shape_cast %23 : vector<1x60x120xf32> to vector<60x120xf32>
    %cst_20 = arith.constant dense<0.000000e+00> : vector<60x15xf32>
    %25 = tpu.matmul %24, %22, %cst_20 {dimension_numbers = #tpu.dot_dimension_numbers<[1], [0], [0], [1], [0, 0, 1, 1], [], []>} : vector<60x120xf32>, vector<120x15xf32>, vector<60x15xf32> -> vector<60x15xf32>
    %26 = arith.addf %21, %25 : vector<60x15xf32>
    %27 = vector.extract_strided_slice %5 {offsets = [120, 15], sizes = [120, 15], strides = [1, 1]} : vector<360x45xf32> to vector<120x15xf32>
    %c4 = arith.constant 4 : index
    %c0_21 = arith.constant 0 : index
    %c0_22 = arith.constant 0 : index
    %28 = vector.load %arg4[%c4, %c0_21, %c0_22] : memref<9x60x120xf32, #tpu.memory_space<vmem>>, vector<1x60x120xf32>
    %29 = vector.shape_cast %28 : vector<1x60x120xf32> to vector<60x120xf32>
    %cst_23 = arith.constant dense<0.000000e+00> : vector<60x15xf32>
    %30 = tpu.matmul %29, %27, %cst_23 {dimension_numbers = #tpu.dot_dimension_numbers<[1], [0], [0], [1], [0, 0, 1, 1], [], []>} : vector<60x120xf32>, vector<120x15xf32>, vector<60x15xf32> -> vector<60x15xf32>
    %31 = arith.addf %26, %30 : vector<60x15xf32>
    %32 = vector.extract_strided_slice %5 {offsets = [120, 30], sizes = [120, 15], strides = [1, 1]} : vector<360x45xf32> to vector<120x15xf32>
    %c5 = arith.constant 5 : index
    %c0_24 = arith.constant 0 : index
    %c0_25 = arith.constant 0 : index
    %33 = vector.load %arg4[%c5, %c0_24, %c0_25] : memref<9x60x120xf32, #tpu.memory_space<vmem>>, vector<1x60x120xf32>
    %34 = vector.shape_cast %33 : vector<1x60x120xf32> to vector<60x120xf32>
    %cst_26 = arith.constant dense<0.000000e+00> : vector<60x15xf32>
    %35 = tpu.matmul %34, %32, %cst_26 {dimension_numbers = #tpu.dot_dimension_numbers<[1], [0], [0], [1], [0, 0, 1, 1], [], []>} : vector<60x120xf32>, vector<120x15xf32>, vector<60x15xf32> -> vector<60x15xf32>
    %36 = arith.addf %31, %35 : vector<60x15xf32>
    %37 = vector.extract_strided_slice %5 {offsets = [240, 0], sizes = [120, 15], strides = [1, 1]} : vector<360x45xf32> to vector<120x15xf32>
    %c6 = arith.constant 6 : index
    %c0_27 = arith.constant 0 : index
    %c0_28 = arith.constant 0 : index
    %38 = vector.load %arg4[%c6, %c0_27, %c0_28] : memref<9x60x120xf32, #tpu.memory_space<vmem>>, vector<1x60x120xf32>
    %39 = vector.shape_cast %38 : vector<1x60x120xf32> to vector<60x120xf32>
    %cst_29 = arith.constant dense<0.000000e+00> : vector<60x15xf32>
    %40 = tpu.matmul %39, %37, %cst_29 {dimension_numbers = #tpu.dot_dimension_numbers<[1], [0], [0], [1], [0, 0, 1, 1], [], []>} : vector<60x120xf32>, vector<120x15xf32>, vector<60x15xf32> -> vector<60x15xf32>
    %41 = arith.addf %36, %40 : vector<60x15xf32>
    %42 = vector.extract_strided_slice %5 {offsets = [240, 15], sizes = [120, 15], strides = [1, 1]} : vector<360x45xf32> to vector<120x15xf32>
    %c7 = arith.constant 7 : index
    %c0_30 = arith.constant 0 : index
    %c0_31 = arith.constant 0 : index
    %43 = vector.load %arg4[%c7, %c0_30, %c0_31] : memref<9x60x120xf32, #tpu.memory_space<vmem>>, vector<1x60x120xf32>
    %44 = vector.shape_cast %43 : vector<1x60x120xf32> to vector<60x120xf32>
    %cst_32 = arith.constant dense<0.000000e+00> : vector<60x15xf32>
    %45 = tpu.matmul %44, %42, %cst_32 {dimension_numbers = #tpu.dot_dimension_numbers<[1], [0], [0], [1], [0, 0, 1, 1], [], []>} : vector<60x120xf32>, vector<120x15xf32>, vector<60x15xf32> -> vector<60x15xf32>
    %46 = arith.addf %41, %45 : vector<60x15xf32>
    %47 = vector.extract_strided_slice %5 {offsets = [240, 30], sizes = [120, 15], strides = [1, 1]} : vector<360x45xf32> to vector<120x15xf32>
    %c8 = arith.constant 8 : index
    %c0_33 = arith.constant 0 : index
    %c0_34 = arith.constant 0 : index
    %48 = vector.load %arg4[%c8, %c0_33, %c0_34] : memref<9x60x120xf32, #tpu.memory_space<vmem>>, vector<1x60x120xf32>
    %49 = vector.shape_cast %48 : vector<1x60x120xf32> to vector<60x120xf32>
    %cst_35 = arith.constant dense<0.000000e+00> : vector<60x15xf32>
    %50 = tpu.matmul %49, %47, %cst_35 {dimension_numbers = #tpu.dot_dimension_numbers<[1], [0], [0], [1], [0, 0, 1, 1], [], []>} : vector<60x120xf32>, vector<120x15xf32>, vector<60x15xf32> -> vector<60x15xf32>
    %51 = arith.addf %46, %50 : vector<60x15xf32>
    %c0_36 = arith.constant 0 : index
    %c0_37 = arith.constant 0 : index
    %52 = vector.load %arg5[%c0_36, %c0_37] : memref<60x1xf32, #tpu.memory_space<vmem>>, vector<60x1xf32>
    %53 = vector.broadcast %52 : vector<60x1xf32> to vector<60x15xf32>
    %54 = arith.addf %51, %53 : vector<60x15xf32>
    %55 = vector.extract_strided_slice %54 {offsets = [0, 0], sizes = [15, 15], strides = [1, 1]} : vector<60x15xf32> to vector<15x15xf32>
    %56 = vector.extract_strided_slice %55 {offsets = [0, 0], sizes = [7, 15], strides = [1, 1]} : vector<15x15xf32> to vector<7x15xf32>
    %cst_38 = arith.constant dense<0xFF800000> : vector<15xf32>
    %57 = vector.multi_reduction <maximumf>, %56, %cst_38 [0] : vector<7x15xf32> to vector<15xf32>
    %58 = vector.shape_cast %57 : vector<15xf32> to vector<1x15xf32>
    %59 = vector.extract_strided_slice %55 {offsets = [3, 0], sizes = [7, 15], strides = [1, 1]} : vector<15x15xf32> to vector<7x15xf32>
    %cst_39 = arith.constant dense<0xFF800000> : vector<15xf32>
    %60 = vector.multi_reduction <maximumf>, %59, %cst_39 [0] : vector<7x15xf32> to vector<15xf32>
    %61 = vector.shape_cast %60 : vector<15xf32> to vector<1x15xf32>
    %62 = vector.extract_strided_slice %55 {offsets = [6, 0], sizes = [7, 15], strides = [1, 1]} : vector<15x15xf32> to vector<7x15xf32>
    %cst_40 = arith.constant dense<0xFF800000> : vector<15xf32>
    %63 = vector.multi_reduction <maximumf>, %62, %cst_40 [0] : vector<7x15xf32> to vector<15xf32>
    %64 = vector.shape_cast %63 : vector<15xf32> to vector<1x15xf32>
    %65 = tpu.concatenate %58, %61, %64 in 0 : vector<1x15xf32>, vector<1x15xf32>, vector<1x15xf32> -> vector<3x15xf32>
    %66 = vector.extract_strided_slice %65 {offsets = [0, 0], sizes = [3, 7], strides = [1, 1]} : vector<3x15xf32> to vector<3x7xf32>
    %cst_41 = arith.constant dense<0xFF800000> : vector<3xf32>
    %67 = vector.multi_reduction <maximumf>, %66, %cst_41 [1] : vector<3x7xf32> to vector<3xf32>
    %68 = vector.shape_cast %67 : vector<3xf32> to vector<3x1xf32>
    %69 = vector.extract_strided_slice %65 {offsets = [0, 3], sizes = [3, 7], strides = [1, 1]} : vector<3x15xf32> to vector<3x7xf32>
    %cst_42 = arith.constant dense<0xFF800000> : vector<3xf32>
    %70 = vector.multi_reduction <maximumf>, %69, %cst_42 [1] : vector<3x7xf32> to vector<3xf32>
    %71 = vector.shape_cast %70 : vector<3xf32> to vector<3x1xf32>
    %72 = vector.extract_strided_slice %65 {offsets = [0, 6], sizes = [3, 7], strides = [1, 1]} : vector<3x15xf32> to vector<3x7xf32>
    %cst_43 = arith.constant dense<0xFF800000> : vector<3xf32>
    %73 = vector.multi_reduction <maximumf>, %72, %cst_43 [1] : vector<3x7xf32> to vector<3xf32>
    %74 = vector.shape_cast %73 : vector<3xf32> to vector<3x1xf32>
    %75 = tpu.concatenate %68, %71, %74 in 1 : vector<3x1xf32>, vector<3x1xf32>, vector<3x1xf32> -> vector<3x3xf32>
    %cst_44 = arith.constant 0.000000e+00 : f32
    %76 = vector.broadcast %cst_44 : f32 to vector<1x3xf32>
    %cst_45 = arith.constant 0.000000e+00 : f32
    %77 = vector.broadcast %cst_45 : f32 to vector<5x1xf32>
    %78 = tpu.concatenate %76, %75, %76 in 0 : vector<1x3xf32>, vector<3x3xf32>, vector<1x3xf32> -> vector<5x3xf32>
    %79 = tpu.concatenate %77, %78, %77 in 1 : vector<5x1xf32>, vector<5x3xf32>, vector<5x1xf32> -> vector<5x5xf32>
    %80 = vector.extract_strided_slice %54 {offsets = [15, 0], sizes = [15, 15], strides = [1, 1]} : vector<60x15xf32> to vector<15x15xf32>
    %81 = vector.extract_strided_slice %80 {offsets = [0, 0], sizes = [7, 15], strides = [1, 1]} : vector<15x15xf32> to vector<7x15xf32>
    %cst_46 = arith.constant dense<0xFF800000> : vector<15xf32>
    %82 = vector.multi_reduction <maximumf>, %81, %cst_46 [0] : vector<7x15xf32> to vector<15xf32>
    %83 = vector.shape_cast %82 : vector<15xf32> to vector<1x15xf32>
    %84 = vector.extract_strided_slice %80 {offsets = [3, 0], sizes = [7, 15], strides = [1, 1]} : vector<15x15xf32> to vector<7x15xf32>
    %cst_47 = arith.constant dense<0xFF800000> : vector<15xf32>
    %85 = vector.multi_reduction <maximumf>, %84, %cst_47 [0] : vector<7x15xf32> to vector<15xf32>
    %86 = vector.shape_cast %85 : vector<15xf32> to vector<1x15xf32>
    %87 = vector.extract_strided_slice %80 {offsets = [6, 0], sizes = [7, 15], strides = [1, 1]} : vector<15x15xf32> to vector<7x15xf32>
    %cst_48 = arith.constant dense<0xFF800000> : vector<15xf32>
    %88 = vector.multi_reduction <maximumf>, %87, %cst_48 [0] : vector<7x15xf32> to vector<15xf32>
    %89 = vector.shape_cast %88 : vector<15xf32> to vector<1x15xf32>
    %90 = tpu.concatenate %83, %86, %89 in 0 : vector<1x15xf32>, vector<1x15xf32>, vector<1x15xf32> -> vector<3x15xf32>
    %91 = vector.extract_strided_slice %90 {offsets = [0, 0], sizes = [3, 7], strides = [1, 1]} : vector<3x15xf32> to vector<3x7xf32>
    %cst_49 = arith.constant dense<0xFF800000> : vector<3xf32>
    %92 = vector.multi_reduction <maximumf>, %91, %cst_49 [1] : vector<3x7xf32> to vector<3xf32>
    %93 = vector.shape_cast %92 : vector<3xf32> to vector<3x1xf32>
    %94 = vector.extract_strided_slice %90 {offsets = [0, 3], sizes = [3, 7], strides = [1, 1]} : vector<3x15xf32> to vector<3x7xf32>
    %cst_50 = arith.constant dense<0xFF800000> : vector<3xf32>
    %95 = vector.multi_reduction <maximumf>, %94, %cst_50 [1] : vector<3x7xf32> to vector<3xf32>
    %96 = vector.shape_cast %95 : vector<3xf32> to vector<3x1xf32>
    %97 = vector.extract_strided_slice %90 {offsets = [0, 6], sizes = [3, 7], strides = [1, 1]} : vector<3x15xf32> to vector<3x7xf32>
    %cst_51 = arith.constant dense<0xFF800000> : vector<3xf32>
    %98 = vector.multi_reduction <maximumf>, %97, %cst_51 [1] : vector<3x7xf32> to vector<3xf32>
    %99 = vector.shape_cast %98 : vector<3xf32> to vector<3x1xf32>
    %100 = tpu.concatenate %93, %96, %99 in 1 : vector<3x1xf32>, vector<3x1xf32>, vector<3x1xf32> -> vector<3x3xf32>
    %cst_52 = arith.constant 0.000000e+00 : f32
    %101 = vector.broadcast %cst_52 : f32 to vector<1x3xf32>
    %cst_53 = arith.constant 0.000000e+00 : f32
    %102 = vector.broadcast %cst_53 : f32 to vector<5x1xf32>
    %103 = tpu.concatenate %101, %100, %101 in 0 : vector<1x3xf32>, vector<3x3xf32>, vector<1x3xf32> -> vector<5x3xf32>
    %104 = tpu.concatenate %102, %103, %102 in 1 : vector<5x1xf32>, vector<5x3xf32>, vector<5x1xf32> -> vector<5x5xf32>
    %105 = vector.extract_strided_slice %54 {offsets = [30, 0], sizes = [15, 15], strides = [1, 1]} : vector<60x15xf32> to vector<15x15xf32>
    %106 = vector.extract_strided_slice %105 {offsets = [0, 0], sizes = [7, 15], strides = [1, 1]} : vector<15x15xf32> to vector<7x15xf32>
    %cst_54 = arith.constant dense<0xFF800000> : vector<15xf32>
    %107 = vector.multi_reduction <maximumf>, %106, %cst_54 [0] : vector<7x15xf32> to vector<15xf32>
    %108 = vector.shape_cast %107 : vector<15xf32> to vector<1x15xf32>
    %109 = vector.extract_strided_slice %105 {offsets = [3, 0], sizes = [7, 15], strides = [1, 1]} : vector<15x15xf32> to vector<7x15xf32>
    %cst_55 = arith.constant dense<0xFF800000> : vector<15xf32>
    %110 = vector.multi_reduction <maximumf>, %109, %cst_55 [0] : vector<7x15xf32> to vector<15xf32>
    %111 = vector.shape_cast %110 : vector<15xf32> to vector<1x15xf32>
    %112 = vector.extract_strided_slice %105 {offsets = [6, 0], sizes = [7, 15], strides = [1, 1]} : vector<15x15xf32> to vector<7x15xf32>
    %cst_56 = arith.constant dense<0xFF800000> : vector<15xf32>
    %113 = vector.multi_reduction <maximumf>, %112, %cst_56 [0] : vector<7x15xf32> to vector<15xf32>
    %114 = vector.shape_cast %113 : vector<15xf32> to vector<1x15xf32>
    %115 = tpu.concatenate %108, %111, %114 in 0 : vector<1x15xf32>, vector<1x15xf32>, vector<1x15xf32> -> vector<3x15xf32>
    %116 = vector.extract_strided_slice %115 {offsets = [0, 0], sizes = [3, 7], strides = [1, 1]} : vector<3x15xf32> to vector<3x7xf32>
    %cst_57 = arith.constant dense<0xFF800000> : vector<3xf32>
    %117 = vector.multi_reduction <maximumf>, %116, %cst_57 [1] : vector<3x7xf32> to vector<3xf32>
    %118 = vector.shape_cast %117 : vector<3xf32> to vector<3x1xf32>
    %119 = vector.extract_strided_slice %115 {offsets = [0, 3], sizes = [3, 7], strides = [1, 1]} : vector<3x15xf32> to vector<3x7xf32>
    %cst_58 = arith.constant dense<0xFF800000> : vector<3xf32>
    %120 = vector.multi_reduction <maximumf>, %119, %cst_58 [1] : vector<3x7xf32> to vector<3xf32>
    %121 = vector.shape_cast %120 : vector<3xf32> to vector<3x1xf32>
    %122 = vector.extract_strided_slice %115 {offsets = [0, 6], sizes = [3, 7], strides = [1, 1]} : vector<3x15xf32> to vector<3x7xf32>
    %cst_59 = arith.constant dense<0xFF800000> : vector<3xf32>
    %123 = vector.multi_reduction <maximumf>, %122, %cst_59 [1] : vector<3x7xf32> to vector<3xf32>
    %124 = vector.shape_cast %123 : vector<3xf32> to vector<3x1xf32>
    %125 = tpu.concatenate %118, %121, %124 in 1 : vector<3x1xf32>, vector<3x1xf32>, vector<3x1xf32> -> vector<3x3xf32>
    %cst_60 = arith.constant 0.000000e+00 : f32
    %126 = vector.broadcast %cst_60 : f32 to vector<1x3xf32>
    %cst_61 = arith.constant 0.000000e+00 : f32
    %127 = vector.broadcast %cst_61 : f32 to vector<5x1xf32>
    %128 = tpu.concatenate %126, %125, %126 in 0 : vector<1x3xf32>, vector<3x3xf32>, vector<1x3xf32> -> vector<5x3xf32>
    %129 = tpu.concatenate %127, %128, %127 in 1 : vector<5x1xf32>, vector<5x3xf32>, vector<5x1xf32> -> vector<5x5xf32>
    %130 = vector.extract_strided_slice %54 {offsets = [45, 0], sizes = [15, 15], strides = [1, 1]} : vector<60x15xf32> to vector<15x15xf32>
    %131 = vector.extract_strided_slice %130 {offsets = [0, 0], sizes = [7, 15], strides = [1, 1]} : vector<15x15xf32> to vector<7x15xf32>
    %cst_62 = arith.constant dense<0xFF800000> : vector<15xf32>
    %132 = vector.multi_reduction <maximumf>, %131, %cst_62 [0] : vector<7x15xf32> to vector<15xf32>
    %133 = vector.shape_cast %132 : vector<15xf32> to vector<1x15xf32>
    %134 = vector.extract_strided_slice %130 {offsets = [3, 0], sizes = [7, 15], strides = [1, 1]} : vector<15x15xf32> to vector<7x15xf32>
    %cst_63 = arith.constant dense<0xFF800000> : vector<15xf32>
    %135 = vector.multi_reduction <maximumf>, %134, %cst_63 [0] : vector<7x15xf32> to vector<15xf32>
    %136 = vector.shape_cast %135 : vector<15xf32> to vector<1x15xf32>
    %137 = vector.extract_strided_slice %130 {offsets = [6, 0], sizes = [7, 15], strides = [1, 1]} : vector<15x15xf32> to vector<7x15xf32>
    %cst_64 = arith.constant dense<0xFF800000> : vector<15xf32>
    %138 = vector.multi_reduction <maximumf>, %137, %cst_64 [0] : vector<7x15xf32> to vector<15xf32>
    %139 = vector.shape_cast %138 : vector<15xf32> to vector<1x15xf32>
    %140 = tpu.concatenate %133, %136, %139 in 0 : vector<1x15xf32>, vector<1x15xf32>, vector<1x15xf32> -> vector<3x15xf32>
    %141 = vector.extract_strided_slice %140 {offsets = [0, 0], sizes = [3, 7], strides = [1, 1]} : vector<3x15xf32> to vector<3x7xf32>
    %cst_65 = arith.constant dense<0xFF800000> : vector<3xf32>
    %142 = vector.multi_reduction <maximumf>, %141, %cst_65 [1] : vector<3x7xf32> to vector<3xf32>
    %143 = vector.shape_cast %142 : vector<3xf32> to vector<3x1xf32>
    %144 = vector.extract_strided_slice %140 {offsets = [0, 3], sizes = [3, 7], strides = [1, 1]} : vector<3x15xf32> to vector<3x7xf32>
    %cst_66 = arith.constant dense<0xFF800000> : vector<3xf32>
    %145 = vector.multi_reduction <maximumf>, %144, %cst_66 [1] : vector<3x7xf32> to vector<3xf32>
    %146 = vector.shape_cast %145 : vector<3xf32> to vector<3x1xf32>
    %147 = vector.extract_strided_slice %140 {offsets = [0, 6], sizes = [3, 7], strides = [1, 1]} : vector<3x15xf32> to vector<3x7xf32>
    %cst_67 = arith.constant dense<0xFF800000> : vector<3xf32>
    %148 = vector.multi_reduction <maximumf>, %147, %cst_67 [1] : vector<3x7xf32> to vector<3xf32>
    %149 = vector.shape_cast %148 : vector<3xf32> to vector<3x1xf32>
    %150 = tpu.concatenate %143, %146, %149 in 1 : vector<3x1xf32>, vector<3x1xf32>, vector<3x1xf32> -> vector<3x3xf32>
    %cst_68 = arith.constant 0.000000e+00 : f32
    %151 = vector.broadcast %cst_68 : f32 to vector<1x3xf32>
    %cst_69 = arith.constant 0.000000e+00 : f32
    %152 = vector.broadcast %cst_69 : f32 to vector<5x1xf32>
    %153 = tpu.concatenate %151, %150, %151 in 0 : vector<1x3xf32>, vector<3x3xf32>, vector<1x3xf32> -> vector<5x3xf32>
    %154 = tpu.concatenate %152, %153, %152 in 1 : vector<5x1xf32>, vector<5x3xf32>, vector<5x1xf32> -> vector<5x5xf32>
    %155 = tpu.concatenate %79, %104, %129, %154 in 0 : vector<5x5xf32>, vector<5x5xf32>, vector<5x5xf32>, vector<5x5xf32> -> vector<20x5xf32>
    %cst_70 = arith.constant 0.000000e+00 : f32
    %156 = vector.broadcast %cst_70 : f32 to vector<12x3xf32>
    %c0_71 = arith.constant 0 : index
    %c0_72 = arith.constant 0 : index
    %c0_73 = arith.constant 0 : index
    %157 = vector.load %arg6[%c0_71, %c0_72, %c0_73] : memref<9x12x20xf32, #tpu.memory_space<vmem>>, vector<1x12x20xf32>
    %158 = vector.shape_cast %157 : vector<1x12x20xf32> to vector<12x20xf32>
    %159 = vector.extract_strided_slice %155 {offsets = [0, 0], sizes = [20, 3], strides = [1, 1]} : vector<20x5xf32> to vector<20x3xf32>
    %cst_74 = arith.constant dense<0.000000e+00> : vector<12x3xf32>
    %160 = tpu.matmul %158, %159, %cst_74 {dimension_numbers = #tpu.dot_dimension_numbers<[1], [0], [0], [1], [0, 0, 1, 1], [], []>} : vector<12x20xf32>, vector<20x3xf32>, vector<12x3xf32> -> vector<12x3xf32>
    %161 = arith.addf %156, %160 : vector<12x3xf32>
    %c1_75 = arith.constant 1 : index
    %c0_76 = arith.constant 0 : index
    %c0_77 = arith.constant 0 : index
    %162 = vector.load %arg6[%c1_75, %c0_76, %c0_77] : memref<9x12x20xf32, #tpu.memory_space<vmem>>, vector<1x12x20xf32>
    %163 = vector.shape_cast %162 : vector<1x12x20xf32> to vector<12x20xf32>
    %164 = vector.extract_strided_slice %155 {offsets = [0, 1], sizes = [20, 3], strides = [1, 1]} : vector<20x5xf32> to vector<20x3xf32>
    %cst_78 = arith.constant dense<0.000000e+00> : vector<12x3xf32>
    %165 = tpu.matmul %163, %164, %cst_78 {dimension_numbers = #tpu.dot_dimension_numbers<[1], [0], [0], [1], [0, 0, 1, 1], [], []>} : vector<12x20xf32>, vector<20x3xf32>, vector<12x3xf32> -> vector<12x3xf32>
    %166 = arith.addf %161, %165 : vector<12x3xf32>
    %c2_79 = arith.constant 2 : index
    %c0_80 = arith.constant 0 : index
    %c0_81 = arith.constant 0 : index
    %167 = vector.load %arg6[%c2_79, %c0_80, %c0_81] : memref<9x12x20xf32, #tpu.memory_space<vmem>>, vector<1x12x20xf32>
    %168 = vector.shape_cast %167 : vector<1x12x20xf32> to vector<12x20xf32>
    %169 = vector.extract_strided_slice %155 {offsets = [0, 2], sizes = [20, 3], strides = [1, 1]} : vector<20x5xf32> to vector<20x3xf32>
    %cst_82 = arith.constant dense<0.000000e+00> : vector<12x3xf32>
    %170 = tpu.matmul %168, %169, %cst_82 {dimension_numbers = #tpu.dot_dimension_numbers<[1], [0], [0], [1], [0, 0, 1, 1], [], []>} : vector<12x20xf32>, vector<20x3xf32>, vector<12x3xf32> -> vector<12x3xf32>
    %171 = arith.addf %166, %170 : vector<12x3xf32>
    %c3_83 = arith.constant 3 : index
    %c0_84 = arith.constant 0 : index
    %c0_85 = arith.constant 0 : index
    %172 = vector.load %arg6[%c3_83, %c0_84, %c0_85] : memref<9x12x20xf32, #tpu.memory_space<vmem>>, vector<1x12x20xf32>
    %173 = vector.shape_cast %172 : vector<1x12x20xf32> to vector<12x20xf32>
    %174 = vector.extract_strided_slice %155 {offsets = [0, 0], sizes = [20, 3], strides = [1, 1]} : vector<20x5xf32> to vector<20x3xf32>
    %cst_86 = arith.constant dense<0.000000e+00> : vector<12x3xf32>
    %175 = tpu.matmul %173, %174, %cst_86 {dimension_numbers = #tpu.dot_dimension_numbers<[1], [0], [0], [1], [0, 0, 1, 1], [], []>} : vector<12x20xf32>, vector<20x3xf32>, vector<12x3xf32> -> vector<12x3xf32>
    %176 = arith.addf %171, %175 : vector<12x3xf32>
    %c4_87 = arith.constant 4 : index
    %c0_88 = arith.constant 0 : index
    %c0_89 = arith.constant 0 : index
    %177 = vector.load %arg6[%c4_87, %c0_88, %c0_89] : memref<9x12x20xf32, #tpu.memory_space<vmem>>, vector<1x12x20xf32>
    %178 = vector.shape_cast %177 : vector<1x12x20xf32> to vector<12x20xf32>
    %179 = vector.extract_strided_slice %155 {offsets = [0, 1], sizes = [20, 3], strides = [1, 1]} : vector<20x5xf32> to vector<20x3xf32>
    %cst_90 = arith.constant dense<0.000000e+00> : vector<12x3xf32>
    %180 = tpu.matmul %178, %179, %cst_90 {dimension_numbers = #tpu.dot_dimension_numbers<[1], [0], [0], [1], [0, 0, 1, 1], [], []>} : vector<12x20xf32>, vector<20x3xf32>, vector<12x3xf32> -> vector<12x3xf32>
    %181 = arith.addf %176, %180 : vector<12x3xf32>
    %c5_91 = arith.constant 5 : index
    %c0_92 = arith.constant 0 : index
    %c0_93 = arith.constant 0 : index
    %182 = vector.load %arg6[%c5_91, %c0_92, %c0_93] : memref<9x12x20xf32, #tpu.memory_space<vmem>>, vector<1x12x20xf32>
    %183 = vector.shape_cast %182 : vector<1x12x20xf32> to vector<12x20xf32>
    %184 = vector.extract_strided_slice %155 {offsets = [0, 2], sizes = [20, 3], strides = [1, 1]} : vector<20x5xf32> to vector<20x3xf32>
    %cst_94 = arith.constant dense<0.000000e+00> : vector<12x3xf32>
    %185 = tpu.matmul %183, %184, %cst_94 {dimension_numbers = #tpu.dot_dimension_numbers<[1], [0], [0], [1], [0, 0, 1, 1], [], []>} : vector<12x20xf32>, vector<20x3xf32>, vector<12x3xf32> -> vector<12x3xf32>
    %186 = arith.addf %181, %185 : vector<12x3xf32>
    %c6_95 = arith.constant 6 : index
    %c0_96 = arith.constant 0 : index
    %c0_97 = arith.constant 0 : index
    %187 = vector.load %arg6[%c6_95, %c0_96, %c0_97] : memref<9x12x20xf32, #tpu.memory_space<vmem>>, vector<1x12x20xf32>
    %188 = vector.shape_cast %187 : vector<1x12x20xf32> to vector<12x20xf32>
    %189 = vector.extract_strided_slice %155 {offsets = [0, 0], sizes = [20, 3], strides = [1, 1]} : vector<20x5xf32> to vector<20x3xf32>
    %cst_98 = arith.constant dense<0.000000e+00> : vector<12x3xf32>
    %190 = tpu.matmul %188, %189, %cst_98 {dimension_numbers = #tpu.dot_dimension_numbers<[1], [0], [0], [1], [0, 0, 1, 1], [], []>} : vector<12x20xf32>, vector<20x3xf32>, vector<12x3xf32> -> vector<12x3xf32>
    %191 = arith.addf %186, %190 : vector<12x3xf32>
    %c7_99 = arith.constant 7 : index
    %c0_100 = arith.constant 0 : index
    %c0_101 = arith.constant 0 : index
    %192 = vector.load %arg6[%c7_99, %c0_100, %c0_101] : memref<9x12x20xf32, #tpu.memory_space<vmem>>, vector<1x12x20xf32>
    %193 = vector.shape_cast %192 : vector<1x12x20xf32> to vector<12x20xf32>
    %194 = vector.extract_strided_slice %155 {offsets = [0, 1], sizes = [20, 3], strides = [1, 1]} : vector<20x5xf32> to vector<20x3xf32>
    %cst_102 = arith.constant dense<0.000000e+00> : vector<12x3xf32>
    %195 = tpu.matmul %193, %194, %cst_102 {dimension_numbers = #tpu.dot_dimension_numbers<[1], [0], [0], [1], [0, 0, 1, 1], [], []>} : vector<12x20xf32>, vector<20x3xf32>, vector<12x3xf32> -> vector<12x3xf32>
    %196 = arith.addf %191, %195 : vector<12x3xf32>
    %c8_103 = arith.constant 8 : index
    %c0_104 = arith.constant 0 : index
    %c0_105 = arith.constant 0 : index
    %197 = vector.load %arg6[%c8_103, %c0_104, %c0_105] : memref<9x12x20xf32, #tpu.memory_space<vmem>>, vector<1x12x20xf32>
    %198 = vector.shape_cast %197 : vector<1x12x20xf32> to vector<12x20xf32>
    %199 = vector.extract_strided_slice %155 {offsets = [0, 2], sizes = [20, 3], strides = [1, 1]} : vector<20x5xf32> to vector<20x3xf32>
    %cst_106 = arith.constant dense<0.000000e+00> : vector<12x3xf32>
    %200 = tpu.matmul %198, %199, %cst_106 {dimension_numbers = #tpu.dot_dimension_numbers<[1], [0], [0], [1], [0, 0, 1, 1], [], []>} : vector<12x20xf32>, vector<20x3xf32>, vector<12x3xf32> -> vector<12x3xf32>
    %201 = arith.addf %196, %200 : vector<12x3xf32>
    %c0_107 = arith.constant 0 : index
    %c0_108 = arith.constant 0 : index
    %202 = vector.load %arg7[%c0_107, %c0_108] : memref<12x1xf32, #tpu.memory_space<vmem>>, vector<12x1xf32>
    %203 = vector.broadcast %202 : vector<12x1xf32> to vector<12x3xf32>
    %204 = arith.addf %201, %203 : vector<12x3xf32>
    %c0_109 = arith.constant 0 : index
    %c0_110 = arith.constant 0 : index
    %c0_111 = arith.constant 0 : index
    %205 = vector.load %arg8[%c0_109, %c0_110, %c0_111] : memref<3x4x12xf32, #tpu.memory_space<vmem>>, vector<1x4x12xf32>
    %206 = vector.shape_cast %205 : vector<1x4x12xf32> to vector<4x12xf32>
    %cst_112 = arith.constant dense<0.000000e+00> : vector<4x3xf32>
    %207 = tpu.matmul %206, %204, %cst_112 {dimension_numbers = #tpu.dot_dimension_numbers<[1], [0], [0], [1], [0, 0, 1, 1], [], []>} : vector<4x12xf32>, vector<12x3xf32>, vector<4x3xf32> -> vector<4x3xf32>
    %c0_113 = arith.constant 0 : index
    %c0_114 = arith.constant 0 : index
    %c0_115 = arith.constant 0 : index
    %208 = vector.load %arg9[%c0_113, %c0_114, %c0_115] : memref<3x3x1024xf32, #tpu.memory_space<vmem>>, vector<1x3x1024xf32>
    %209 = vector.shape_cast %208 : vector<1x3x1024xf32> to vector<3x1024xf32>
    %cst_116 = arith.constant dense<0.000000e+00> : vector<4x1024xf32>
    %210 = tpu.matmul %207, %209, %cst_116 {dimension_numbers = #tpu.dot_dimension_numbers<[1], [0], [0], [1], [0, 0, 1, 1], [], []>} : vector<4x3xf32>, vector<3x1024xf32>, vector<4x1024xf32> -> vector<4x1024xf32>
    %c1_117 = arith.constant 1 : index
    %c0_118 = arith.constant 0 : index
    %c0_119 = arith.constant 0 : index
    %211 = vector.load %arg8[%c1_117, %c0_118, %c0_119] : memref<3x4x12xf32, #tpu.memory_space<vmem>>, vector<1x4x12xf32>
    %212 = vector.shape_cast %211 : vector<1x4x12xf32> to vector<4x12xf32>
    %cst_120 = arith.constant dense<0.000000e+00> : vector<4x3xf32>
    %213 = tpu.matmul %212, %204, %cst_120 {dimension_numbers = #tpu.dot_dimension_numbers<[1], [0], [0], [1], [0, 0, 1, 1], [], []>} : vector<4x12xf32>, vector<12x3xf32>, vector<4x3xf32> -> vector<4x3xf32>
    %c1_121 = arith.constant 1 : index
    %c0_122 = arith.constant 0 : index
    %c0_123 = arith.constant 0 : index
    %214 = vector.load %arg9[%c1_121, %c0_122, %c0_123] : memref<3x3x1024xf32, #tpu.memory_space<vmem>>, vector<1x3x1024xf32>
    %215 = vector.shape_cast %214 : vector<1x3x1024xf32> to vector<3x1024xf32>
    %cst_124 = arith.constant dense<0.000000e+00> : vector<4x1024xf32>
    %216 = tpu.matmul %213, %215, %cst_124 {dimension_numbers = #tpu.dot_dimension_numbers<[1], [0], [0], [1], [0, 0, 1, 1], [], []>} : vector<4x3xf32>, vector<3x1024xf32>, vector<4x1024xf32> -> vector<4x1024xf32>
    %217 = arith.addf %210, %216 : vector<4x1024xf32>
    %c2_125 = arith.constant 2 : index
    %c0_126 = arith.constant 0 : index
    %c0_127 = arith.constant 0 : index
    %218 = vector.load %arg8[%c2_125, %c0_126, %c0_127] : memref<3x4x12xf32, #tpu.memory_space<vmem>>, vector<1x4x12xf32>
    %219 = vector.shape_cast %218 : vector<1x4x12xf32> to vector<4x12xf32>
    %cst_128 = arith.constant dense<0.000000e+00> : vector<4x3xf32>
    %220 = tpu.matmul %219, %204, %cst_128 {dimension_numbers = #tpu.dot_dimension_numbers<[1], [0], [0], [1], [0, 0, 1, 1], [], []>} : vector<4x12xf32>, vector<12x3xf32>, vector<4x3xf32> -> vector<4x3xf32>
    %c2_129 = arith.constant 2 : index
    %c0_130 = arith.constant 0 : index
    %c0_131 = arith.constant 0 : index
    %221 = vector.load %arg9[%c2_129, %c0_130, %c0_131] : memref<3x3x1024xf32, #tpu.memory_space<vmem>>, vector<1x3x1024xf32>
    %222 = vector.shape_cast %221 : vector<1x3x1024xf32> to vector<3x1024xf32>
    %cst_132 = arith.constant dense<0.000000e+00> : vector<4x1024xf32>
    %223 = tpu.matmul %220, %222, %cst_132 {dimension_numbers = #tpu.dot_dimension_numbers<[1], [0], [0], [1], [0, 0, 1, 1], [], []>} : vector<4x3xf32>, vector<3x1024xf32>, vector<4x1024xf32> -> vector<4x1024xf32>
    %224 = arith.addf %217, %223 : vector<4x1024xf32>
    %c0_133 = arith.constant 0 : index
    %c0_134 = arith.constant 0 : index
    %c0_135 = arith.constant 0 : index
    %225 = vector.load %arg10[%c0_133, %c0_134, %c0_135] : memref<1x4x1024xf32, #tpu.memory_space<vmem>>, vector<1x4x1024xf32>
    %226 = vector.shape_cast %225 : vector<1x4x1024xf32> to vector<4x1024xf32>
    %227 = vector.shape_cast %224 : vector<4x1024xf32> to vector<1x4x1024xf32>
    tpu.vector_store %arg10[%c0_133, %c0_134, %c0_135], %227 {strides = array<i32>} : memref<1x4x1024xf32, #tpu.memory_space<vmem>>, vector<1x4x1024xf32>,
    return
  }
  func.func @transform_0(%arg0: i32) -> (i32, i32, i32) {
    %c0_i32 = arith.constant 0 : i32
    %c0_i32_0 = arith.constant 0 : i32
    %c0_i32_1 = arith.constant 0 : i32
    return %arg0, %c0_i32, %c0_i32_0 : i32, i32, i32
  }
  func.func @transform_1(%arg0: i32) -> (i32, i32) {
    %c0_i32 = arith.constant 0 : i32
    %c0_i32_0 = arith.constant 0 : i32
    %c0_i32_1 = arith.constant 0 : i32
    return %c0_i32, %c0_i32_0 : i32, i32
  }
  func.func @transform_2(%arg0: i32) -> (i32, i32) {
    %c0_i32 = arith.constant 0 : i32
    %c0_i32_0 = arith.constant 0 : i32
    %c0_i32_1 = arith.constant 0 : i32
    return %c0_i32, %c0_i32_0 : i32, i32
  }
  func.func @transform_3(%arg0: i32) -> (i32, i32, i32) {
    %c0_i32 = arith.constant 0 : i32
    %c0_i32_0 = arith.constant 0 : i32
    %c0_i32_1 = arith.constant 0 : i32
    %c0_i32_2 = arith.constant 0 : i32
    return %c0_i32, %c0_i32_0, %c0_i32_1 : i32, i32, i32
  }
  func.func @transform_4(%arg0: i32) -> (i32, i32) {
    %c0_i32 = arith.constant 0 : i32
    %c0_i32_0 = arith.constant 0 : i32
    %c0_i32_1 = arith.constant 0 : i32
    return %c0_i32, %c0_i32_0 : i32, i32
  }
  func.func @transform_5(%arg0: i32) -> (i32, i32, i32) {
    %c0_i32 = arith.constant 0 : i32
    %c0_i32_0 = arith.constant 0 : i32
    %c0_i32_1 = arith.constant 0 : i32
    %c0_i32_2 = arith.constant 0 : i32
    return %c0_i32, %c0_i32_0, %c0_i32_1 : i32, i32, i32
  }
  func.func @transform_6(%arg0: i32) -> (i32, i32) {
    %c0_i32 = arith.constant 0 : i32
    %c0_i32_0 = arith.constant 0 : i32
    %c0_i32_1 = arith.constant 0 : i32
    return %c0_i32, %c0_i32_0 : i32, i32
  }
  func.func @transform_7(%arg0: i32) -> (i32, i32, i32) {
    %c0_i32 = arith.constant 0 : i32
    %c0_i32_0 = arith.constant 0 : i32
    %c0_i32_1 = arith.constant 0 : i32
    %c0_i32_2 = arith.constant 0 : i32
    return %c0_i32, %c0_i32_0, %c0_i32_1 : i32, i32, i32
  }
  func.func @transform_8(%arg0: i32) -> (i32, i32, i32) {
    %c0_i32 = arith.constant 0 : i32
    %c0_i32_0 = arith.constant 0 : i32
    %c0_i32_1 = arith.constant 0 : i32
    %c0_i32_2 = arith.constant 0 : i32
    return %c0_i32, %c0_i32_0, %c0_i32_1 : i32, i32, i32
  }
  func.func @transform_9(%arg0: i32) -> (i32, i32, i32) {
    %c0_i32 = arith.constant 0 : i32
    %c0_i32_0 = arith.constant 0 : i32
    %c0_i32_1 = arith.constant 0 : i32
    return %arg0, %c0_i32, %c0_i32_0 : i32, i32, i32
  }
}

module attributes {stable_mosaic.version = 11 : i64} {
  func.func @_final_kernel(%arg0: i32, %arg1: i32, %arg2: memref<1x8x1024xf32, #tpu.memory_space<vmem>>, %arg3: memref<1x4x1024xf32, #tpu.memory_space<vmem>>, %arg4: memref<8x8xf32, #tpu.memory_space<vmem>>, %arg5: memref<8x4xf32, #tpu.memory_space<vmem>>, %arg6: memref<8x1xf32, #tpu.memory_space<vmem>>, %arg7: memref<1x8x1024xf32, #tpu.memory_space<vmem>>) attributes {dimension_semantics = [#tpu.dimension_semantics<parallel>, #tpu.dimension_semantics<parallel>], iteration_bounds = array<i64: 2, 1>, scalar_prefetch = 0 : i64, scratch_operands = 0 : i64, tpu.core_type = #tpu.core_type<tc>, window_params = [{transform_indices = @transform_0, window_bounds = array<i64: 1, 8, 1024>}, {transform_indices = @transform_1, window_bounds = array<i64: 1, 4, 1024>}, {pipeline_mode = #tpu.pipeline_mode<synchronous>, transform_indices = @transform_2, window_bounds = array<i64: 8, 8>}, {pipeline_mode = #tpu.pipeline_mode<synchronous>, transform_indices = @transform_3, window_bounds = array<i64: 8, 4>}, {pipeline_mode = #tpu.pipeline_mode<synchronous>, transform_indices = @transform_4, window_bounds = array<i64: 8, 1>}, {transform_indices = @transform_5, window_bounds = array<i64: 1, 8, 1024>}]} {
    %c0 = arith.constant 0 : index
    %c0_0 = arith.constant 0 : index
    %c0_1 = arith.constant 0 : index
    %0 = vector.load %arg2[%c0, %c0_0, %c0_1] : memref<1x8x1024xf32, #tpu.memory_space<vmem>>, vector<1x8x1024xf32>
    %1 = vector.shape_cast %0 : vector<1x8x1024xf32> to vector<8x1024xf32>
    %c0_2 = arith.constant 0 : index
    %c0_3 = arith.constant 0 : index
    %2 = vector.load %arg4[%c0_2, %c0_3] : memref<8x8xf32, #tpu.memory_space<vmem>>, vector<8x8xf32>
    %cst = arith.constant dense<0.000000e+00> : vector<8x1024xf32>
    %3 = tpu.matmul %2, %1, %cst {dimension_numbers = #tpu.dot_dimension_numbers<[1], [0], [0], [1], [0, 0, 1, 1], [], []>} : vector<8x8xf32>, vector<8x1024xf32>, vector<8x1024xf32> -> vector<8x1024xf32>
    %c0_4 = arith.constant 0 : index
    %c0_5 = arith.constant 0 : index
    %4 = vector.load %arg5[%c0_4, %c0_5] : memref<8x4xf32, #tpu.memory_space<vmem>>, vector<8x4xf32>
    %c0_6 = arith.constant 0 : index
    %c0_7 = arith.constant 0 : index
    %c0_8 = arith.constant 0 : index
    %5 = vector.load %arg3[%c0_6, %c0_7, %c0_8] : memref<1x4x1024xf32, #tpu.memory_space<vmem>>, vector<1x4x1024xf32>
    %6 = vector.shape_cast %5 : vector<1x4x1024xf32> to vector<4x1024xf32>
    %cst_9 = arith.constant dense<0.000000e+00> : vector<8x1024xf32>
    %7 = tpu.matmul %4, %6, %cst_9 {dimension_numbers = #tpu.dot_dimension_numbers<[1], [0], [0], [1], [0, 0, 1, 1], [], []>} : vector<8x4xf32>, vector<4x1024xf32>, vector<8x1024xf32> -> vector<8x1024xf32>
    %8 = arith.addf %3, %7 : vector<8x1024xf32>
    %c0_10 = arith.constant 0 : index
    %c0_11 = arith.constant 0 : index
    %9 = vector.load %arg6[%c0_10, %c0_11] : memref<8x1xf32, #tpu.memory_space<vmem>>, vector<8x1xf32>
    %10 = vector.broadcast %9 : vector<8x1xf32> to vector<8x1024xf32>
    %11 = arith.addf %8, %10 : vector<8x1024xf32>
    %12 = arith.negf %11 : vector<8x1024xf32>
    %13 = math.exp %12 : vector<8x1024xf32>
    %cst_12 = arith.constant 1.000000e+00 : f32
    %14 = vector.broadcast %cst_12 : f32 to vector<8x1024xf32>
    %15 = arith.addf %14, %13 : vector<8x1024xf32>
    %16 = arith.divf %14, %15 : vector<8x1024xf32>
    %17 = arith.mulf %1, %16 : vector<8x1024xf32>
    %c0_13 = arith.constant 0 : index
    %c0_14 = arith.constant 0 : index
    %c0_15 = arith.constant 0 : index
    %18 = vector.load %arg7[%c0_13, %c0_14, %c0_15] : memref<1x8x1024xf32, #tpu.memory_space<vmem>>, vector<1x8x1024xf32>
    %19 = vector.shape_cast %18 : vector<1x8x1024xf32> to vector<8x1024xf32>
    %20 = vector.shape_cast %17 : vector<8x1024xf32> to vector<1x8x1024xf32>
    tpu.vector_store %arg7[%c0_13, %c0_14, %c0_15], %20 {strides = array<i32>} : memref<1x8x1024xf32, #tpu.memory_space<vmem>>, vector<1x8x1024xf32>,
    return
  }
  func.func @transform_0(%arg0: i32, %arg1: i32) -> (i32, i32, i32) {
    %c0_i32 = arith.constant 0 : i32
    %c0_i32_0 = arith.constant 0 : i32
    return %arg0, %c0_i32, %arg1 : i32, i32, i32
  }
  func.func @transform_1(%arg0: i32, %arg1: i32) -> (i32, i32, i32) {
    %c0_i32 = arith.constant 0 : i32
    %c0_i32_0 = arith.constant 0 : i32
    return %arg0, %c0_i32, %arg1 : i32, i32, i32
  }
  func.func @transform_2(%arg0: i32, %arg1: i32) -> (i32, i32) {
    %c0_i32 = arith.constant 0 : i32
    %c0_i32_0 = arith.constant 0 : i32
    %c0_i32_1 = arith.constant 0 : i32
    return %c0_i32, %c0_i32_0 : i32, i32
  }
  func.func @transform_3(%arg0: i32, %arg1: i32) -> (i32, i32) {
    %c0_i32 = arith.constant 0 : i32
    %c0_i32_0 = arith.constant 0 : i32
    %c0_i32_1 = arith.constant 0 : i32
    return %c0_i32, %c0_i32_0 : i32, i32
  }
  func.func @transform_4(%arg0: i32, %arg1: i32) -> (i32, i32) {
    %c0_i32 = arith.constant 0 : i32
    %c0_i32_0 = arith.constant 0 : i32
    %c0_i32_1 = arith.constant 0 : i32
    return %c0_i32, %c0_i32_0 : i32, i32
  }
  func.func @transform_5(%arg0: i32, %arg1: i32) -> (i32, i32, i32) {
    %c0_i32 = arith.constant 0 : i32
    %c0_i32_0 = arith.constant 0 : i32
    return %arg0, %c0_i32, %arg1 : i32, i32, i32
  }
}

</mosaic_0001>

<bundles_post_ra>
// kernel: esa_forward.3
= control target key start
LH: loop header
LB: loop body
LE: loop exit
PB: predicated region body
PF: predicated region fallthrough
CT: control target
= control target key end

     0   :  { %s1257_s18 = smov 0   ;;  %s1259_s19 = smov 0   ;;  %s1358_s0 = inlined_call_operand.vmem [shape: f32[2,8,1024], index: 0, kind: input, shape index: {}]   ;;  %s1359_s1 = inlined_call_operand.vmem [shape: f32[2,4,1024], index: 1, kind: input, shape index: {}]   ;;  %s1360_s2 = inlined_call_operand.vmem [shape: f32[8,8], index: 2, kind: input, shape index: {}]   ;;  %s1361_s3 = inlined_call_operand.vmem [shape: f32[8,4], index: 3, kind: input, shape index: {}]   ;;  %s1362_s4 = inlined_call_operand.vmem [shape: f32[8,1], index: 4, kind: input, shape index: {}]   ;;  %s1363_s5 = inlined_call_operand.vmem [shape: f32[2,8,1024], index: 5, kind: output, shape index: {}]  }
   0x1   :  { %s1261_s20 = smov 0  }
   0x2 LB: > { %s27_s21 = sadd.s32 1, %s1219_s19  ;;  %p1102_p0 = scmp.ge.s32.totalorder %s1223_s20, 1  ;;  %s1223_s20 = sphi %s1261_s20, %s15_s20   ;;  %s1219_s19 = sphi %s1259_s19, %s1365_s19   ;;  %s1215_s18 = sphi %s1257_s18, %s1364_s18  }
   0x3   : > { %p29_p1 = scmp.ge.s32.totalorder %s27_s21, 2  ;;  %p225_p2 = scmp.lt.s32.totalorder %s1223_s20, 3 }
   0x5   : > { %s1367_s21 = smov (%p29_p1, %s27_s21), 0  ;;  %p226_p3 = pnand %p1102_p0, %p225_p2 }
   0x6   : > { %p271_p4 = scmp.lt.s32.totalorder (!%p226_p3), %s1215_s18, 1 }
   0x7   : > { %229 = sbr.rel (%p226_p3) target bundleno = 268 (0x10c), region = 40 }
   0xc   : > { %v1225_v0 = vmov 0.0   ;;  %v915_v1 = vld [vmem:[%s1362_s4] sm:$0xff]  ;;  %s1369_s18 = smov (!%p271_p4, %s1215_s18), 1  ;;  %v1226_v2 = vmov 0   ;;  %vm326_vm0 = vcmask 1043456   ;;  %vm322_vm1 = vcmask 31744  }
   0xd   : > { %407 = vmatprep.mubr.f32.mxu0 %v1225_v0  ;;  %478 = vmatprep.mubr.f32.mxu1 %v1225_v0  ;;  %s1136_s24 = sshll.u32 %s1369_s18, 5  ;;  %s1135_s28 = sshll.u32 %s1369_s18, 6  ;;  %v309_v9 = vld [vmem:[%s1361_s3] sm:$0xff]  ;;  %vm627_vm2 = vcmask 64512  }
   0xe   : > { %1164 = vset.pattern.permute.xlu0 %v1226_v2  ;;  %s288_s27 = scalar_lea.vmem %s1359_s1, %s1136_s24  ;;  %s278_s8 = scalar_lea.vmem %s1358_s0, %s1135_s28  ;;  %v308_v16 = vld [vmem:[%s1360_s2] sm:$0xff] }
   0xf   : > { %918 = vperm.xlu0 %1164, %v915_v1   ;;  %v310_v3 = vld [vmem:[%s288_s27] sm:$0xff]  ;;  %v311_v4 = vld [vmem:[%s288_s27 + $0x8] sm:$0xff]  ;;  %v312_v5 = vld [vmem:[%s288_s27 + $0x10] sm:$0xff]  ;;  %s298_s13 = scalar_lea.vmem %s1363_s5, %s1135_s28 }
  0x10   : > { %v318_v6 = vcombine.high %v310_v3, %v310_v3  ;;  %v319_v7 = vcombine.high %v311_v4, %v311_v4  ;;  %v313_v8 = vld [vmem:[%s288_s27 + $0x18] sm:$0xff]  ;;  %v320_v10 = vcombine.high %v312_v5, %v312_v5  ;;  %v1303_v12 = vld [vmem:[%s278_s8 + $0x8] sm:$0xff]  ;;  %v1307_v14 = vld [vmem:[%s278_s8] sm:$0xff] }
  0x11   : > { %v321_v11 = vcombine.high %v313_v8, %v313_v8  ;;  %v1305_v13 = vld [vmem:[%s278_s8 + $0x18] sm:$0xff]  ;;  %v1309_v15 = vld [vmem:[%s278_s8 + $0x10] sm:$0xff]  ;;  %v1320_v17 = vld [vmem:[%s278_s8 + $0x28] sm:$0xff] }
  0x12   : > { %1109 = vmatprep.subr.msk.mxu0 %vm326_vm0, %v318_v6  ;;  %1112 = vmatprep.subr.msk.mxu1 %vm326_vm0, %v319_v7  ;;  %v1322_v18 = vld [vmem:[%s278_s8 + $0x38] sm:$0xff]  ;;  %v1324_v19 = vld [vmem:[%s278_s8 + $0x20] sm:$0xff]  ;;  %v1326_v20 = vld [vmem:[%s278_s8 + $0x30] sm:$0xff] }
  0x13   : > { %1110 = vmatpush1.msk.msra.mxu0 %vm326_vm0, %v310_v3  ;;  %1113 = vmatpush1.msk.msra.mxu1 %vm326_vm0, %v311_v4 }
  0x14   : > { %1111 = vmatmul.mubr.msk.f32.vlgmr.msra.gmra.mxu0 %vm322_vm1, %v309_v9  ;;  %1114 = vmatmul.mubr.msk.f32.vlgmr.msra.gmra.mxu1 %vm322_vm1, %v309_v9 }
  0x15   : > { %1115 = vmatprep.subr.msk.mxu0 %vm326_vm0, %v320_v10  ;;  %1118 = vmatprep.subr.msk.mxu1 %vm326_vm0, %v321_v11 }
  0x16   : > { %1116 = vmatpush1.msk.msra.mxu0 %vm326_vm0, %v312_v5  ;;  %1119 = vmatpush1.msk.msra.mxu1 %vm326_vm0, %v313_v8 }
  0x17   : > { %549 = vmatprep.mubr.f32.mxu0 %v1225_v0  ;;  %620 = vmatprep.mubr.f32.mxu1 %v1225_v0 }
  0x18   : > { %1117 = vmatmul.mubr.msk.f32.vlgmr.msra.gmra.mxu0 %vm322_vm1, %v309_v9  ;;  %1120 = vmatmul.mubr.msk.f32.vlgmr.msra.gmra.mxu1 %vm322_vm1, %v309_v9 }
  0x19   : > { %661 = vmatprep.subr.mxu0 %v1303_v12  ;;  %732 = vmatprep.subr.mxu1 %v1305_v13 }
  0x1a   : > { %662 = vmatpush1.msra.mxu0 %v1307_v14  ;;  %733 = vmatpush1.msra.mxu1 %v1309_v15 }
  0x1b   : > { %695 = vmatprep.mubr.f32.mxu0 %v1225_v0  ;;  %766 = vmatprep.mubr.f32.mxu1 %v1225_v0 }
  0x1c   : > { %1121 = vmatmul.mubr.msk.f32.vlgmr.msra.gmra.mxu0 %vm627_vm2, %v308_v16  ;;  %1122 = vmatmul.mubr.msk.f32.vlgmr.msra.gmra.mxu1 %vm627_vm2, %v308_v16 }
  0x1d   : > { %803 = vmatprep.subr.mxu0 %v1320_v17  ;;  %874 = vmatprep.subr.mxu1 %v1322_v18 }
  0x1e   : > { %804 = vmatpush1.msra.mxu0 %v1324_v19  ;;  %875 = vmatpush1.msra.mxu1 %v1326_v20 }
  0x1f   : > { %837 = vmatprep.mubr.f32.mxu0 %v1225_v0  ;;  %908 = vmatprep.mubr.f32.mxu1 %v1225_v0 }
  0x20   : > { %1123 = vmatmul.mubr.msk.f32.vlgmr.msra.gmra.mxu0 %vm627_vm2, %v308_v16  ;;  %1124 = vmatmul.mubr.msk.f32.vlgmr.msra.gmra.mxu1 %vm627_vm2, %v308_v16 }
  0x8a   : > { %v919_v29 = vpop.permute.xlu0 %918 }
  0xd4   : > { %v409_v21 = vpop.f32.mrf.mxu0  ;;  %v480_v22 = vpop.f32.mrf.mxu1 }
  0xd6   : > { %v411_v23 = vpop.f32.mrf.mxu0  ;;  %v482_v24 = vpop.f32.mrf.mxu1 }
  0xd8   : > { %v551_v25 = vpop.f32.mrf.mxu0  ;;  %v622_v26 = vpop.f32.mrf.mxu1 }
  0xda   : > { %v553_v27 = vpop.f32.mrf.mxu0  ;;  %v624_v28 = vpop.f32.mrf.mxu1 }
  0xdc   : > { %v697_v30 = vpop.f32.mrf.mxu0  ;;  %v768_v31 = vpop.f32.mrf.mxu1 }
  0xdd   : > { %v698_v32 = vadd.f32 %v697_v30, %v409_v21  ;;  %v769_v33 = vadd.f32 %v768_v31, %v480_v22 }
  0xde   : > { %v699_v34 = vpop.f32.mrf.mxu0  ;;  %v770_v35 = vpop.f32.mrf.mxu1 }
  0xdf   : > { %v921_v36 = vadd.f32 %v919_v29, %v698_v32  ;;  %v923_v37 = vadd.f32 %v919_v29, %v769_v33  ;;  %v700_v38 = vadd.f32 %v699_v34, %v411_v23  ;;  %v771_v39 = vadd.f32 %v770_v35, %v482_v24 }
  0xe0   : > { %v839_v40 = vpop.f32.mrf.mxu0  ;;  %v910_v41 = vpop.f32.mrf.mxu1 }
  0xe1   : > { %v1125_v42 = vmul.f32 -1.442695, %v921_v36  ;;  %v1127_v43 = vmul.f32 -1.442695, %v923_v37  ;;  %v922_v44 = vadd.f32 %v919_v29, %v700_v38  ;;  %v924_v45 = vadd.f32 %v919_v29, %v771_v39 }
  0xe2   : > { %v840_v46 = vadd.f32 %v839_v40, %v551_v25  ;;  %v911_v47 = vadd.f32 %v910_v41, %v622_v26  ;;  %v841_v48 = vpop.f32.mrf.mxu0  ;;  %v912_v49 = vpop.f32.mrf.mxu1 }
  0xe3   : > { %1169 = vpow2.f32 %v1125_v42  ;;  %v1126_v50 = vmul.f32 -1.442695, %v922_v44  ;;  %v1128_v51 = vmul.f32 -1.442695, %v924_v45  ;;  %v842_v52 = vadd.f32 %v841_v48, %v553_v27 }
  0xe4   : > { %1171 = vpow2.f32 %v1127_v43  ;;  %v925_v53 = vadd.f32 %v919_v29, %v840_v46  ;;  %v927_v54 = vadd.f32 %v919_v29, %v911_v47  ;;  %v913_v55 = vadd.f32 %v912_v49, %v624_v28 }
  0xe5   : > { %1173 = vpow2.f32 %v1126_v50  ;;  %v926_v56 = vadd.f32 %v919_v29, %v842_v52 }
  0xe6   : > { %1175 = vpow2.f32 %v1128_v51  ;;  %v1129_v57 = vmul.f32 -1.442695, %v925_v53  ;;  %v1131_v58 = vmul.f32 -1.442695, %v927_v54  ;;  %v928_v59 = vadd.f32 %v919_v29, %v913_v55 }
  0xe7   : > { %v1130_v60 = vmul.f32 -1.442695, %v926_v56 }
  0xe8   : > { %1177 = vpow2.f32 %v1129_v57  ;;  %v1132_v61 = vmul.f32 -1.442695, %v928_v59 }
  0xe9   : > { %1179 = vpow2.f32 %v1131_v58 }
  0xea   : > { %1181 = vpow2.f32 %v1130_v60 }
  0xeb   : > { %1183 = vpow2.f32 %v1132_v61 }
  0xf0   : > { %v1170_v62 = vpop.eup %1169 }
  0xf1   : > { %v1172_v63 = vpop.eup %1171  ;;  %v953_v0 = vadd.f32 1.0, %v1170_v62 }
  0xf2   : > { %v1174_v1 = vpop.eup %1173  ;;  %v955_v2 = vadd.f32 1.0, %v1172_v63 }
  0xf3   : > { %v1176_v3 = vpop.eup %1175  ;;  %1185 = vrcp.f32 %v953_v0  ;;  %v954_v4 = vadd.f32 1.0, %v1174_v1 }
  0xf4   : > { %1187 = vrcp.f32 %v955_v2  ;;  %v956_v5 = vadd.f32 1.0, %v1176_v3 }
  0xf5   : > { %v1178_v6 = vpop.eup %1177  ;;  %1189 = vrcp.f32 %v954_v4 }
  0xf6   : > { %v1180_v7 = vpop.eup %1179  ;;  %1191 = vrcp.f32 %v956_v5  ;;  %v957_v8 = vadd.f32 1.0, %v1178_v6 }
  0xf7   : > { %v1182_v9 = vpop.eup %1181  ;;  %v959_v10 = vadd.f32 1.0, %v1180_v7 }
  0xf8   : > { %v1184_v11 = vpop.eup %1183  ;;  %1193 = vrcp.f32 %v957_v8  ;;  %v958_v16 = vadd.f32 1.0, %v1182_v9 }
  0xf9   : > { %1195 = vrcp.f32 %v959_v10  ;;  %v960_v21 = vadd.f32 1.0, %v1184_v11 }
  0xfa   : > { %1197 = vrcp.f32 %v958_v16 }
  0xfb   : > { %1199 = vrcp.f32 %v960_v21 }
 0x100   : > { %v1186_v22 = vpop.eup %1185 }
 0x101   : > { %v1188_v23 = vpop.eup %1187  ;;  %v977_v24 = vmul.f32 %v1186_v22, %v1307_v14 }
 0x102   : > { %v1190_v25 = vpop.eup %1189  ;;  %v979_v26 = vmul.f32 %v1188_v23, %v1309_v15 }
 0x103   : > { %v1192_v27 = vpop.eup %1191  ;;  %985 = vst [vmem:[%s298_s13] sm:$0xff] %v977_v24  ;;  %v978_v28 = vmul.f32 %v1190_v25, %v1303_v12 }
 0x104   : > { %987 = vst [vmem:[%s298_s13 + $0x10] sm:$0xff] %v979_v26  ;;  %v980_v29 = vmul.f32 %v1192_v27, %v1305_v13 }
 0x105   : > { %v1194_v30 = vpop.eup %1193  ;;  %986 = vst [vmem:[%s298_s13 + $0x8] sm:$0xff] %v978_v28 }
 0x106   : > { %v1196_v31 = vpop.eup %1195  ;;  %988 = vst [vmem:[%s298_s13 + $0x18] sm:$0xff] %v980_v29  ;;  %v981_v32 = vmul.f32 %v1194_v30, %v1324_v19 }
 0x107   : > { %v1198_v33 = vpop.eup %1197  ;;  %v983_v34 = vmul.f32 %v1196_v31, %v1326_v20 }
 0x108   : > { %v1200_v14 = vpop.eup %1199  ;;  %989 = vst [vmem:[%s298_s13 + $0x20] sm:$0xff] %v981_v32  ;;  %v982_v15 = vmul.f32 %v1198_v33, %v1320_v17 }
 0x109   : > { %991 = vst [vmem:[%s298_s13 + $0x30] sm:$0xff] %v983_v34  ;;  %v984_v35 = vmul.f32 %v1200_v14, %v1322_v18 }
 0x10a   : > { %990 = vst [vmem:[%s298_s13 + $0x28] sm:$0xff] %v982_v15 }
 0x10b   : > { %992 = vst [vmem:[%s298_s13 + $0x38] sm:$0xff] %v984_v35 }
 0x10c PF: > { %s15_s20 = sadd.s32 1, %s1223_s20   ;;  %s1364_s18 = smov %s1219_s19 }
 0x10d   : > { %p12_p5 = scmp.ge.s32.totalorder %s15_s20, 4   ;;  %s1365_s19 = smov %s1367_s21 }
 0x10f   :  { %14 = sbr.rel (!%p12_p5) target bundleno = 2 (0x2), region = 73 }

// kernel: esa_forward.2
= control target key start
LH: loop header
LB: loop body
LE: loop exit
PB: predicated region body
PF: predicated region fallthrough
CT: control target
= control target key end

     0   :  { %s6248_s30 = smov 0   ;;  %s7952_s0 = inlined_call_operand.vmem [shape: f32[2,256,32], index: 0, kind: input, shape index: {}]   ;;  %s7953_s1 = inlined_call_operand.vmem [shape: f32[32,45], index: 1, kind: input, shape index: {}]   ;;  %s7954_s2 = inlined_call_operand.vmem [shape: f32[360,256], index: 2, kind: input, shape index: {}]   ;;  %s7955_s3 = inlined_call_operand.vmem [shape: f32[9,60,120], index: 3, kind: input, shape index: {}]   ;;  %s7956_s4 = inlined_call_operand.vmem [shape: f32[60,1], index: 4, kind: input, shape index: {}]   ;;  %s7957_s5 = inlined_call_operand.vmem [shape: f32[9,12,20], index: 5, kind: input, shape index: {}]   ;;  %s7958_s6 = inlined_call_operand.vmem [shape: f32[12,1], index: 6, kind: input, shape index: {}]   ;;  %s7959_s7 = inlined_call_operand.vmem [shape: f32[3,4,12], index: 7, kind: input, shape index: {}]   ;;  %s7960_s8 = inlined_call_operand.vmem [shape: f32[3,3,1024], index: 8, kind: input, shape index: {}]   ;;  %s7961_s9 = inlined_call_operand.vmem [shape: f32[2,4,1024], index: 9, kind: output, shape index: {}]  }
   0x1 LB: > { %s5043_s10 = sadd.s32 4294967295, %s6188_s30   ;;  %p5047_p0 = scmp.ge.s32.totalorder %s6188_s30, 1  ;;  %s6188_s30 = sphi %s6248_s30, %s19_s30  }
   0x2   : > { %p287_p1 = scmp.lt.s32.totalorder %s6188_s30, 3 }
   0x4   : > { %p288_p2 = pnand %p5047_p0, %p287_p1 }
   0x5   : > { %p323_p3 = scmp.lt.s32.totalorder (!%p288_p2), %s5043_s10, 1  ;;  %s6191_s13 = smov (!%p288_p2), 113  }
   0x6   : > { %291 = sbr.rel (%p288_p2) target bundleno = 2364 (0x93c), region = 56  ;;  %s6192_s14 = smov (!%p288_p2), 98  }
   0x7   : > { %s6194_s24 = smov (!%p288_p2), 1   ;;  %s6196_s29 = smov (!%p288_p2), 126  }
   0xb   : > { %v368_v0 = vld [vmem:[%s7953_s1 + $0x18] sm:$0xff]  ;;  %v367_v1 = vld [vmem:[%s7953_s1 + $0x10] sm:$0xff]  ;;  %v366_v2 = vld [vmem:[%s7953_s1 + $0x8] sm:$0xff]  ;;  %s7966_s10 = smov (!%p323_p3, %s5043_s10), 1  ;;  %vm369_vm0 = vcmask 261120   ;;  %v7962_v36 = vmov 0.0  }
   0xc   : > { %5616 = vmatprep.subr.mxu0 %v368_v0  ;;  %v365_v3 = vld [vmem:[%s7953_s1] sm:$0xff]  ;;  %s5317_s19 = sshll.u32 %s7966_s10, 8  ;;  %781 = vmatprep.subr.mxu1 %v7962_v36  ;;  %v692_v37 = vld [vmem:[%s7954_s2 + $0x8] sm:$0xff]  ;;  %vm1148_vm1 = vcmask 982016   ;;  %vm2740_vm2 = vcmask 120832   ;;  %vm2748_vm3 = vcmask 121859  }
   0xd   : > { %5617 = vmatpush3.msra.mxu0 %v368_v0  ;;  %s6274_s22 = scalar_lea.vmem %s7952_s0, %s5317_s19  ;;  %845 = vmatprep.mubr.f32.mxu1 %v692_v37  ;;  %v721_v37 = vld [vmem:[%s7954_s2 + $0xf0] sm:$0xff]  ;;  %vm2759_vm4 = vcmask 121862   ;;  %vm2761_vm5 = vcmask 118784   ;;  %vm2803_vm6 = vcmask 121863   ;;  %vm2816_vm7 = vcmask 114688   ;;  %s5318_s21 = sshll.u32 %s7966_s10, 5 }
   0xe   : > { %5618 = vmatprep.subr.mxu0 %v367_v1  ;;  %v333_v4 = vld [vmem:[%s6274_s22] sm:$0xff]  ;;  %v334_v5 = vld [vmem:[%s6274_s22 + $0x8] sm:$0xff]  ;;  %v335_v6 = vld [vmem:[%s6274_s22 + $0x10] sm:$0xff]  ;;  %vm2827_vm8 = vcmask 117760   ;;  %vm2805_vm9 = vcmask 119808   ;;  %vm2750_vm10 = vcmask 115712  }
   0xf   : > { %5619 = vmatpush3.msra.mxu0 %v367_v1  ;;  %5624 = vmatprep.mubr.msk.f32.mxu0 %vm369_vm0, %v333_v4  ;;  %v336_v7 = vld [vmem:[%s6274_s22 + $0x18] sm:$0xff]  ;;  %v337_v8 = vld [vmem:[%s6274_s22 + $0x20] sm:$0xff]  ;;  %v338_v9 = vld [vmem:[%s6274_s22 + $0x28] sm:$0xff]  ;;  %vm2814_vm11 = vcmask 121858   ;;  %vm2825_vm12 = vcmask 121861   ;;  %vm2879_vm13 = vcmask 116736  }
  0x10   : > { %5620 = vmatprep.subr.mxu0 %v366_v2  ;;  %v339_v10 = vld [vmem:[%s6274_s22 + $0x30] sm:$0xff]  ;;  %v340_v11 = vld [vmem:[%s6274_s22 + $0x38] sm:$0xff]  ;;  %v341_v12 = vld [vmem:[%s6274_s22 + $0x40] sm:$0xff]  ;;  %vm2869_vm14 = vcmask 121857   ;;  %vm2877_vm15 = vcmask 121860  }
  0x11   : > { %5621 = vmatpush3.msra.mxu0 %v366_v2  ;;  %v342_v13 = vld [vmem:[%s6274_s22 + $0x48] sm:$0xff]  ;;  %v343_v14 = vld [vmem:[%s6274_s22 + $0x50] sm:$0xff]  ;;  %v344_v15 = vld [vmem:[%s6274_s22 + $0x58] sm:$0xff] }
  0x12   : > { %5622 = vmatprep.subr.mxu0 %v365_v3  ;;  %v345_v16 = vld [vmem:[%s6274_s22 + $0x60] sm:$0xff]  ;;  %v346_v17 = vld [vmem:[%s6274_s22 + $0x68] sm:$0xff]  ;;  %v347_v18 = vld [vmem:[%s6274_s22 + $0x70] sm:$0xff] }
  0x13   : > { %5623 = vmatpush3.msra.mxu0 %v365_v3  ;;  %v348_v19 = vld [vmem:[%s6274_s22 + $0x78] sm:$0xff]  ;;  %v349_v20 = vld [vmem:[%s6274_s22 + $0x80] sm:$0xff]  ;;  %v350_v21 = vld [vmem:[%s6274_s22 + $0x88] sm:$0xff] }
  0x14   : > { %5625 = vmatmul.mubr.msk.f32.vlgmr.msra.gmra.mxu0 %vm369_vm0, %v334_v5  ;;  %v351_v22 = vld [vmem:[%s6274_s22 + $0x90] sm:$0xff]  ;;  %v352_v23 = vld [vmem:[%s6274_s22 + $0x98] sm:$0xff]  ;;  %v353_v24 = vld [vmem:[%s6274_s22 + $0xa0] sm:$0xff] }
  0x15   : > { %5627 = vmatprep.mubr.msk.f32.mxu0 %vm369_vm0, %v335_v6  ;;  %v354_v25 = vld [vmem:[%s6274_s22 + $0xa8] sm:$0xff]  ;;  %v355_v26 = vld [vmem:[%s6274_s22 + $0xb0] sm:$0xff]  ;;  %v356_v27 = vld [vmem:[%s6274_s22 + $0xb8] sm:$0xff] }
  0x16   : > { %v357_v28 = vld [vmem:[%s6274_s22 + $0xc0] sm:$0xff]  ;;  %v358_v29 = vld [vmem:[%s6274_s22 + $0xc8] sm:$0xff]  ;;  %v359_v30 = vld [vmem:[%s6274_s22 + $0xd0] sm:$0xff] }
  0x17   : > { %v360_v31 = vld [vmem:[%s6274_s22 + $0xd8] sm:$0xff]  ;;  %v361_v32 = vld [vmem:[%s6274_s22 + $0xe0] sm:$0xff]  ;;  %v362_v33 = vld [vmem:[%s6274_s22 + $0xe8] sm:$0xff] }
  0x18   : > { %5628 = vmatmul.mubr.msk.f32.gmra.mxu0 %vm369_vm0, %v336_v7  ;;  %v363_v34 = vld [vmem:[%s6274_s22 + $0xf0] sm:$0xff]  ;;  %v364_v35 = vld [vmem:[%s6274_s22 + $0xf8] sm:$0xff]  ;;  %v691_v6 = vld [vmem:[%s7954_s2] sm:$0xff] }
  0x19   : > { %5630 = vmatprep.mubr.msk.f32.mxu0 %vm369_vm0, %v337_v8  ;;  %v694_v7 = vld [vmem:[%s7954_s2 + $0x18] sm:$0xff]  ;;  %v693_v8 = vld [vmem:[%s7954_s2 + $0x10] sm:$0xff] }
  0x1c   : > { %5631 = vmatmul.mubr.msk.f32.gmra.mxu0 %vm369_vm0, %v338_v9  ;;  %v696_v9 = vld [vmem:[%s7954_s2 + $0x28] sm:$0xff] }
  0x1d   : > { %5633 = vmatprep.mubr.msk.f32.mxu0 %vm369_vm0, %v339_v10  ;;  %v695_v10 = vld [vmem:[%s7954_s2 + $0x20] sm:$0xff] }
  0x20   : > { %5634 = vmatmul.mubr.msk.f32.gmra.mxu0 %vm369_vm0, %v340_v11  ;;  %v698_v11 = vld [vmem:[%s7954_s2 + $0x38] sm:$0xff] }
  0x21   : > { %5636 = vmatprep.mubr.msk.f32.mxu0 %vm369_vm0, %v341_v12  ;;  %v697_v12 = vld [vmem:[%s7954_s2 + $0x30] sm:$0xff] }
  0x24   : > { %5637 = vmatmul.mubr.msk.f32.gmra.mxu0 %vm369_vm0, %v342_v13  ;;  %v700_v13 = vld [vmem:[%s7954_s2 + $0x48] sm:$0xff] }
  0x25   : > { %5639 = vmatprep.mubr.msk.f32.mxu0 %vm369_vm0, %v343_v14  ;;  %v699_v14 = vld [vmem:[%s7954_s2 + $0x40] sm:$0xff] }
  0x28   : > { %5640 = vmatmul.mubr.msk.f32.gmra.mxu0 %vm369_vm0, %v344_v15  ;;  %v702_v15 = vld [vmem:[%s7954_s2 + $0x58] sm:$0xff] }
  0x29   : > { %5642 = vmatprep.mubr.msk.f32.mxu0 %vm369_vm0, %v345_v16  ;;  %v701_v16 = vld [vmem:[%s7954_s2 + $0x50] sm:$0xff] }
  0x2c   : > { %5643 = vmatmul.mubr.msk.f32.gmra.mxu0 %vm369_vm0, %v346_v17  ;;  %v704_v17 = vld [vmem:[%s7954_s2 + $0x68] sm:$0xff] }
  0x2d   : > { %5645 = vmatprep.mubr.msk.f32.mxu0 %vm369_vm0, %v347_v18  ;;  %v703_v18 = vld [vmem:[%s7954_s2 + $0x60] sm:$0xff] }
  0x30   : > { %5646 = vmatmul.mubr.msk.f32.gmra.mxu0 %vm369_vm0, %v348_v19  ;;  %v706_v19 = vld [vmem:[%s7954_s2 + $0x78] sm:$0xff] }
  0x31   : > { %5648 = vmatprep.mubr.msk.f32.mxu0 %vm369_vm0, %v349_v20  ;;  %v705_v20 = vld [vmem:[%s7954_s2 + $0x70] sm:$0xff] }
  0x34   : > { %5649 = vmatmul.mubr.msk.f32.gmra.mxu0 %vm369_vm0, %v350_v21  ;;  %v708_v21 = vld [vmem:[%s7954_s2 + $0x88] sm:$0xff] }
  0x35   : > { %5651 = vmatprep.mubr.msk.f32.mxu0 %vm369_vm0, %v351_v22  ;;  %v707_v22 = vld [vmem:[%s7954_s2 + $0x80] sm:$0xff] }
  0x38   : > { %5652 = vmatmul.mubr.msk.f32.gmra.mxu0 %vm369_vm0, %v352_v23  ;;  %v710_v23 = vld [vmem:[%s7954_s2 + $0x98] sm:$0xff] }
  0x39   : > { %5654 = vmatprep.mubr.msk.f32.mxu0 %vm369_vm0, %v353_v24  ;;  %v709_v24 = vld [vmem:[%s7954_s2 + $0x90] sm:$0xff] }
  0x3c   : > { %5655 = vmatmul.mubr.msk.f32.gmra.mxu0 %vm369_vm0, %v354_v25  ;;  %v712_v25 = vld [vmem:[%s7954_s2 + $0xa8] sm:$0xff] }
  0x3d   : > { %5657 = vmatprep.mubr.msk.f32.mxu0 %vm369_vm0, %v355_v26  ;;  %v711_v26 = vld [vmem:[%s7954_s2 + $0xa0] sm:$0xff] }
  0x40   : > { %5658 = vmatmul.mubr.msk.f32.gmra.mxu0 %vm369_vm0, %v356_v27  ;;  %v714_v27 = vld [vmem:[%s7954_s2 + $0xb8] sm:$0xff] }
  0x41   : > { %5660 = vmatprep.mubr.msk.f32.mxu0 %vm369_vm0, %v357_v28  ;;  %v713_v28 = vld [vmem:[%s7954_s2 + $0xb0] sm:$0xff] }
  0x44   : > { %5661 = vmatmul.mubr.msk.f32.gmra.mxu0 %vm369_vm0, %v358_v29  ;;  %v716_v29 = vld [vmem:[%s7954_s2 + $0xc8] sm:$0xff] }
  0x45   : > { %5663 = vmatprep.mubr.msk.f32.mxu0 %vm369_vm0, %v359_v30  ;;  %v715_v30 = vld [vmem:[%s7954_s2 + $0xc0] sm:$0xff] }
  0x48   : > { %5664 = vmatmul.mubr.msk.f32.gmra.mxu0 %vm369_vm0, %v360_v31  ;;  %v718_v31 = vld [vmem:[%s7954_s2 + $0xd8] sm:$0xff] }
  0x49   : > { %5666 = vmatprep.mubr.msk.f32.mxu0 %vm369_vm0, %v361_v32  ;;  %v717_v32 = vld [vmem:[%s7954_s2 + $0xd0] sm:$0xff] }
  0x4c   : > { %5667 = vmatmul.mubr.msk.f32.gmra.mxu0 %vm369_vm0, %v362_v33  ;;  %v720_v33 = vld [vmem:[%s7954_s2 + $0xe8] sm:$0xff] }
  0x4d   : > { %5669 = vmatprep.mubr.msk.f32.mxu0 %vm369_vm0, %v363_v34  ;;  %v719_v34 = vld [vmem:[%s7954_s2 + $0xe0] sm:$0xff] }
  0x50   : > { %5670 = vmatmul.mubr.msk.f32.gmra.mxu0 %vm369_vm0, %v364_v35  ;;  %v722_v35 = vld [vmem:[%s7954_s2 + $0xf8] sm:$0xff]  ;;  %vm2770_vm0 = vcmask 1040384  }
  0xd4   : > { %v5626_v38 = vpop.f32.mrf.mxu0 }
  0xd6   : > { %v532_v39 = vpop.f32.mrf.mxu0 }
  0xd8   : > { %v5629_v40 = vpop.f32.mrf.mxu0 }
  0xda   : > { %v542_v41 = vpop.f32.mrf.mxu0 }
  0xdc   : > { %v5632_v42 = vpop.f32.mrf.mxu0 }
  0xde   : > { %v552_v43 = vpop.f32.mrf.mxu0 }
  0xe0   : > { %v5635_v44 = vpop.f32.mrf.mxu0 }
  0xe2   : > { %v562_v45 = vpop.f32.mrf.mxu0 }
  0xe4   : > { %v5638_v46 = vpop.f32.mrf.mxu0 }
  0xe6   : > { %v572_v47 = vpop.f32.mrf.mxu0 }
  0xe8   : > { %v5641_v48 = vpop.f32.mrf.mxu0 }
  0xea   : > { %v582_v49 = vpop.f32.mrf.mxu0 }
  0xec   : > { %v5644_v50 = vpop.f32.mrf.mxu0 }
  0xee   : > { %v592_v51 = vpop.f32.mrf.mxu0 }
  0xf0   : > { %v5647_v52 = vpop.f32.mrf.mxu0 }
  0xf1   : > { %782 = vmatpush1.msra.mxu1 %v5647_v52  ;;  %v738_v52 = vld [vmem:[%s7954_s2 + $0x178] sm:$0xff] }
  0xf2   : > { %v602_v53 = vpop.f32.mrf.mxu0  ;;  %783 = vmatprep.subr.mxu1 %v7962_v36 }
  0xf3   : > { %784 = vmatpush1.msra.mxu1 %v602_v53  ;;  %v737_v53 = vld [vmem:[%s7954_s2 + $0x170] sm:$0xff] }
  0xf4   : > { %v6345_v54 = vpop.f32.mrf.mxu0  ;;  %785 = vmatprep.subr.mxu1 %v7962_v36 }
  0xf5   : > { %786 = vmatpush1.msra.mxu1 %v5644_v50  ;;  %v736_v50 = vld [vmem:[%s7954_s2 + $0x168] sm:$0xff] }
  0xf6   : > { %v6348_v55 = vpop.f32.mrf.mxu0  ;;  %787 = vmatprep.subr.mxu1 %v7962_v36 }
  0xf7   : > { %788 = vmatpush1.msra.mxu1 %v592_v51  ;;  %v735_v51 = vld [vmem:[%s7954_s2 + $0x160] sm:$0xff] }
  0xf8   : > { %v5653_v56 = vpop.f32.mrf.mxu0  ;;  %789 = vmatprep.subr.mxu1 %v7962_v36 }
  0xf9   : > { %790 = vmatpush1.msra.mxu1 %v5641_v48  ;;  %v734_v48 = vld [vmem:[%s7954_s2 + $0x158] sm:$0xff] }
  0xfa   : > { %v622_v57 = vpop.f32.mrf.mxu0  ;;  %791 = vmatprep.subr.mxu1 %v7962_v36 }
  0xfb   : > { %792 = vmatpush1.msra.mxu1 %v582_v49  ;;  %v733_v49 = vld [vmem:[%s7954_s2 + $0x150] sm:$0xff] }
  0xfc   : > { %v5656_v58 = vpop.f32.mrf.mxu0  ;;  %793 = vmatprep.subr.mxu1 %v7962_v36 }
  0xfd   : > { %794 = vmatpush1.msra.mxu1 %v5638_v46  ;;  %v732_v46 = vld [vmem:[%s7954_s2 + $0x148] sm:$0xff] }
  0xfe   : > { %v632_v59 = vpop.f32.mrf.mxu0  ;;  %795 = vmatprep.subr.mxu1 %v7962_v36 }
  0xff   : > { %796 = vmatpush1.msra.mxu1 %v572_v47  ;;  %v731_v47 = vld [vmem:[%s7954_s2 + $0x140] sm:$0xff] }
 0x100   : > { %v5659_v60 = vpop.f32.mrf.mxu0  ;;  %797 = vmatprep.subr.mxu1 %v7962_v36 }
 0x101   : > { %798 = vmatpush1.msra.mxu1 %v5635_v44  ;;  %v730_v44 = vld [vmem:[%s7954_s2 + $0x138] sm:$0xff] }
 0x102   : > { %v642_v61 = vpop.f32.mrf.mxu0  ;;  %799 = vmatprep.subr.mxu1 %v7962_v36 }
 0x103   : > { %800 = vmatpush1.msra.mxu1 %v562_v45  ;;  %v729_v45 = vld [vmem:[%s7954_s2 + $0x130] sm:$0xff] }
 0x104   : > { %v5662_v62 = vpop.f32.mrf.mxu0  ;;  %801 = vmatprep.subr.mxu1 %v7962_v36 }
 0x105   : > { %802 = vmatpush1.msra.mxu1 %v5632_v42  ;;  %v728_v42 = vld [vmem:[%s7954_s2 + $0x128] sm:$0xff] }
 0x106   : > { %v652_v63 = vpop.f32.mrf.mxu0  ;;  %803 = vmatprep.subr.mxu1 %v7962_v36 }
 0x107   : > { %804 = vmatpush1.msra.mxu1 %v552_v43  ;;  %v727_v43 = vld [vmem:[%s7954_s2 + $0x120] sm:$0xff] }
 0x108   : > { %v5665_v0 = vpop.f32.mrf.mxu0  ;;  %805 = vmatprep.subr.mxu1 %v7962_v36 }
 0x109   : > { %806 = vmatpush1.msra.mxu1 %v5629_v40  ;;  %v726_v40 = vld [vmem:[%s7954_s2 + $0x118] sm:$0xff] }
 0x10a   : > { %v662_v1 = vpop.f32.mrf.mxu0  ;;  %807 = vmatprep.subr.mxu1 %v7962_v36 }
 0x10b   : > { %808 = vmatpush1.msra.mxu1 %v542_v41  ;;  %v725_v41 = vld [vmem:[%s7954_s2 + $0x110] sm:$0xff] }
 0x10c   : > { %v5668_v2 = vpop.f32.mrf.mxu0  ;;  %809 = vmatprep.subr.mxu1 %v7962_v36 }
 0x10d   : > { %810 = vmatpush1.msra.mxu1 %v5626_v38  ;;  %v724_v38 = vld [vmem:[%s7954_s2 + $0x108] sm:$0xff] }
 0x10e   : > { %v672_v3 = vpop.f32.mrf.mxu0  ;;  %811 = vmatprep.subr.mxu1 %v7962_v36 }
 0x10f   : > { %812 = vmatpush1.msra.mxu1 %v532_v39  ;;  %v723_v39 = vld [vmem:[%s7954_s2 + $0x100] sm:$0xff] }
 0x110   : > { %v5671_v4 = vpop.f32.mrf.mxu0  ;;  %813 = vmatprep.subr.mxu1 %v7962_v36 }
 0x111   : > { %814 = vmatpush2.msra.mxu1 %v5671_v4  ;;  %v754_v4 = vld [vmem:[%s7954_s2 + $0x1f8] sm:$0xff] }
 0x112   : > { %v682_v5 = vpop.f32.mrf.mxu0  ;;  %815 = vmatprep.subr.mxu1 %v7962_v36 }
 0x113   : > { %816 = vmatpush2.msra.mxu1 %v682_v5  ;;  %v753_v5 = vld [vmem:[%s7954_s2 + $0x1f0] sm:$0xff] }
 0x114   : > { %817 = vmatprep.subr.mxu1 %v7962_v36 }
 0x115   : > { %818 = vmatpush2.msra.mxu1 %v5668_v2  ;;  %v752_v2 = vld [vmem:[%s7954_s2 + $0x1e8] sm:$0xff] }
 0x116   : > { %819 = vmatprep.subr.mxu1 %v7962_v36 }
 0x117   : > { %820 = vmatpush2.msra.mxu1 %v672_v3  ;;  %v751_v3 = vld [vmem:[%s7954_s2 + $0x1e0] sm:$0xff] }
 0x118   : > { %821 = vmatprep.subr.mxu1 %v7962_v36 }
 0x119   : > { %822 = vmatpush2.msra.mxu1 %v5665_v0  ;;  %v750_v0 = vld [vmem:[%s7954_s2 + $0x1d8] sm:$0xff] }
 0x11a   : > { %823 = vmatprep.subr.mxu1 %v7962_v36 }
 0x11b   : > { %824 = vmatpush2.msra.mxu1 %v662_v1  ;;  %v749_v1 = vld [vmem:[%s7954_s2 + $0x1d0] sm:$0xff] }
 0x11c   : > { %825 = vmatprep.subr.mxu1 %v7962_v36 }
 0x11d   : > { %826 = vmatpush2.msra.mxu1 %v5662_v62  ;;  %v748_v62 = vld [vmem:[%s7954_s2 + $0x1c8] sm:$0xff] }
 0x11e   : > { %827 = vmatprep.subr.mxu1 %v7962_v36 }
 0x11f   : > { %828 = vmatpush2.msra.mxu1 %v652_v63  ;;  %v747_v63 = vld [vmem:[%s7954_s2 + $0x1c0] sm:$0xff] }
 0x120   : > { %829 = vmatprep.subr.mxu1 %v7962_v36 }
 0x121   : > { %830 = vmatpush2.msra.mxu1 %v5659_v60  ;;  %v746_v60 = vld [vmem:[%s7954_s2 + $0x1b8] sm:$0xff] }
 0x122   : > { %831 = vmatprep.subr.mxu1 %v7962_v36 }
 0x123   : > { %832 = vmatpush2.msra.mxu1 %v642_v61  ;;  %v745_v61 = vld [vmem:[%s7954_s2 + $0x1b0] sm:$0xff] }
 0x124   : > { %833 = vmatprep.subr.mxu1 %v7962_v36 }
 0x125   : > { %834 = vmatpush2.msra.mxu1 %v5656_v58  ;;  %v744_v58 = vld [vmem:[%s7954_s2 + $0x1a8] sm:$0xff] }
 0x126   : > { %835 = vmatprep.subr.mxu1 %v7962_v36 }
 0x127   : > { %836 = vmatpush2.msra.mxu1 %v632_v59  ;;  %v743_v59 = vld [vmem:[%s7954_s2 + $0x1a0] sm:$0xff] }
 0x128   : > { %837 = vmatprep.subr.mxu1 %v7962_v36 }
 0x129   : > { %838 = vmatpush2.msra.mxu1 %v5653_v56  ;;  %v742_v56 = vld [vmem:[%s7954_s2 + $0x198] sm:$0xff] }
 0x12a   : > { %839 = vmatprep.subr.mxu1 %v7962_v36 }
 0x12b   : > { %840 = vmatpush2.msra.mxu1 %v622_v57  ;;  %v741_v57 = vld [vmem:[%s7954_s2 + $0x190] sm:$0xff] }
 0x12c   : > { %841 = vmatprep.subr.mxu1 %v7962_v36 }
 0x12d   : > { %842 = vmatpush2.msra.mxu1 %v6345_v54  ;;  %v740_v54 = vld [vmem:[%s7954_s2 + $0x188] sm:$0xff] }
 0x12e   : > { %843 = vmatprep.subr.mxu1 %v7962_v36 }
 0x12f   : > { %844 = vmatpush2.msra.mxu1 %v6348_v55  ;;  %v739_v55 = vld [vmem:[%s7954_s2 + $0x180] sm:$0xff] }
 0x130   : > { %846 = vmatmul.mubr.f32.vlgmr.msra.gmra.mxu1 %v691_v6  ;;  %v756_v6 = vld [vmem:[%s7954_s2 + $0x208] sm:$0xff] }
 0x131   : > { %850 = vmatprep.mubr.f32.mxu1 %v694_v7  ;;  %v755_v7 = vld [vmem:[%s7954_s2 + $0x200] sm:$0xff] }
 0x134   : > { %851 = vmatmul.mubr.f32.gmra.mxu1 %v693_v8  ;;  %v758_v8 = vld [vmem:[%s7954_s2 + $0x218] sm:$0xff] }
 0x135   : > { %855 = vmatprep.mubr.f32.mxu1 %v696_v9  ;;  %v757_v9 = vld [vmem:[%s7954_s2 + $0x210] sm:$0xff] }
 0x138   : > { %856 = vmatmul.mubr.f32.gmra.mxu1 %v695_v10  ;;  %v760_v10 = vld [vmem:[%s7954_s2 + $0x228] sm:$0xff] }
 0x139   : > { %860 = vmatprep.mubr.f32.mxu1 %v698_v11  ;;  %v759_v11 = vld [vmem:[%s7954_s2 + $0x220] sm:$0xff] }
 0x13c   : > { %861 = vmatmul.mubr.f32.gmra.mxu1 %v697_v12  ;;  %v762_v12 = vld [vmem:[%s7954_s2 + $0x238] sm:$0xff] }
 0x13d   : > { %865 = vmatprep.mubr.f32.mxu1 %v700_v13  ;;  %v761_v13 = vld [vmem:[%s7954_s2 + $0x230] sm:$0xff] }
 0x140   : > { %866 = vmatmul.mubr.f32.gmra.mxu1 %v699_v14  ;;  %v764_v14 = vld [vmem:[%s7954_s2 + $0x248] sm:$0xff] }
 0x141   : > { %870 = vmatprep.mubr.f32.mxu1 %v702_v15  ;;  %v763_v15 = vld [vmem:[%s7954_s2 + $0x240] sm:$0xff] }
 0x144   : > { %871 = vmatmul.mubr.f32.gmra.mxu1 %v701_v16  ;;  %v766_v16 = vld [vmem:[%s7954_s2 + $0x258] sm:$0xff] }
 0x145   : > { %875 = vmatprep.mubr.f32.mxu1 %v704_v17  ;;  %v765_v17 = vld [vmem:[%s7954_s2 + $0x250] sm:$0xff] }
 0x148   : > { %876 = vmatmul.mubr.f32.gmra.mxu1 %v703_v18  ;;  %v768_v18 = vld [vmem:[%s7954_s2 + $0x268] sm:$0xff] }
 0x149   : > { %880 = vmatprep.mubr.f32.mxu1 %v706_v19  ;;  %v767_v19 = vld [vmem:[%s7954_s2 + $0x260] sm:$0xff] }
 0x14c   : > { %881 = vmatmul.mubr.f32.gmra.mxu1 %v705_v20  ;;  %v770_v20 = vld [vmem:[%s7954_s2 + $0x278] sm:$0xff] }
 0x14d   : > { %885 = vmatprep.mubr.f32.mxu1 %v708_v21  ;;  %v769_v21 = vld [vmem:[%s7954_s2 + $0x270] sm:$0xff] }
 0x150   : > { %886 = vmatmul.mubr.f32.gmra.mxu1 %v707_v22  ;;  %v772_v22 = vld [vmem:[%s7954_s2 + $0x288] sm:$0xff] }
 0x151   : > { %890 = vmatprep.mubr.f32.mxu1 %v710_v23  ;;  %v771_v23 = vld [vmem:[%s7954_s2 + $0x280] sm:$0xff] }
 0x154   : > { %891 = vmatmul.mubr.f32.gmra.mxu1 %v709_v24  ;;  %v774_v24 = vld [vmem:[%s7954_s2 + $0x298] sm:$0xff] }
 0x155   : > { %895 = vmatprep.mubr.f32.mxu1 %v712_v25  ;;  %v773_v25 = vld [vmem:[%s7954_s2 + $0x290] sm:$0xff] }
 0x158   : > { %896 = vmatmul.mubr.f32.gmra.mxu1 %v711_v26  ;;  %v776_v26 = vld [vmem:[%s7954_s2 + $0x2a8] sm:$0xff] }
 0x159   : > { %900 = vmatprep.mubr.f32.mxu1 %v714_v27  ;;  %v775_v27 = vld [vmem:[%s7954_s2 + $0x2a0] sm:$0xff] }
 0x15c   : > { %901 = vmatmul.mubr.f32.gmra.mxu1 %v713_v28  ;;  %v778_v28 = vld [vmem:[%s7954_s2 + $0x2b8] sm:$0xff] }
 0x15d   : > { %905 = vmatprep.mubr.f32.mxu1 %v716_v29  ;;  %v777_v29 = vld [vmem:[%s7954_s2 + $0x2b0] sm:$0xff] }
 0x160   : > { %906 = vmatmul.mubr.f32.gmra.mxu1 %v715_v30  ;;  %v780_v30 = vld [vmem:[%s7954_s2 + $0x2c8] sm:$0xff] }
 0x161   : > { %910 = vmatprep.mubr.f32.mxu1 %v718_v31  ;;  %v779_v31 = vld [vmem:[%s7954_s2 + $0x2c0] sm:$0xff] }
 0x164   : > { %911 = vmatmul.mubr.f32.gmra.mxu1 %v717_v32 }
 0x165   : > { %915 = vmatprep.mubr.f32.mxu1 %v720_v33 }
 0x168   : > { %916 = vmatmul.mubr.f32.gmra.mxu1 %v719_v34 }
 0x169   : > { %920 = vmatprep.mubr.f32.mxu1 %v722_v35 }
 0x16c   : > { %921 = vmatmul.mubr.f32.gmra.mxu1 %v721_v37 }
 0x16d   : > { %925 = vmatprep.mubr.f32.mxu1 %v724_v38 }
 0x170   : > { %926 = vmatmul.mubr.f32.gmra.mxu1 %v723_v39 }
 0x171   : > { %930 = vmatprep.mubr.f32.mxu1 %v726_v40 }
 0x174   : > { %931 = vmatmul.mubr.f32.gmra.mxu1 %v725_v41 }
 0x175   : > { %935 = vmatprep.mubr.f32.mxu1 %v728_v42 }
 0x178   : > { %936 = vmatmul.mubr.f32.gmra.mxu1 %v727_v43 }
 0x179   : > { %940 = vmatprep.mubr.f32.mxu1 %v730_v44 }
 0x17c   : > { %941 = vmatmul.mubr.f32.gmra.mxu1 %v729_v45 }
 0x17d   : > { %945 = vmatprep.mubr.f32.mxu1 %v732_v46 }
 0x180   : > { %946 = vmatmul.mubr.f32.gmra.mxu1 %v731_v47 }
 0x181   : > { %950 = vmatprep.mubr.f32.mxu1 %v734_v48 }
 0x184   : > { %951 = vmatmul.mubr.f32.gmra.mxu1 %v733_v49 }
 0x185   : > { %955 = vmatprep.mubr.f32.mxu1 %v736_v50 }
 0x188   : > { %956 = vmatmul.mubr.f32.gmra.mxu1 %v735_v51 }
 0x189   : > { %960 = vmatprep.mubr.f32.mxu1 %v738_v52 }
 0x18c   : > { %961 = vmatmul.mubr.f32.gmra.mxu1 %v737_v53 }
 0x18d   : > { %965 = vmatprep.mubr.f32.mxu1 %v740_v54 }
 0x190   : > { %966 = vmatmul.mubr.f32.gmra.mxu1 %v739_v55 }
 0x191   : > { %970 = vmatprep.mubr.f32.mxu1 %v742_v56 }
 0x194   : > { %971 = vmatmul.mubr.f32.gmra.mxu1 %v741_v57 }
 0x195   : > { %975 = vmatprep.mubr.f32.mxu1 %v744_v58 }
 0x198   : > { %976 = vmatmul.mubr.f32.gmra.mxu1 %v743_v59 }
 0x199   : > { %980 = vmatprep.mubr.f32.mxu1 %v746_v60 }
 0x19c   : > { %981 = vmatmul.mubr.f32.gmra.mxu1 %v745_v61 }
 0x19d   : > { %985 = vmatprep.mubr.f32.mxu1 %v748_v62 }
 0x1a0   : > { %986 = vmatmul.mubr.f32.gmra.mxu1 %v747_v63 }
 0x1a1   : > { %990 = vmatprep.mubr.f32.mxu1 %v750_v0 }
 0x1a4   : > { %991 = vmatmul.mubr.f32.gmra.mxu1 %v749_v1 }
 0x1a5   : > { %995 = vmatprep.mubr.f32.mxu1 %v752_v2 }
 0x1a8   : > { %996 = vmatmul.mubr.f32.gmra.mxu1 %v751_v3 }
 0x1a9   : > { %1000 = vmatprep.mubr.f32.mxu1 %v754_v4 }
 0x1ac   : > { %1001 = vmatmul.mubr.f32.gmra.mxu1 %v753_v5 }
 0x1ad   : > { %1005 = vmatprep.mubr.f32.mxu1 %v756_v6 }
 0x1b0   : > { %1006 = vmatmul.mubr.f32.gmra.mxu1 %v755_v7 }
 0x1b1   : > { %1010 = vmatprep.mubr.f32.mxu1 %v758_v8 }
 0x1b4   : > { %1011 = vmatmul.mubr.f32.gmra.mxu1 %v757_v9 }
 0x1b5   : > { %1015 = vmatprep.mubr.f32.mxu1 %v760_v10  ;;  %v5084_v10 = vld [vmem:[%s7955_s3 + $0x40] sm:$0xff] }
 0x1b6   : > { %5702 = vmatprep.mubr.msk.f32.mxu0 %vm1148_vm1, %v5084_v10 }
 0x1b8   : > { %1016 = vmatmul.mubr.f32.gmra.mxu1 %v759_v11 }
 0x1b9   : > { %1020 = vmatprep.mubr.f32.mxu1 %v762_v12 }
 0x1bc   : > { %1021 = vmatmul.mubr.f32.gmra.mxu1 %v761_v13 }
 0x1bd   : > { %1025 = vmatprep.mubr.f32.mxu1 %v764_v14 }
 0x1c0   : > { %1026 = vmatmul.mubr.f32.gmra.mxu1 %v763_v15 }
 0x1c1   : > { %1030 = vmatprep.mubr.f32.mxu1 %v766_v16 }
 0x1c4   : > { %1031 = vmatmul.mubr.f32.gmra.mxu1 %v765_v17 }
 0x1c5   : > { %1035 = vmatprep.mubr.f32.mxu1 %v768_v18 }
 0x1c8   : > { %1036 = vmatmul.mubr.f32.gmra.mxu1 %v767_v19 }
 0x1c9   : > { %1040 = vmatprep.mubr.f32.mxu1 %v770_v20 }
 0x1cc   : > { %1041 = vmatmul.mubr.f32.gmra.mxu1 %v769_v21 }
 0x1cd   : > { %1045 = vmatprep.mubr.f32.mxu1 %v772_v22 }
 0x1d0   : > { %1046 = vmatmul.mubr.f32.gmra.mxu1 %v771_v23 }
 0x1d1   : > { %1050 = vmatprep.mubr.f32.mxu1 %v774_v24 }
 0x1d4   : > { %1051 = vmatmul.mubr.f32.gmra.mxu1 %v773_v25 }
 0x1d5   : > { %1055 = vmatprep.mubr.f32.mxu1 %v776_v26 }
 0x1d8   : > { %1056 = vmatmul.mubr.f32.gmra.mxu1 %v775_v27 }
 0x1d9   : > { %1060 = vmatprep.mubr.f32.mxu1 %v778_v28 }
 0x1dc   : > { %1061 = vmatmul.mubr.f32.gmra.mxu1 %v777_v29 }
 0x1dd   : > { %1065 = vmatprep.mubr.f32.mxu1 %v780_v30 }
 0x1e0   : > { %1066 = vmatmul.mubr.f32.gmra.mxu1 %v779_v31 }
 0x1f0   : > { %v6648_v32 = vpop.f32.mrf.mxu1 }
 0x1f2   : > { %v849_v33 = vpop.f32.mrf.mxu1 }
 0x1f4   : > { %v6650_v34 = vpop.f32.mrf.mxu1 }
 0x1f6   : > { %v854_v35 = vpop.f32.mrf.mxu1 }
 0x1f8   : > { %v6652_v37 = vpop.f32.mrf.mxu1 }
 0x1fa   : > { %v859_v38 = vpop.f32.mrf.mxu1 }
 0x1fc   : > { %v6654_v39 = vpop.f32.mrf.mxu1 }
 0x1fe   : > { %v864_v40 = vpop.f32.mrf.mxu1 }
 0x200   : > { %v6656_v41 = vpop.f32.mrf.mxu1 }
 0x202   : > { %v869_v42 = vpop.f32.mrf.mxu1 }
 0x204   : > { %v6658_v43 = vpop.f32.mrf.mxu1 }
 0x206   : > { %v874_v44 = vpop.f32.mrf.mxu1 }
 0x208   : > { %v6660_v45 = vpop.f32.mrf.mxu1 }
 0x20a   : > { %v879_v46 = vpop.f32.mrf.mxu1 }
 0x20c   : > { %v6662_v47 = vpop.f32.mrf.mxu1 }
 0x20e   : > { %v884_v48 = vpop.f32.mrf.mxu1 }
 0x210   : > { %v6664_v49 = vpop.f32.mrf.mxu1 }
 0x212   : > { %v889_v50 = vpop.f32.mrf.mxu1 }
 0x214   : > { %v6666_v51 = vpop.f32.mrf.mxu1 }
 0x216   : > { %v894_v52 = vpop.f32.mrf.mxu1 }
 0x218   : > { %v6668_v53 = vpop.f32.mrf.mxu1 }
 0x21a   : > { %v899_v54 = vpop.f32.mrf.mxu1 }
 0x21c   : > { %v6670_v55 = vpop.f32.mrf.mxu1 }
 0x21e   : > { %v904_v56 = vpop.f32.mrf.mxu1 }
 0x220   : > { %v6672_v57 = vpop.f32.mrf.mxu1 }
 0x221   : > { %1127 = vrot.lane.b32.xlu1 %v6672_v57, %s6191_s13 }
 0x222   : > { %v909_v58 = vpop.f32.mrf.mxu1 }
 0x224   : > { %v6676_v59 = vpop.f32.mrf.mxu1 }
 0x225   : > { %1125 = vrot.lane.b32.xlu1 %v6670_v55, %s6191_s13 }
 0x226   : > { %v914_v60 = vpop.f32.mrf.mxu1 }
 0x228   : > { %v6680_v61 = vpop.f32.mrf.mxu1 }
 0x229   : > { %1121 = vrot.lane.b32.xlu1 %v6666_v51, %s6191_s13  ;;  %1131 = vrot.lane.b32.xlu0 %v6680_v61, %s6191_s13 }
 0x22a   : > { %v919_v62 = vpop.f32.mrf.mxu1 }
 0x22c   : > { %v6686_v63 = vpop.f32.mrf.mxu1 }
 0x22d   : > { %1117 = vrot.lane.b32.xlu1 %v6662_v47, %s6191_s13  ;;  %1129 = vrot.lane.b32.xlu0 %v6676_v59, %s6191_s13 }
 0x22e   : > { %v924_v0 = vpop.f32.mrf.mxu1 }
 0x230   : > { %v6692_v1 = vpop.f32.mrf.mxu1 }
 0x231   : > { %1113 = vrot.lane.b32.xlu1 %v6658_v43, %s6191_s13  ;;  %1123 = vrot.lane.b32.xlu0 %v6668_v53, %s6191_s13 }
 0x232   : > { %v929_v2 = vpop.f32.mrf.mxu1 }
 0x234   : > { %v6698_v3 = vpop.f32.mrf.mxu1 }
 0x235   : > { %1109 = vrot.lane.b32.xlu1 %v6654_v39, %s6191_s13  ;;  %1119 = vrot.lane.b32.xlu0 %v6664_v49, %s6191_s13 }
 0x236   : > { %v934_v4 = vpop.f32.mrf.mxu1 }
 0x238   : > { %v6704_v5 = vpop.f32.mrf.mxu1 }
 0x239   : > { %1105 = vrot.lane.b32.xlu1 %v6650_v34, %s6191_s13  ;;  %1115 = vrot.lane.b32.xlu0 %v6660_v45, %s6191_s13 }
 0x23a   : > { %v939_v6 = vpop.f32.mrf.mxu1 }
 0x23c   : > { %v6710_v7 = vpop.f32.mrf.mxu1 }
 0x23d   : > { %1444 = vrot.lane.b32.xlu1 %v6680_v61, %s6192_s14  ;;  %1111 = vrot.lane.b32.xlu0 %v6656_v41, %s6191_s13 }
 0x23e   : > { %v944_v8 = vpop.f32.mrf.mxu1 }
 0x240   : > { %v6716_v9 = vpop.f32.mrf.mxu1 }
 0x241   : > { %1440 = vrot.lane.b32.xlu1 %v6672_v57, %s6192_s14  ;;  %1107 = vrot.lane.b32.xlu0 %v6652_v37, %s6191_s13 }
 0x242   : > { %v949_v11 = vpop.f32.mrf.mxu1 }
 0x244   : > { %v6726_v12 = vpop.f32.mrf.mxu1 }
 0x245   : > { %1436 = vrot.lane.b32.xlu1 %v6668_v53, %s6192_s14  ;;  %1103 = vrot.lane.b32.xlu0 %v6648_v32, %s6191_s13 }
 0x246   : > { %v954_v13 = vpop.f32.mrf.mxu1 }
 0x248   : > { %v6732_v14 = vpop.f32.mrf.mxu1 }
 0x249   : > { %1432 = vrot.lane.b32.xlu1 %v6664_v49, %s6192_s14  ;;  %1442 = vrot.lane.b32.xlu0 %v6676_v59, %s6192_s14 }
 0x24a   : > { %v959_v15 = vpop.f32.mrf.mxu1 }
 0x24c   : > { %v6738_v16 = vpop.f32.mrf.mxu1 }
 0x24d   : > { %1428 = vrot.lane.b32.xlu1 %v6660_v45, %s6192_s14  ;;  %1438 = vrot.lane.b32.xlu0 %v6670_v55, %s6192_s14 }
 0x24e   : > { %v964_v17 = vpop.f32.mrf.mxu1 }
 0x250   : > { %v6744_v18 = vpop.f32.mrf.mxu1 }
 0x251   : > { %1424 = vrot.lane.b32.xlu1 %v6656_v41, %s6192_s14  ;;  %1434 = vrot.lane.b32.xlu0 %v6666_v51, %s6192_s14 }
 0x252   : > { %v969_v19 = vpop.f32.mrf.mxu1 }
 0x254   : > { %v6750_v20 = vpop.f32.mrf.mxu1 }
 0x255   : > { %1420 = vrot.lane.b32.xlu1 %v6652_v37, %s6192_s14  ;;  %1430 = vrot.lane.b32.xlu0 %v6662_v47, %s6192_s14 }
 0x256   : > { %v974_v21 = vpop.f32.mrf.mxu1 }
 0x258   : > { %v6756_v22 = vpop.f32.mrf.mxu1 }
 0x259   : > { %1416 = vrot.lane.b32.xlu1 %v6648_v32, %s6192_s14  ;;  %1426 = vrot.lane.b32.xlu0 %v6658_v43, %s6192_s14 }
 0x25a   : > { %v979_v23 = vpop.f32.mrf.mxu1 }
 0x25c   : > { %v6762_v24 = vpop.f32.mrf.mxu1 }
 0x25d   : > { %1422 = vrot.lane.b32.xlu0 %v6654_v39, %s6192_s14  ;;  %1770 = vrot.lane.b32.xlu1 %v6692_v1, %s6191_s13 }
 0x25e   : > { %v984_v25 = vpop.f32.mrf.mxu1 }
 0x260   : > { %v6768_v26 = vpop.f32.mrf.mxu1 }
 0x261   : > { %1418 = vrot.lane.b32.xlu0 %v6650_v34, %s6192_s14  ;;  %1774 = vrot.lane.b32.xlu1 %v6704_v5, %s6191_s13 }
 0x262   : > { %v989_v27 = vpop.f32.mrf.mxu1 }
 0x264   : > { %v6774_v28 = vpop.f32.mrf.mxu1 }
 0x265   : > { %1768 = vrot.lane.b32.xlu0 %v6686_v63, %s6191_s13  ;;  %1778 = vrot.lane.b32.xlu1 %v6716_v9, %s6191_s13 }
 0x266   : > { %v994_v29 = vpop.f32.mrf.mxu1 }
 0x268   : > { %v6780_v30 = vpop.f32.mrf.mxu1 }
 0x269   : > { %1772 = vrot.lane.b32.xlu0 %v6698_v3, %s6191_s13  ;;  %1782 = vrot.lane.b32.xlu1 %v6732_v14, %s6191_s13 }
 0x26a   : > { %v999_v31 = vpop.f32.mrf.mxu1 }
 0x26c   : > { %v6786_v33 = vpop.f32.mrf.mxu1 }
 0x26d   : > { %1776 = vrot.lane.b32.xlu0 %v6710_v7, %s6191_s13  ;;  %1786 = vrot.lane.b32.xlu1 %v6744_v18, %s6191_s13 }
 0x26e   : > { %v1004_v35 = vpop.f32.mrf.mxu1 }
 0x270   : > { %v6792_v38 = vpop.f32.mrf.mxu1 }
 0x271   : > { %1780 = vrot.lane.b32.xlu0 %v6726_v12, %s6191_s13  ;;  %1790 = vrot.lane.b32.xlu1 %v6756_v22, %s6191_s13 }
 0x272   : > { %v1009_v40 = vpop.f32.mrf.mxu1 }
 0x274   : > { %v6798_v42 = vpop.f32.mrf.mxu1 }
 0x275   : > { %1784 = vrot.lane.b32.xlu0 %v6738_v16, %s6191_s13  ;;  %1794 = vrot.lane.b32.xlu1 %v6768_v26, %s6191_s13 }
 0x276   : > { %v1014_v44 = vpop.f32.mrf.mxu1 }
 0x278   : > { %v6804_v46 = vpop.f32.mrf.mxu1 }
 0x279   : > { %1788 = vrot.lane.b32.xlu0 %v6750_v20, %s6191_s13  ;;  %1983 = vrot.lane.b32.xlu1 %v6762_v24, %s6192_s14 }
 0x27a   : > { %v1019_v48 = vpop.f32.mrf.mxu1 }
 0x27c   : > { %v6810_v50 = vpop.f32.mrf.mxu1 }
 0x27d   : > { %1792 = vrot.lane.b32.xlu0 %v6762_v24, %s6191_s13  ;;  %1979 = vrot.lane.b32.xlu1 %v6750_v20, %s6192_s14 }
 0x27e   : > { %v1024_v52 = vpop.f32.mrf.mxu1 }
 0x280   : > { %v6816_v54 = vpop.f32.mrf.mxu1 }
 0x281   : > { %1975 = vrot.lane.b32.xlu1 %v6738_v16, %s6192_s14  ;;  %1796 = vrot.lane.b32.xlu0 %v6774_v28, %s6191_s13 }
 0x282   : > { %v1029_v56 = vpop.f32.mrf.mxu1 }
 0x284   : > { %v6822_v58 = vpop.f32.mrf.mxu1 }
 0x285   : > { %1971 = vrot.lane.b32.xlu1 %v6726_v12, %s6192_s14  ;;  %1985 = vrot.lane.b32.xlu0 %v6768_v26, %s6192_s14 }
 0x286   : > { %v1034_v60 = vpop.f32.mrf.mxu1 }
 0x288   : > { %v6828_v62 = vpop.f32.mrf.mxu1 }
 0x289   : > { %1967 = vrot.lane.b32.xlu1 %v6710_v7, %s6192_s14  ;;  %1981 = vrot.lane.b32.xlu0 %v6756_v22, %s6192_s14 }
 0x28a   : > { %v1039_v0 = vpop.f32.mrf.mxu1 }
 0x28c   : > { %v6834_v2 = vpop.f32.mrf.mxu1 }
 0x28d   : > { %1963 = vrot.lane.b32.xlu1 %v6698_v3, %s6192_s14  ;;  %1977 = vrot.lane.b32.xlu0 %v6744_v18, %s6192_s14 }
 0x28e   : > { %v1044_v4 = vpop.f32.mrf.mxu1 }
 0x290   : > { %v1047_v6 = vpop.f32.mrf.mxu1 }
 0x291   : > { %1959 = vrot.lane.b32.xlu1 %v6686_v63, %s6192_s14  ;;  %1973 = vrot.lane.b32.xlu0 %v6732_v14, %s6192_s14 }
 0x292   : > { %v1049_v8 = vpop.f32.mrf.mxu1 }
 0x293   : > { %v1128_v10 = vpop.permute.xlu1 %1127 }
 0x294   : > { %v1052_v11 = vpop.f32.mrf.mxu1 }
 0x295   : > { %1987 = vrot.lane.b32.xlu1 %v6774_v28, %s6192_s14  ;;  %1969 = vrot.lane.b32.xlu0 %v6716_v9, %s6192_s14 }
 0x296   : > { %v1054_v13 = vpop.f32.mrf.mxu1 }
 0x297   : > { %v1126_v15 = vpop.permute.xlu1 %1125 }
 0x298   : > { %v6848_v17 = vpop.f32.mrf.mxu1 }
 0x299   : > { %1965 = vrot.lane.b32.xlu0 %v6704_v5, %s6192_s14  ;;  %2323 = vrot.lane.b32.xlu1 %v6816_v54, %s6191_s13 }
 0x29a   : > { %v1059_v19 = vpop.f32.mrf.mxu1 }
 0x29b   : > { %v1122_v21 = vpop.permute.xlu1 %1121  ;;  %v1132_v23 = vpop.permute.xlu0 %1131  ;;  %v5085_v19 = vld [vmem:[%s7955_s3 + $0x48] sm:$0xff] }
 0x29c   : > { %v6854_v25 = vpop.f32.mrf.mxu1  ;;  %5672 = vmatprep.subr.mxu0 %v1132_v23 }
 0x29d   : > { %5673 = vmatpush3.msra.mxu0 %v1132_v23  ;;  %1961 = vrot.lane.b32.xlu0 %v6692_v1, %s6192_s14 }
 0x29e   : > { %2325 = vrot.lane.b32.xlu1 %v6822_v58, %s6191_s13  ;;  %v1064_v27 = vpop.f32.mrf.mxu1 }
 0x29f   : > { %v1118_v29 = vpop.permute.xlu1 %1117  ;;  %v1130_v31 = vpop.permute.xlu0 %1129 }
 0x2a0   : > { %v6860_v35 = vpop.f32.mrf.mxu1  ;;  %5674 = vmatprep.subr.mxu0 %v1130_v31 }
 0x2a1   : > { %5675 = vmatpush3.msra.mxu0 %v1130_v31  ;;  %2518 = vrot.lane.b32.xlu0 %v6828_v62, %s6192_s14 }
 0x2a2   : > { %2327 = vrot.lane.b32.xlu1 %v6828_v62, %s6191_s13  ;;  %5924 = vmatprep.subr.mxu1 %v6860_v35  ;;  %v1069_v40 = vpop.f32.mrf.mxu1 }
 0x2a3   : > { %5676 = vmatprep.subr.mxu0 %v1128_v10  ;;  %5925 = vmatpush3.msra.mxu1 %v6860_v35  ;;  %v1114_v44 = vpop.permute.xlu1 %1113  ;;  %v1124_v48 = vpop.permute.xlu0 %1123  ;;  %v5089_v40 = vld [vmem:[%s7955_s3 + $0x68] sm:$0xff] }
 0x2a4   : > { %5677 = vmatpush3.msra.mxu0 %v1128_v10  ;;  %5926 = vmatprep.subr.mxu1 %v6854_v25 }
 0x2a5   : > { %5678 = vmatprep.subr.mxu0 %v1126_v15  ;;  %5927 = vmatpush3.msra.mxu1 %v6854_v25 }
 0x2a6   : > { %5679 = vmatpush3.msra.mxu0 %v1126_v15  ;;  %2520 = vrot.lane.b32.xlu0 %v6834_v2, %s6192_s14 }
 0x2a7   : > { %2329 = vrot.lane.b32.xlu1 %v6834_v2, %s6191_s13  ;;  %5928 = vmatprep.subr.mxu1 %v6848_v17  ;;  %v1110_v52 = vpop.permute.xlu1 %1109  ;;  %v1120_v56 = vpop.permute.xlu0 %1119 }
 0x2a8   : > { %5680 = vmatprep.subr.mxu0 %v1124_v48  ;;  %5929 = vmatpush3.msra.mxu1 %v6848_v17 }
 0x2a9   : > { %5681 = vmatpush3.msra.mxu0 %v1124_v48  ;;  %5930 = vmatprep.subr.mxu1 %v1052_v11  ;;  %v5173_v48 = vld [vmem:[%s7955_s3 + $0x188] sm:$0xff] }
 0x2aa   : > { %5682 = vmatprep.subr.mxu0 %v1122_v21  ;;  %5931 = vmatpush3.msra.mxu1 %v1052_v11 }
 0x2ab   : > { %5683 = vmatpush3.msra.mxu0 %v1122_v21  ;;  %2522 = vrot.lane.b32.xlu0 %v1047_v6, %s6192_s14  ;;  %v1106_v60 = vpop.permute.xlu1 %1105  ;;  %v1116_v0 = vpop.permute.xlu0 %1115 }
 0x2ac   : > { %2331 = vrot.lane.b32.xlu1 %v1047_v6, %s6191_s13  ;;  %5932 = vmatprep.subr.mxu1 %v1047_v6 }
 0x2ad   : > { %5684 = vmatprep.subr.mxu0 %v1120_v56  ;;  %5933 = vmatpush3.msra.mxu1 %v1047_v6 }
 0x2ae   : > { %5685 = vmatpush3.msra.mxu0 %v1120_v56  ;;  %5934 = vmatprep.subr.mxu1 %v6834_v2  ;;  %v5177_v56 = vld [vmem:[%s7955_s3 + $0x1a8] sm:$0xff] }
 0x2af   : > { %5686 = vmatprep.subr.mxu0 %v1118_v29  ;;  %5935 = vmatpush3.msra.mxu1 %v6834_v2  ;;  %v6880_v4 = vpop.permute.xlu1 %1444  ;;  %v1112_v8 = vpop.permute.xlu0 %1111 }
 0x2b0   : > { %5687 = vmatpush3.msra.mxu0 %v1118_v29  ;;  %2524 = vrot.lane.b32.xlu0 %v1052_v11, %s6192_s14  ;;  %v5086_v29 = vld [vmem:[%s7955_s3 + $0x50] sm:$0xff] }
 0x2b1   : > { %2333 = vrot.lane.b32.xlu1 %v1052_v11, %s6191_s13  ;;  %5936 = vmatprep.subr.mxu1 %v6828_v62 }
 0x2b2   : > { %5688 = vmatprep.subr.mxu0 %v1116_v0  ;;  %5937 = vmatpush3.msra.mxu1 %v6828_v62 }
 0x2b3   : > { %5689 = vmatpush3.msra.mxu0 %v1116_v0  ;;  %5938 = vmatprep.subr.mxu1 %v6822_v58  ;;  %v6887_v6 = vpop.permute.xlu1 %1440  ;;  %v1108_v10 = vpop.permute.xlu0 %1107 }
 0x2b4   : > { %5690 = vmatprep.subr.mxu0 %v1114_v44  ;;  %5939 = vmatpush3.msra.mxu1 %v6822_v58 }
 0x2b5   : > { %5691 = vmatpush3.msra.mxu0 %v1114_v44  ;;  %2526 = vrot.lane.b32.xlu0 %v6848_v17, %s6192_s14  ;;  %v5091_v44 = vld [vmem:[%s7955_s3 + $0x78] sm:$0xf] }
 0x2b6   : > { %2335 = vrot.lane.b32.xlu1 %v6848_v17, %s6191_s13  ;;  %5940 = vmatprep.subr.mxu1 %v6816_v54 }
 0x2b7   : > { %5692 = vmatprep.subr.mxu0 %v1112_v8  ;;  %5941 = vmatpush3.msra.mxu1 %v6816_v54  ;;  %v6896_v62 = vpop.permute.xlu1 %1436  ;;  %v1104_v2 = vpop.permute.xlu0 %1103 }
 0x2b8   : > { %5693 = vmatpush3.msra.mxu0 %v1112_v8  ;;  %5942 = vmatprep.subr.mxu1 %v6810_v50  ;;  %v1077_v8 = vld [vmem:[%s7955_s3 + $0x30] sm:$0xff] }
 0x2b9   : > { %5694 = vmatprep.subr.mxu0 %v1110_v52  ;;  %5943 = vmatpush3.msra.mxu1 %v6810_v50 }
 0x2ba   : > { %5695 = vmatpush3.msra.mxu0 %v1110_v52  ;;  %2528 = vrot.lane.b32.xlu0 %v6854_v25, %s6192_s14  ;;  %v5176_v52 = vld [vmem:[%s7955_s3 + $0x1a0] sm:$0xff] }
 0x2bb   : > { %2337 = vrot.lane.b32.xlu1 %v6854_v25, %s6191_s13  ;;  %5944 = vmatprep.subr.mxu1 %v6804_v46  ;;  %v6905_v11 = vpop.permute.xlu1 %1432  ;;  %v6907_v13 = vpop.permute.xlu0 %1442 }
 0x2bc   : > { %5696 = vmatprep.subr.mxu0 %v1108_v10  ;;  %5945 = vmatpush3.msra.mxu1 %v6804_v46 }
 0x2bd   : > { %5697 = vmatpush3.msra.mxu0 %v1108_v10  ;;  %5946 = vmatprep.subr.mxu1 %v6798_v42  ;;  %v5179_v10 = vld [vmem:[%s7955_s3 + $0x1b8] sm:$0xf] }
 0x2be   : > { %5698 = vmatprep.subr.mxu0 %v1106_v60  ;;  %5947 = vmatpush3.msra.mxu1 %v6798_v42 }
 0x2bf   : > { %5699 = vmatpush3.msra.mxu0 %v1106_v60  ;;  %2321 = vrot.lane.b32.xlu1 %v6810_v50, %s6191_s13  ;;  %v6914_v15 = vpop.permute.xlu1 %1428  ;;  %v6916_v17 = vpop.permute.xlu0 %1438  ;;  %v1076_v60 = vld [vmem:[%s7955_s3 + $0x28] sm:$0xff] }
 0x2c0   : > { %2339 = vrot.lane.b32.xlu0 %v6860_v35, %s6191_s13  ;;  %5948 = vmatprep.subr.mxu1 %v6792_v38 }
 0x2c1   : > { %5700 = vmatprep.subr.mxu0 %v1104_v2  ;;  %5949 = vmatpush3.msra.mxu1 %v6792_v38 }
 0x2c2   : > { %5701 = vmatpush3.msra.mxu0 %v1104_v2  ;;  %5950 = vmatprep.subr.mxu1 %v6786_v33  ;;  %v1078_v2 = vld [vmem:[%s7955_s3 + $0x38] sm:$0xf] }
 0x2c3   : > { %5714 = vmatprep.subr.mxu0 %v6680_v61  ;;  %5951 = vmatpush3.msra.mxu1 %v6786_v33  ;;  %v6928_v21 = vpop.permute.xlu1 %1424  ;;  %v6930_v23 = vpop.permute.xlu0 %1434 }
 0x2c4   : > { %5703 = vmatmul.mubr.msk.f32.vlgmr.msra.gmra.mxu0 %vm1148_vm1, %v5085_v19  ;;  %2319 = vrot.lane.b32.xlu1 %v6804_v46, %s6191_s13  ;;  %v5108_v19 = vld [vmem:[%s7955_s3 + $0x80] sm:$0xff] }
 0x2c5   : > { %5715 = vmatpush3.msra.mxu0 %v6680_v61  ;;  %2530 = vrot.lane.b32.xlu0 %v6860_v35, %s6192_s14  ;;  %v5172_v61 = vld [vmem:[%s7955_s3 + $0x180] sm:$0xff]  ;;  %v5087_v35 = vld [vmem:[%s7955_s3 + $0x58] sm:$0xff] }
 0x2c6   : > { %5952 = vmatprep.subr.mxu1 %v6780_v30  ;;  %5716 = vmatprep.subr.mxu0 %v6676_v59 }
 0x2c7   : > { %5953 = vmatpush3.msra.mxu1 %v6780_v30  ;;  %5717 = vmatpush3.msra.mxu0 %v6676_v59  ;;  %v6942_v25 = vpop.permute.xlu1 %1420  ;;  %v6944_v27 = vpop.permute.xlu0 %1430 }
 0x2c8   : > { %5718 = vmatprep.subr.mxu0 %v6672_v57  ;;  %2317 = vrot.lane.b32.xlu1 %v6798_v42, %s6191_s13 }
 0x2c9   : > { %5719 = vmatpush3.msra.mxu0 %v6672_v57  ;;  %2516 = vrot.lane.b32.xlu0 %v6822_v58, %s6192_s14  ;;  %v5088_v57 = vld [vmem:[%s7955_s3 + $0x60] sm:$0xff] }
 0x2ca   : > { %5720 = vmatprep.subr.mxu0 %v6670_v55  ;;  %5705 = vmatprep.mubr.msk.f32.mxu0 %vm1148_vm1, %v5086_v29 }
 0x2cb   : > { %5721 = vmatpush3.msra.mxu0 %v6670_v55  ;;  %v6961_v59 = vpop.permute.xlu1 %1416  ;;  %v6963_v31 = vpop.permute.xlu0 %1426  ;;  %5954 = vmatprep.mubr.msk.f32.mxu1 %vm1148_vm1, %v5172_v61 }
 0x2cc   : > { %5722 = vmatprep.subr.mxu0 %v6668_v53  ;;  %2315 = vrot.lane.b32.xlu1 %v6792_v38, %s6191_s13 }
 0x2cd   : > { %5723 = vmatpush3.msra.mxu0 %v6668_v53  ;;  %2514 = vrot.lane.b32.xlu0 %v6816_v54, %s6192_s14  ;;  %v5090_v53 = vld [vmem:[%s7955_s3 + $0x70] sm:$0xff] }
 0x2ce   : > { %5724 = vmatprep.subr.mxu0 %v6666_v51  ;;  %5706 = vmatmul.mubr.msk.f32.gmra.mxu0 %vm1148_vm1, %v5087_v35 }
 0x2cf   : > { %5725 = vmatpush3.msra.mxu0 %v6666_v51  ;;  %v6981_v55 = vpop.permute.xlu0 %1422  ;;  %v6983_v58 = vpop.permute.xlu1 %1770  ;;  %5708 = vmatprep.mubr.msk.f32.mxu0 %vm1148_vm1, %v5088_v57 }
 0x2d0   : > { %5726 = vmatprep.subr.mxu0 %v6664_v49  ;;  %2313 = vrot.lane.b32.xlu1 %v6786_v33, %s6191_s13 }
 0x2d1   : > { %5727 = vmatpush3.msra.mxu0 %v6664_v49  ;;  %2512 = vrot.lane.b32.xlu0 %v6810_v50, %s6192_s14  ;;  %v1071_v49 = vld [vmem:[%s7955_s3] sm:$0xff] }
 0x2d2   : > { %5728 = vmatprep.subr.mxu0 %v6662_v47  ;;  %5709 = vmatmul.mubr.msk.f32.gmra.mxu0 %vm1148_vm1, %v5089_v40  ;;  %v5111_v40 = vld [vmem:[%s7955_s3 + $0x98] sm:$0xff] }
 0x2d3   : > { %5729 = vmatpush3.msra.mxu0 %v6662_v47  ;;  %v7001_v51 = vpop.permute.xlu0 %1418  ;;  %v7003_v54 = vpop.permute.xlu1 %1774  ;;  %5711 = vmatprep.mubr.msk.f32.mxu0 %vm1148_vm1, %v5090_v53 }
 0x2d4   : > { %5730 = vmatprep.subr.mxu0 %v6660_v45  ;;  %2311 = vrot.lane.b32.xlu1 %v6780_v30, %s6191_s13 }
 0x2d5   : > { %5731 = vmatpush3.msra.mxu0 %v6660_v45  ;;  %2510 = vrot.lane.b32.xlu0 %v6804_v46, %s6192_s14  ;;  %v1075_v46 = vld [vmem:[%s7955_s3 + $0x20] sm:$0xff] }
 0x2d6   : > { %5732 = vmatprep.subr.mxu0 %v6658_v43  ;;  %5712 = vmatmul.mubr.msk.f32.gmra.mxu0 %vm1148_vm1, %v5091_v44 }
 0x2d7   : > { %5733 = vmatpush3.msra.mxu0 %v6658_v43  ;;  %v7021_v47 = vpop.permute.xlu0 %1768  ;;  %v7023_v50 = vpop.permute.xlu1 %1778  ;;  %5744 = vmatprep.mubr.msk.f32.mxu0 %vm1148_vm1, %v1071_v49 }
 0x2d8   : > { %5734 = vmatprep.subr.mxu0 %v6656_v41  ;;  %2502 = vrot.lane.b32.xlu1 %v6780_v30, %s6192_s14 }
 0x2d9   : > { %5735 = vmatpush3.msra.mxu0 %v6656_v41  ;;  %2508 = vrot.lane.b32.xlu0 %v6798_v42, %s6192_s14  ;;  %v1072_v41 = vld [vmem:[%s7955_s3 + $0x8] sm:$0xff] }
 0x2da   : > { %5736 = vmatprep.subr.mxu0 %v6654_v39  ;;  %5955 = vmatmul.mubr.msk.f32.vlgmr.msra.gmra.mxu1 %vm1148_vm1, %v5173_v48 }
 0x2db   : > { %5737 = vmatpush3.msra.mxu0 %v6654_v39  ;;  %v7038_v43 = vpop.permute.xlu0 %1772  ;;  %v7040_v45 = vpop.permute.xlu1 %1782 }
 0x2dc   : > { %5738 = vmatprep.subr.mxu0 %v6652_v37 }
 0x2dd   : > { %5739 = vmatpush3.msra.mxu0 %v6652_v37  ;;  %2506 = vrot.lane.b32.xlu0 %v6792_v38, %s6192_s14  ;;  %v1073_v37 = vld [vmem:[%s7955_s3 + $0x10] sm:$0xff]  ;;  %v5175_v38 = vld [vmem:[%s7955_s3 + $0x198] sm:$0xff] }
 0x2de   : > { %5740 = vmatprep.subr.mxu0 %v6650_v34 }
 0x2df   : > { %5741 = vmatpush3.msra.mxu0 %v6650_v34  ;;  %v7051_v39 = vpop.permute.xlu0 %1776  ;;  %v7053_v30 = vpop.permute.xlu1 %1786  ;;  %v5174_v34 = vld [vmem:[%s7955_s3 + $0x190] sm:$0xff] }
 0x2e0   : > { %5742 = vmatprep.subr.mxu0 %v6648_v32  ;;  %5957 = vmatprep.mubr.msk.f32.mxu1 %vm1148_vm1, %v5174_v34 }
 0x2e1   : > { %5743 = vmatpush3.msra.mxu0 %v6648_v32  ;;  %2504 = vrot.lane.b32.xlu0 %v6786_v33, %s6192_s14  ;;  %v1074_v32 = vld [vmem:[%s7955_s3 + $0x18] sm:$0xff]  ;;  %s6195_s14 = smov 127  }
 0x2e2   : > { %5745 = vmatmul.mubr.msk.f32.vlgmr.msra.gmra.mxu0 %vm1148_vm1, %v1072_v41  ;;  %5756 = vmatprep.subr.mxu0 %v6880_v4 }
 0x2e3   : > { %5757 = vmatpush3.msra.mxu0 %v6880_v4  ;;  %5747 = vmatprep.mubr.msk.f32.mxu0 %vm1148_vm1, %v1073_v37  ;;  %v7075_v33 = vpop.permute.xlu0 %1780  ;;  %v7077_v42 = vpop.permute.xlu1 %1790 }
 0x2e4   : > { %5758 = vmatprep.subr.mxu0 %v6907_v13  ;;  %5958 = vmatmul.mubr.msk.f32.gmra.mxu1 %vm1148_vm1, %v5175_v38  ;;  %v5129_v38 = vld [vmem:[%s7955_s3 + $0xe8] sm:$0xff] }
 0x2e5   : > { %5759 = vmatpush3.msra.mxu0 %v6907_v13  ;;  %5960 = vmatprep.mubr.msk.f32.mxu1 %vm1148_vm1, %v5176_v52  ;;  %v5131_v52 = vld [vmem:[%s7955_s3 + $0xf8] sm:$0xf] }
 0x2e6   : > { %5760 = vmatprep.subr.mxu0 %v6887_v6  ;;  %5748 = vmatmul.mubr.msk.f32.gmra.mxu0 %vm1148_vm1, %v1074_v32 }
 0x2e7   : > { %5761 = vmatpush3.msra.mxu0 %v6887_v6  ;;  %5750 = vmatprep.mubr.msk.f32.mxu0 %vm1148_vm1, %v1075_v46  ;;  %v7099_v0 = vpop.permute.xlu0 %1784  ;;  %v7101_v4 = vpop.permute.xlu1 %1794  ;;  %v5178_v6 = vld [vmem:[%s7955_s3 + $0x1b0] sm:$0xff] }
 0x2e8   : > { %5762 = vmatprep.subr.mxu0 %v6916_v17  ;;  %5961 = vmatmul.mubr.msk.f32.gmra.mxu1 %vm1148_vm1, %v5177_v56  ;;  %v5130_v46 = vld [vmem:[%s7955_s3 + $0xf0] sm:$0xff] }
 0x2e9   : > { %5763 = vmatpush3.msra.mxu0 %v6916_v17  ;;  %5963 = vmatprep.mubr.msk.f32.mxu1 %vm1148_vm1, %v5178_v6  ;;  %v6193_v6 = vmov 0  }
 0x2ea   : > { %5764 = vmatprep.subr.mxu0 %v6896_v62  ;;  %5751 = vmatmul.mubr.msk.f32.gmra.mxu0 %vm1148_vm1, %v1076_v60 }
 0x2eb   : > { %5765 = vmatpush3.msra.mxu0 %v6896_v62  ;;  %5753 = vmatprep.mubr.msk.f32.mxu0 %vm1148_vm1, %v1077_v8  ;;  %v7123_v13 = vpop.permute.xlu0 %1788  ;;  %v7125_v17 = vpop.permute.xlu1 %1983 }
 0x2ec   : > { %5766 = vmatprep.subr.mxu0 %v6930_v23  ;;  %5964 = vmatmul.mubr.msk.f32.gmra.mxu1 %vm1148_vm1, %v5179_v10  ;;  %v5141_v10 = vld [vmem:[%s7955_s3 + $0x108] sm:$0xff] }
 0x2ed   : > { %5767 = vmatpush3.msra.mxu0 %v6930_v23  ;;  %6168 = vset.pattern.permute.xlu0 %v6193_v6 }
 0x2ee   : > { %5768 = vmatprep.subr.mxu0 %v6905_v11  ;;  %5754 = vmatmul.mubr.msk.f32.gmra.mxu0 %vm1148_vm1, %v1078_v2 }
 0x2ef   : > { %5769 = vmatpush3.msra.mxu0 %v6905_v11  ;;  %v7137_v62 = vpop.permute.xlu0 %1792  ;;  %v7139_v29 = vpop.permute.xlu1 %1979  ;;  %5786 = vmatprep.mubr.msk.f32.mxu0 %vm1148_vm1, %v5108_v19 }
 0x2f0   : > { %5770 = vmatprep.subr.mxu0 %v6944_v27  ;;  %6169 = vset.pattern.permute.xlu1 %v6193_v6 }
 0x2f1   : > { %5771 = vmatpush3.msra.mxu0 %v6944_v27 }
 0x2f2   : > { %5772 = vmatprep.subr.mxu0 %v6914_v15 }
 0x2f3   : > { %5773 = vmatpush3.msra.mxu0 %v6914_v15  ;;  %v7146_v23 = vpop.permute.xlu1 %1975  ;;  %v7148_v61 = vpop.permute.xlu0 %1796  ;;  %v5204_v15 = vld [vmem:[%s7955_s3 + $0x200] sm:$0xff] }
 0x2f4   : > { %5774 = vmatprep.subr.mxu0 %v6963_v31  ;;  %6038 = vmatprep.mubr.msk.f32.mxu1 %vm1148_vm1, %v5204_v15  ;;  %v5147_v15 = vld [vmem:[%s7955_s3 + $0x138] sm:$0xf] }
 0x2f5   : > { %5775 = vmatpush3.msra.mxu0 %v6963_v31 }
 0x2f6   : > { %5776 = vmatprep.subr.mxu0 %v6928_v21 }
 0x2f7   : > { %5777 = vmatpush3.msra.mxu0 %v6928_v21  ;;  %v7154_v11 = vpop.permute.xlu1 %1971  ;;  %v7156_v35 = vpop.permute.xlu0 %1985  ;;  %v5109_v21 = vld [vmem:[%s7955_s3 + $0x88] sm:$0xff] }
 0x2f8   : > { %5778 = vmatprep.subr.mxu0 %v6981_v55 }
 0x2f9   : > { %5779 = vmatpush3.msra.mxu0 %v6981_v55 }
 0x2fa   : > { %5780 = vmatprep.subr.mxu0 %v6942_v25 }
 0x2fb   : > { %5781 = vmatpush3.msra.mxu0 %v6942_v25  ;;  %v7165_v27 = vpop.permute.xlu1 %1967  ;;  %v7167_v31 = vpop.permute.xlu0 %1981  ;;  %v5110_v25 = vld [vmem:[%s7955_s3 + $0x90] sm:$0xff] }
 0x2fc   : > { %5782 = vmatprep.subr.mxu0 %v7001_v51 }
 0x2fd   : > { %5783 = vmatpush3.msra.mxu0 %v7001_v51 }
 0x2fe   : > { %5784 = vmatprep.subr.mxu0 %v6961_v59 }
 0x2ff   : > { %5785 = vmatpush3.msra.mxu0 %v6961_v59  ;;  %v7180_v57 = vpop.permute.xlu1 %1963  ;;  %v7182_v55 = vpop.permute.xlu0 %1977  ;;  %v5112_v59 = vld [vmem:[%s7955_s3 + $0xa0] sm:$0xff] }
 0x300   : > { %5787 = vmatmul.mubr.msk.f32.vlgmr.msra.gmra.mxu0 %vm1148_vm1, %v5109_v21  ;;  %5798 = vmatprep.subr.mxu0 %v6774_v28 }
 0x301   : > { %5799 = vmatpush3.msra.mxu0 %v6774_v28  ;;  %5789 = vmatprep.mubr.msk.f32.mxu0 %vm1148_vm1, %v5110_v25  ;;  %v5113_v28 = vld [vmem:[%s7955_s3 + $0xa8] sm:$0xff] }
 0x302   : > { %5800 = vmatprep.subr.mxu0 %v6768_v26 }
 0x303   : > { %5801 = vmatpush3.msra.mxu0 %v6768_v26  ;;  %v7196_v53 = vpop.permute.xlu1 %1959  ;;  %v7198_v51 = vpop.permute.xlu0 %1973  ;;  %v5114_v26 = vld [vmem:[%s7955_s3 + $0xb0] sm:$0xff] }
 0x304   : > { %5790 = vmatmul.mubr.msk.f32.gmra.mxu0 %vm1148_vm1, %v5111_v40  ;;  %5802 = vmatprep.subr.mxu0 %v6762_v24  ;;  %v5206_v40 = vld [vmem:[%s7955_s3 + $0x210] sm:$0xff] }
 0x305   : > { %5803 = vmatpush3.msra.mxu0 %v6762_v24  ;;  %5792 = vmatprep.mubr.msk.f32.mxu0 %vm1148_vm1, %v5112_v59  ;;  %v5115_v24 = vld [vmem:[%s7955_s3 + $0xb8] sm:$0xf]  ;;  %v5158_v59 = vld [vmem:[%s7955_s3 + $0x150] sm:$0xff] }
 0x306   : > { %5804 = vmatprep.subr.mxu0 %v6756_v22 }
 0x307   : > { %5805 = vmatpush3.msra.mxu0 %v6756_v22  ;;  %v7212_v44 = vpop.permute.xlu1 %1987  ;;  %v7214_v49 = vpop.permute.xlu0 %1969  ;;  %v5124_v22 = vld [vmem:[%s7955_s3 + $0xc0] sm:$0xff] }
 0x308   : > { %5793 = vmatmul.mubr.msk.f32.gmra.mxu0 %vm1148_vm1, %v5113_v28  ;;  %5806 = vmatprep.subr.mxu0 %v6750_v20  ;;  %v5208_v28 = vld [vmem:[%s7955_s3 + $0x220] sm:$0xff] }
 0x309   : > { %5807 = vmatpush3.msra.mxu0 %v6750_v20  ;;  %5795 = vmatprep.mubr.msk.f32.mxu0 %vm1148_vm1, %v5114_v26  ;;  %v5160_v26 = vld [vmem:[%s7955_s3 + $0x160] sm:$0xff] }
 0x30a   : > { %5808 = vmatprep.subr.mxu0 %v6744_v18 }
 0x30b   : > { %5809 = vmatpush3.msra.mxu0 %v6744_v18  ;;  %v7228_v48 = vpop.permute.xlu0 %1965  ;;  %v7230_v41 = vpop.permute.xlu1 %2323 }
 0x30c   : > { %5796 = vmatmul.mubr.msk.f32.gmra.mxu0 %vm1148_vm1, %v5115_v24  ;;  %5810 = vmatprep.subr.mxu0 %v6738_v16  ;;  %v5161_v24 = vld [vmem:[%s7955_s3 + $0x168] sm:$0xff] }
 0x30d   : > { %5811 = vmatpush3.msra.mxu0 %v6738_v16  ;;  %5828 = vmatprep.mubr.msk.f32.mxu0 %vm1148_vm1, %v5124_v22  ;;  %v5162_v22 = vld [vmem:[%s7955_s3 + $0x170] sm:$0xff] }
 0x30e   : > { %5812 = vmatprep.subr.mxu0 %v6732_v14 }
 0x30f   : > { %5813 = vmatpush3.msra.mxu0 %v6732_v14  ;;  %v7238_v20 = vpop.permute.xlu0 %1961 }
 0x310   : > { %5814 = vmatprep.subr.mxu0 %v6726_v12  ;;  %v7241_v18 = vpop.permute.xlu1 %2325 }
 0x311   : > { %5815 = vmatpush3.msra.mxu0 %v6726_v12 }
 0x312   : > { %5816 = vmatprep.subr.mxu0 %v6716_v9 }
 0x313   : > { %5817 = vmatpush3.msra.mxu0 %v6716_v9  ;;  %v7246_v37 = vpop.permute.xlu0 %2518 }
 0x314   : > { %5818 = vmatprep.subr.mxu0 %v6710_v7  ;;  %v7249_v16 = vpop.permute.xlu1 %2327 }
 0x315   : > { %5819 = vmatpush3.msra.mxu0 %v6710_v7  ;;  %v5125_v7 = vld [vmem:[%s7955_s3 + $0xc8] sm:$0xff] }
 0x316   : > { %5820 = vmatprep.subr.mxu0 %v6704_v5 }
 0x317   : > { %5821 = vmatpush3.msra.mxu0 %v6704_v5  ;;  %v5126_v5 = vld [vmem:[%s7955_s3 + $0xd0] sm:$0xff] }
 0x318   : > { %5822 = vmatprep.subr.mxu0 %v6698_v3  ;;  %v7255_v14 = vpop.permute.xlu0 %2520 }
 0x319   : > { %5823 = vmatpush3.msra.mxu0 %v6698_v3  ;;  %v7258_v12 = vpop.permute.xlu1 %2329 }
 0x31a   : > { %5824 = vmatprep.subr.mxu0 %v6692_v1 }
 0x31b   : > { %5825 = vmatpush3.msra.mxu0 %v6692_v1  ;;  %v5127_v1 = vld [vmem:[%s7955_s3 + $0xd8] sm:$0xff] }
 0x31c   : > { %5826 = vmatprep.subr.mxu0 %v6686_v63 }
 0x31d   : > { %5827 = vmatpush3.msra.mxu0 %v6686_v63  ;;  %v7270_v9 = vpop.permute.xlu0 %2522  ;;  %v5128_v63 = vld [vmem:[%s7955_s3 + $0xe0] sm:$0xff] }
 0x31e   : > { %5829 = vmatmul.mubr.msk.f32.vlgmr.msra.gmra.mxu0 %vm1148_vm1, %v5125_v7  ;;  %5840 = vmatprep.subr.mxu0 %v7148_v61  ;;  %v7274_v3 = vpop.permute.xlu1 %2331  ;;  %v2686_v7 = vld [vmem:[%s7956_s4 + $0x10] sm:$0xff] }
 0x31f   : > { %5841 = vmatpush3.msra.mxu0 %v7148_v61  ;;  %5831 = vmatprep.mubr.msk.f32.mxu0 %vm1148_vm1, %v5126_v5  ;;  %v2684_v5 = vld [vmem:[%s7956_s4] sm:$0xff] }
 0x320   : > { %5842 = vmatprep.subr.mxu0 %v7101_v4  ;;  %2704 = vperm.xlu1 %6169, %v2686_v7  }
 0x321   : > { %5843 = vmatpush3.msra.mxu0 %v7101_v4 }
 0x322   : > { %5832 = vmatmul.mubr.msk.f32.gmra.mxu0 %vm1148_vm1, %v5127_v1  ;;  %5844 = vmatprep.subr.mxu0 %v7137_v62  ;;  %v7288_v34 = vpop.permute.xlu0 %2524  ;;  %v5192_v1 = vld [vmem:[%s7955_s3 + $0x1e0] sm:$0xff] }
 0x323   : > { %5845 = vmatpush3.msra.mxu0 %v7137_v62  ;;  %5834 = vmatprep.mubr.msk.f32.mxu0 %vm1148_vm1, %v5128_v63  ;;  %v7295_v32 = vpop.permute.xlu1 %2333  ;;  %v5145_v62 = vld [vmem:[%s7955_s3 + $0x128] sm:$0xff] }
 0x324   : > { %5846 = vmatprep.subr.mxu0 %v7077_v42  ;;  %v5193_v63 = vld [vmem:[%s7955_s3 + $0x1e8] sm:$0xff] }
 0x325   : > { %5847 = vmatpush3.msra.mxu0 %v7077_v42  ;;  %v5140_v42 = vld [vmem:[%s7955_s3 + $0x100] sm:$0xff] }
 0x326   : > { %5835 = vmatmul.mubr.msk.f32.gmra.mxu0 %vm1148_vm1, %v5129_v38  ;;  %5848 = vmatprep.subr.mxu0 %v7123_v13  ;;  %v5195_v38 = vld [vmem:[%s7955_s3 + $0x1f8] sm:$0xf] }
 0x327   : > { %5849 = vmatpush3.msra.mxu0 %v7123_v13  ;;  %5837 = vmatprep.mubr.msk.f32.mxu0 %vm1148_vm1, %v5130_v46  ;;  %v2527_v56 = vpop.permute.xlu0 %2526  ;;  %v5144_v13 = vld [vmem:[%s7955_s3 + $0x120] sm:$0xff] }
 0x328   : > { %5850 = vmatprep.subr.mxu0 %v7053_v30  ;;  %v7310_v60 = vpop.permute.xlu1 %2335 }
 0x329   : > { %5851 = vmatpush3.msra.mxu0 %v7053_v30  ;;  %v2685_v30 = vld [vmem:[%s7956_s4 + $0x8] sm:$0xff] }
 0x32a   : > { %5838 = vmatmul.mubr.msk.f32.gmra.mxu0 %vm1148_vm1, %v5131_v52  ;;  %5852 = vmatprep.subr.mxu0 %v7099_v0 }
 0x32b   : > { %5853 = vmatpush3.msra.mxu0 %v7099_v0  ;;  %5870 = vmatprep.mubr.msk.f32.mxu0 %vm1148_vm1, %v5140_v42 }
 0x32c   : > { %5854 = vmatprep.subr.mxu0 %v7040_v45  ;;  %v2529_v4 = vpop.permute.xlu0 %2528  ;;  %2699 = vperm.xlu0 %6168, %v2685_v30  }
 0x32d   : > { %5855 = vmatpush3.msra.mxu0 %v7040_v45  ;;  %v7322_v8 = vpop.permute.xlu1 %2337 }
 0x32e   : > { %5856 = vmatprep.subr.mxu0 %v7075_v33 }
 0x32f   : > { %5857 = vmatpush3.msra.mxu0 %v7075_v33 }
 0x330   : > { %5858 = vmatprep.subr.mxu0 %v7023_v50 }
 0x331   : > { %5859 = vmatpush3.msra.mxu0 %v7023_v50  ;;  %v7335_v45 = vpop.permute.xlu1 %2321  ;;  %v2688_v50 = vld [vmem:[%s7956_s4 + $0x20] sm:$0xff] }
 0x332   : > { %5860 = vmatprep.subr.mxu0 %v7051_v39  ;;  %v7332_v0 = vpop.permute.xlu0 %2339  ;;  %2714 = vperm.xlu0 %6168, %v2688_v50  }
 0x333   : > { %5861 = vmatpush3.msra.mxu0 %v7051_v39 }
 0x334   : > { %5862 = vmatprep.subr.mxu0 %v7003_v54 }
 0x335   : > { %5863 = vmatpush3.msra.mxu0 %v7003_v54 }
 0x336   : > { %5864 = vmatprep.subr.mxu0 %v7038_v43  ;;  %v7345_v39 = vpop.permute.xlu1 %2319 }
 0x337   : > { %5865 = vmatpush3.msra.mxu0 %v7038_v43  ;;  %v2531_v33 = vpop.permute.xlu0 %2530 }
 0x338   : > { %5866 = vmatprep.subr.mxu0 %v6983_v58  ;;  %6008 = vmatprep.subr.mxu1 %v2531_v33 }
 0x339   : > { %5867 = vmatpush3.msra.mxu0 %v6983_v58  ;;  %6009 = vmatpush3.msra.mxu1 %v2531_v33  ;;  %v5142_v58 = vld [vmem:[%s7955_s3 + $0x110] sm:$0xff] }
 0x33a   : > { %5868 = vmatprep.subr.mxu0 %v7021_v47  ;;  %6010 = vmatprep.subr.mxu1 %v2529_v4  ;;  %v7363_v43 = vpop.permute.xlu1 %2317 }
 0x33b   : > { %5869 = vmatpush3.msra.mxu0 %v7021_v47  ;;  %v2517_v54 = vpop.permute.xlu0 %2516  ;;  %6011 = vmatpush3.msra.mxu1 %v2529_v4  ;;  %v5143_v47 = vld [vmem:[%s7955_s3 + $0x118] sm:$0xff] }
 0x33c   : > { %5871 = vmatmul.mubr.msk.f32.vlgmr.msra.gmra.mxu0 %vm1148_vm1, %v5141_v10  ;;  %5882 = vmatprep.subr.mxu0 %v7212_v44 }
 0x33d   : > { %6012 = vmatprep.subr.mxu1 %v2527_v56  ;;  %5883 = vmatpush3.msra.mxu0 %v7212_v44  ;;  %v5209_v44 = vld [vmem:[%s7955_s3 + $0x228] sm:$0xff] }
 0x33e   : > { %6013 = vmatpush3.msra.mxu1 %v2527_v56  ;;  %5884 = vmatprep.subr.mxu0 %v7156_v35  ;;  %v7383_v61 = vpop.permute.xlu1 %2315 }
 0x33f   : > { %6014 = vmatprep.subr.mxu1 %v7288_v34  ;;  %5873 = vmatprep.mubr.msk.f32.mxu0 %vm1148_vm1, %v5142_v58  ;;  %v2515_v2 = vpop.permute.xlu0 %2514 }
 0x340   : > { %5885 = vmatpush3.msra.mxu0 %v7156_v35  ;;  %6015 = vmatpush3.msra.mxu1 %v7288_v34  ;;  %v5194_v34 = vld [vmem:[%s7955_s3 + $0x1f0] sm:$0xff] }
 0x341   : > { %5874 = vmatmul.mubr.msk.f32.gmra.mxu0 %vm1148_vm1, %v5143_v47  ;;  %5886 = vmatprep.subr.mxu0 %v7125_v17 }
 0x342   : > { %6016 = vmatprep.subr.mxu1 %v7270_v9  ;;  %5887 = vmatpush3.msra.mxu0 %v7125_v17  ;;  %v5146_v17 = vld [vmem:[%s7955_s3 + $0x130] sm:$0xff] }
 0x343   : > { %6017 = vmatpush3.msra.mxu1 %v7270_v9  ;;  %5888 = vmatprep.subr.mxu0 %v7167_v31  ;;  %v2513_v19 = vpop.permute.xlu0 %2512  ;;  %v5190_v9 = vld [vmem:[%s7955_s3 + $0x1d0] sm:$0xff] }
 0x344   : > { %6018 = vmatprep.subr.mxu1 %v7255_v14  ;;  %5876 = vmatprep.mubr.msk.f32.mxu0 %vm1148_vm1, %v5144_v13 }
 0x345   : > { %5889 = vmatpush3.msra.mxu0 %v7167_v31  ;;  %6019 = vmatpush3.msra.mxu1 %v7255_v14  ;;  %v7401_v31 = vpop.permute.xlu1 %2313  ;;  %v5188_v14 = vld [vmem:[%s7955_s3 + $0x1c0] sm:$0xff] }
 0x346   : > { %5877 = vmatmul.mubr.msk.f32.gmra.mxu0 %vm1148_vm1, %v5145_v62  ;;  %5890 = vmatprep.subr.mxu0 %v7139_v29 }
 0x347   : > { %6020 = vmatprep.subr.mxu1 %v7246_v37  ;;  %5891 = vmatpush3.msra.mxu0 %v7139_v29  ;;  %v2511_v35 = vpop.permute.xlu0 %2510 }
 0x348   : > { %6021 = vmatpush3.msra.mxu1 %v7246_v37  ;;  %5892 = vmatprep.subr.mxu0 %v7182_v55  ;;  %v5163_v37 = vld [vmem:[%s7955_s3 + $0x178] sm:$0xf] }
 0x349   : > { %6022 = vmatprep.subr.mxu1 %v2517_v54  ;;  %5879 = vmatprep.mubr.msk.f32.mxu0 %vm1148_vm1, %v5146_v17  ;;  %v7410_v25 = vpop.permute.xlu1 %2311 }
 0x34a   : > { %5893 = vmatpush3.msra.mxu0 %v7182_v55  ;;  %6023 = vmatpush3.msra.mxu1 %v2517_v54  ;;  %v5156_v55 = vld [vmem:[%s7955_s3 + $0x140] sm:$0xff] }
 0x34b   : > { %5880 = vmatmul.mubr.msk.f32.gmra.mxu0 %vm1148_vm1, %v5147_v15  ;;  %5894 = vmatprep.subr.mxu0 %v7146_v23  ;;  %v2509_v29 = vpop.permute.xlu0 %2508 }
 0x34c   : > { %6024 = vmatprep.subr.mxu1 %v2515_v2  ;;  %5895 = vmatpush3.msra.mxu0 %v7146_v23 }
 0x34d   : > { %6025 = vmatpush3.msra.mxu1 %v2515_v2  ;;  %5896 = vmatprep.subr.mxu0 %v7198_v51 }
 0x34e   : > { %6026 = vmatprep.subr.mxu1 %v2513_v19  ;;  %5897 = vmatpush3.msra.mxu0 %v7198_v51  ;;  %v5207_v51 = vld [vmem:[%s7955_s3 + $0x218] sm:$0xff] }
 0x34f   : > { %6027 = vmatpush3.msra.mxu1 %v2513_v19  ;;  %5898 = vmatprep.subr.mxu0 %v7154_v11  ;;  %v2507_v21 = vpop.permute.xlu0 %2506 }
 0x350   : > { %6028 = vmatprep.subr.mxu1 %v2511_v35  ;;  %5899 = vmatpush3.msra.mxu0 %v7154_v11  ;;  %v2503_v11 = vpop.permute.xlu1 %2502 }
 0x351   : > { %6029 = vmatpush3.msra.mxu1 %v2511_v35  ;;  %5900 = vmatprep.subr.mxu0 %v7214_v49 }
 0x352   : > { %6030 = vmatprep.subr.mxu1 %v2509_v29  ;;  %5901 = vmatpush3.msra.mxu0 %v7214_v49  ;;  %v5210_v49 = vld [vmem:[%s7955_s3 + $0x230] sm:$0xff] }
 0x353   : > { %6031 = vmatpush3.msra.mxu1 %v2509_v29  ;;  %5902 = vmatprep.subr.mxu0 %v7165_v27  ;;  %v2505_v23 = vpop.permute.xlu0 %2504 }
 0x354   : > { %6032 = vmatprep.subr.mxu1 %v2507_v21  ;;  %5903 = vmatpush3.msra.mxu0 %v7165_v27  ;;  %v5205_v27 = vld [vmem:[%s7955_s3 + $0x208] sm:$0xff] }
 0x355   : > { %6033 = vmatpush3.msra.mxu1 %v2507_v21  ;;  %5904 = vmatprep.subr.mxu0 %v7228_v48 }
 0x356   : > { %5905 = vmatpush3.msra.mxu0 %v7228_v48  ;;  %6034 = vmatprep.subr.mxu1 %v2505_v23  ;;  %v5211_v48 = vld [vmem:[%s7955_s3 + $0x238] sm:$0xf] }
 0x357   : > { %5906 = vmatprep.subr.mxu0 %v7180_v57  ;;  %6035 = vmatpush3.msra.mxu1 %v2505_v23 }
 0x358   : > { %5907 = vmatpush3.msra.mxu0 %v7180_v57  ;;  %6036 = vmatprep.subr.mxu1 %v2503_v11  ;;  %v5157_v57 = vld [vmem:[%s7955_s3 + $0x148] sm:$0xff] }
 0x359   : > { %5908 = vmatprep.subr.mxu0 %v7238_v20  ;;  %6037 = vmatpush3.msra.mxu1 %v2503_v11 }
 0x35a   : > { %5909 = vmatpush3.msra.mxu0 %v7238_v20  ;;  %5912 = vmatprep.mubr.msk.f32.mxu0 %vm1148_vm1, %v5156_v55  ;;  %v2690_v20 = vld [vmem:[%s7956_s4 + $0x30] sm:$0xff] }
 0x35b   : > { %5910 = vmatprep.subr.mxu0 %v7196_v53  ;;  %6039 = vmatmul.mubr.msk.f32.vlgmr.msra.gmra.mxu1 %vm1148_vm1, %v5205_v27 }
 0x35c   : > { %5911 = vmatpush3.msra.mxu0 %v7196_v53  ;;  %6041 = vmatprep.mubr.msk.f32.mxu1 %vm1148_vm1, %v5206_v40  ;;  %v5159_v53 = vld [vmem:[%s7955_s3 + $0x158] sm:$0xff] }
 0x35d   : > { %5913 = vmatmul.mubr.msk.f32.vlgmr.msra.gmra.mxu0 %vm1148_vm1, %v5157_v57  ;;  %5966 = vmatprep.subr.mxu0 %v7332_v0 }
 0x35e   : > { %5967 = vmatpush3.msra.mxu0 %v7332_v0  ;;  %5915 = vmatprep.mubr.msk.f32.mxu0 %vm1148_vm1, %v5158_v59 }
 0x35f   : > { %5968 = vmatprep.subr.mxu0 %v7322_v8  ;;  %6042 = vmatmul.mubr.msk.f32.gmra.mxu1 %vm1148_vm1, %v5207_v51 }
 0x360   : > { %5969 = vmatpush3.msra.mxu0 %v7322_v8  ;;  %6044 = vmatprep.mubr.msk.f32.mxu1 %vm1148_vm1, %v5208_v28 }
 0x361   : > { %5916 = vmatmul.mubr.msk.f32.gmra.mxu0 %vm1148_vm1, %v5159_v53  ;;  %5970 = vmatprep.subr.mxu0 %v7310_v60 }
 0x362   : > { %5971 = vmatpush3.msra.mxu0 %v7310_v60  ;;  %5918 = vmatprep.mubr.msk.f32.mxu0 %vm1148_vm1, %v5160_v26 }
 0x363   : > { %5972 = vmatprep.subr.mxu0 %v7295_v32  ;;  %6045 = vmatmul.mubr.msk.f32.gmra.mxu1 %vm1148_vm1, %v5209_v44 }
 0x364   : > { %5973 = vmatpush3.msra.mxu0 %v7295_v32  ;;  %6047 = vmatprep.mubr.msk.f32.mxu1 %vm1148_vm1, %v5210_v49 }
 0x365   : > { %5919 = vmatmul.mubr.msk.f32.gmra.mxu0 %vm1148_vm1, %v5161_v24  ;;  %5974 = vmatprep.subr.mxu0 %v7274_v3 }
 0x366   : > { %5975 = vmatpush3.msra.mxu0 %v7274_v3  ;;  %5921 = vmatprep.mubr.msk.f32.mxu0 %vm1148_vm1, %v5162_v22  ;;  %v5191_v3 = vld [vmem:[%s7955_s3 + $0x1d8] sm:$0xff] }
 0x367   : > { %5976 = vmatprep.subr.mxu0 %v7258_v12  ;;  %6048 = vmatmul.mubr.msk.f32.gmra.mxu1 %vm1148_vm1, %v5211_v48 }
 0x368   : > { %5977 = vmatpush3.msra.mxu0 %v7258_v12  ;;  %2724 = vperm.xlu0 %6168, %v2690_v20   ;;  %v2687_v12 = vld [vmem:[%s7956_s4 + $0x18] sm:$0xff] }
 0x369   : > { %5922 = vmatmul.mubr.msk.f32.gmra.mxu0 %vm1148_vm1, %v5163_v37  ;;  %5978 = vmatprep.subr.mxu0 %v7249_v16 }
 0x36a   : > { %5979 = vmatpush3.msra.mxu0 %v7249_v16  ;;  %5996 = vmatprep.mubr.msk.f32.mxu0 %vm1148_vm1, %v5188_v14  ;;  %v2689_v16 = vld [vmem:[%s7956_s4 + $0x28] sm:$0xff] }
 0x36b   : > { %5980 = vmatprep.subr.mxu0 %v7241_v18  ;;  %2709 = vperm.xlu1 %6169, %v2687_v12  }
 0x36c   : > { %5981 = vmatpush3.msra.mxu0 %v7241_v18  ;;  %2694 = vperm.xlu0 %6168, %v2684_v5   ;;  %v5189_v18 = vld [vmem:[%s7955_s3 + $0x1c8] sm:$0xff] }
 0x36d   : > { %5982 = vmatprep.subr.mxu0 %v7230_v41 }
 0x36e   : > { %5983 = vmatpush3.msra.mxu0 %v7230_v41  ;;  %v2691_v41 = vld [vmem:[%s7956_s4 + $0x38] sm:$0xf] }
 0x36f   : > { %5984 = vmatprep.subr.mxu0 %v7335_v45  ;;  %2719 = vperm.xlu1 %6169, %v2689_v16  }
 0x370   : > { %5985 = vmatpush3.msra.mxu0 %v7335_v45 }
 0x371   : > { %5986 = vmatprep.subr.mxu0 %v7345_v39 }
 0x372   : > { %5987 = vmatpush3.msra.mxu0 %v7345_v39 }
 0x373   : > { %5988 = vmatprep.subr.mxu0 %v7363_v43  ;;  %2729 = vperm.xlu1 %6169, %v2691_v41  }
 0x374   : > { %5989 = vmatpush3.msra.mxu0 %v7363_v43 }
 0x375   : > { %5990 = vmatprep.subr.mxu0 %v7383_v61 }
 0x376   : > { %5991 = vmatpush3.msra.mxu0 %v7383_v61 }
 0x377   : > { %5992 = vmatprep.subr.mxu0 %v7401_v31 }
 0x378   : > { %5993 = vmatpush3.msra.mxu0 %v7401_v31 }
 0x379   : > { %5994 = vmatprep.subr.mxu0 %v7410_v25 }
 0x37a   : > { %5995 = vmatpush3.msra.mxu0 %v7410_v25 }
 0x37b   : > { %5997 = vmatmul.mubr.msk.f32.vlgmr.msra.gmra.mxu0 %vm1148_vm1, %v5189_v18 }
 0x37c   : > { %5999 = vmatprep.mubr.msk.f32.mxu0 %vm1148_vm1, %v5190_v9 }
 0x37f   : > { %6000 = vmatmul.mubr.msk.f32.gmra.mxu0 %vm1148_vm1, %v5191_v3 }
 0x380   : > { %6002 = vmatprep.mubr.msk.f32.mxu0 %vm1148_vm1, %v5192_v1 }
 0x383   : > { %6003 = vmatmul.mubr.msk.f32.gmra.mxu0 %vm1148_vm1, %v5193_v63 }
 0x384   : > { %6005 = vmatprep.mubr.msk.f32.mxu0 %vm1148_vm1, %v5194_v34  ;;  %v5704_v32 = vpop.f32.mrf.mxu0 }
 0x386   : > { %v1239_v46 = vpop.f32.mrf.mxu0 }
 0x387   : > { %6006 = vmatmul.mubr.msk.f32.gmra.mxu0 %vm1148_vm1, %v5195_v38  ;;  %vm2772_vm1 = vcmask 1041408  }
 0x38e   : > { %v5707_v52 = vpop.f32.mrf.mxu0 }
 0x390   : > { %v1249_v56 = vpop.f32.mrf.mxu0 }
 0x392   : > { %v5710_v60 = vpop.f32.mrf.mxu0 }
 0x394   : > { %v1259_v42 = vpop.f32.mrf.mxu0 }
 0x396   : > { %v5713_v4 = vpop.f32.mrf.mxu0 }
 0x398   : > { %v1269_v8 = vpop.f32.mrf.mxu0 }
 0x39a   : > { %v5956_v48 = vpop.f32.mrf.mxu1 }
 0x39c   : > { %v2240_v37 = vpop.f32.mrf.mxu1 }
 0x3a2   : > { %v5746_v30 = vpop.f32.mrf.mxu0 }
 0x3a3   : > { %v1374_v0 = vadd.f32 %v5746_v30, %v5704_v32 }
 0x3a4   : > { %v1368_v6 = vpop.f32.mrf.mxu0  ;;  %v5959_v7 = vpop.f32.mrf.mxu1 }
 0x3a5   : > { %v1369_v45 = vadd.f32 %v1368_v6, %v1239_v46 }
 0x3a6   : > { %v5749_v50 = vpop.f32.mrf.mxu0  ;;  %v7570_v12 = vpop.f32.mrf.mxu1 }
 0x3a7   : > { %v1384_v33 = vadd.f32 %v5749_v50, %v5707_v52  ;;  %v2700_v34 = vpop.permute.xlu0 %2699 }
 0x3a8   : > { %v1378_v39 = vpop.f32.mrf.mxu0  ;;  %v7572_v41 = vpop.f32.mrf.mxu1 }
 0x3a9   : > { %v1379_v10 = vadd.f32 %v1378_v39, %v1249_v56 }
 0x3aa   : > { %v5752_v54 = vpop.f32.mrf.mxu0  ;;  %v7574_v9 = vpop.f32.mrf.mxu1 }
 0x3ab   : > { %v1394_v58 = vadd.f32 %v5752_v54, %v5710_v60 }
 0x3ac   : > { %v1388_v47 = vpop.f32.mrf.mxu0  ;;  %v7576_v1 = vpop.f32.mrf.mxu1 }
 0x3ad   : > { %v1389_v43 = vadd.f32 %v1388_v47, %v1259_v42  ;;  %v7580_v60 = vpop.permute.xlu0 %2714 }
 0x3ae   : > { %v5755_v2 = vpop.f32.mrf.mxu0  ;;  %v7578_v32 = vpop.f32.mrf.mxu1 }
 0x3af   : > { %v1404_v13 = vadd.f32 %v5755_v2, %v5713_v4 }
 0x3b0   : > { %v1398_v19 = vpop.f32.mrf.mxu0 }
 0x3b1   : > { %v7564_v62 = vadd.f32 %v1398_v19, %v1269_v8 }
 0x3c0   : > { %v5788_v61 = vpop.f32.mrf.mxu0 }
 0x3c1   : > { %v1591_v38 = vadd.f32 %v5788_v61, %v1374_v0 }
 0x3c2   : > { %v1551_v17 = vpop.f32.mrf.mxu0 }
 0x3c3   : > { %v1590_v35 = vadd.f32 %v1551_v17, %v1369_v45 }
 0x3c4   : > { %v5791_v15 = vpop.f32.mrf.mxu0 }
 0x3c5   : > { %v1593_v42 = vadd.f32 %v5791_v15, %v1384_v33 }
 0x3c6   : > { %v1561_v31 = vpop.f32.mrf.mxu0 }
 0x3c7   : > { %v1592_v6 = vadd.f32 %v1561_v31, %v1379_v10 }
 0x3c8   : > { %v5794_v29 = vpop.f32.mrf.mxu0 }
 0x3c9   : > { %v1595_v47 = vadd.f32 %v5794_v29, %v1394_v58 }
 0x3ca   : > { %v1571_v21 = vpop.f32.mrf.mxu0 }
 0x3cb   : > { %v1594_v2 = vadd.f32 %v1571_v21, %v1389_v43  ;;  %v7585_v21 = vpop.permute.xlu1 %2704 }
 0x3cc   : > { %v5797_v25 = vpop.f32.mrf.mxu0 }
 0x3cd   : > { %v1597_v17 = vadd.f32 %v5797_v25, %v1404_v13 }
 0x3ce   : > { %v1581_v23 = vpop.f32.mrf.mxu0 }
 0x3de   : > { %v5830_v11 = vpop.f32.mrf.mxu0 }
 0x3df   : > { %v1737_v52 = vadd.f32 %v5830_v11, %v1591_v38 }
 0x3e0   : > { %v1697_v55 = vpop.f32.mrf.mxu0 }
 0x3e1   : > { %v1736_v4 = vadd.f32 %v1697_v55, %v1590_v35  ;;  %v1596_v55 = vadd.f32 %v1581_v23, %v7564_v62 }
 0x3e2   : > { %v5833_v27 = vpop.f32.mrf.mxu0 }
 0x3e3   : > { %v1739_v45 = vadd.f32 %v5833_v27, %v1593_v42  ;;  %v7582_v38 = vpop.permute.xlu0 %2724 }
 0x3e4   : > { %v1707_v40 = vpop.f32.mrf.mxu0 }
 0x3e5   : > { %v1738_v19 = vadd.f32 %v1707_v40, %v1592_v6 }
 0x3e6   : > { %v5836_v57 = vpop.f32.mrf.mxu0 }
 0x3e7   : > { %v1741_v36 = vadd.f32 %v5836_v57, %v1595_v47 }
 0x3e8   : > { %v1717_v59 = vpop.f32.mrf.mxu0 }
 0x3e9   : > { %v1740_v33 = vadd.f32 %v1717_v59, %v1594_v2 }
 0x3ea   : > { %v5839_v51 = vpop.f32.mrf.mxu0 }
 0x3eb   : > { %v1743_v58 = vadd.f32 %v5839_v51, %v1597_v17 }
 0x3ec   : > { %v7566_v28 = vpop.f32.mrf.mxu0 }
 0x3ed   : > { %v1742_v57 = vadd.f32 %v7566_v28, %v1596_v55 }
 0x3fc   : > { %v5872_v53 = vpop.f32.mrf.mxu0 }
 0x3fd   : > { %v1943_v8 = vadd.f32 %v5872_v53, %v1737_v52 }
 0x3fe   : > { %v1903_v26 = vpop.f32.mrf.mxu0 }
 0x3ff   : > { %v1942_v50 = vadd.f32 %v1903_v26, %v1736_v4 }
 0x401   : > { %v5875_v44 = vpop.f32.mrf.mxu0 }
 0x402   : > { %v1945_v0 = vadd.f32 %v5875_v44, %v1739_v45 }
 0x403   : > { %v1913_v49 = vpop.f32.mrf.mxu0 }
 0x404   : > { %v1944_v35 = vadd.f32 %v1913_v49, %v1738_v19 }
 0x406   : > { %v5878_v24 = vpop.f32.mrf.mxu0 }
 0x407   : > { %v1947_v43 = vadd.f32 %v5878_v24, %v1741_v36 }
 0x408   : > { %v1923_v22 = vpop.f32.mrf.mxu0 }
 0x409   : > { %v1946_v13 = vadd.f32 %v1923_v22, %v1740_v33 }
 0x40b   : > { %v5881_v20 = vpop.f32.mrf.mxu0 }
 0x40c   : > { %v1949_v59 = vadd.f32 %v5881_v20, %v1743_v58 }
 0x40d   : > { %v7568_v14 = vpop.f32.mrf.mxu0 }
 0x40e   : > { %v1948_v49 = vadd.f32 %v7568_v14, %v1742_v57 }
 0x41b   : > { %v6040_v56 = vpop.f32.mrf.mxu1 }
 0x41d   : > { %v5914_v5 = vpop.f32.mrf.mxu0  ;;  %v2637_v54 = vpop.f32.mrf.mxu1 }
 0x41e   : > { %v2134_v39 = vadd.f32 %v5914_v5, %v1943_v8 }
 0x41f   : > { %v2094_v16 = vpop.f32.mrf.mxu0  ;;  %v6043_v31 = vpop.f32.mrf.mxu1 }
 0x420   : > { %v2133_v61 = vadd.f32 %v2094_v16, %v1942_v50  ;;  %v2280_v10 = vadd.f32 %v5956_v48, %v2134_v39  ;;  %v2695_v48 = vpop.permute.xlu0 %2694 }
 0x421   : > { %v5917_v18 = vpop.f32.mrf.mxu0  ;;  %v2647_v51 = vpop.f32.mrf.mxu1 }
 0x422   : > { %v2136_v15 = vadd.f32 %v5917_v18, %v1945_v0  ;;  %v2279_v25 = vadd.f32 %v2240_v37, %v2133_v61 }
 0x423   : > { %v2104_v3 = vpop.f32.mrf.mxu0  ;;  %v6046_v52 = vpop.f32.mrf.mxu1 }
 0x424   : > { %v2135_v27 = vadd.f32 %v2104_v3, %v1944_v35  ;;  %v2282_v44 = vadd.f32 %v5959_v7, %v2136_v15  ;;  %v2710_v7 = vpop.permute.xlu1 %2709 }
 0x425   : > { %v5920_v63 = vpop.f32.mrf.mxu0  ;;  %v2657_v19 = vpop.f32.mrf.mxu1 }
 0x426   : > { %v2138_v53 = vadd.f32 %v5920_v63, %v1947_v43  ;;  %v2281_v37 = vadd.f32 %v7570_v12, %v2135_v27 }
 0x427   : > { %v2114_v46 = vpop.f32.mrf.mxu0 }
 0x428   : > { %v2137_v62 = vadd.f32 %v2114_v46, %v1946_v13  ;;  %v2284_v16 = vadd.f32 %v7572_v41, %v2138_v53  ;;  %v2720_v35 = vpop.permute.xlu1 %2719 }
 0x429   : > { %v5923_v30 = vpop.f32.mrf.mxu0 }
 0x42a   : > { %v2140_v24 = vadd.f32 %v5923_v30, %v1949_v59  ;;  %v2283_v3 = vadd.f32 %v7574_v9, %v2137_v62 }
 0x42b   : > { %v2124_v11 = vpop.f32.mrf.mxu0 }
 0x42c   : > { %v2139_v14 = vadd.f32 %v2124_v11, %v1948_v49 }
 0x43b   : > { %v5998_v29 = vpop.f32.mrf.mxu0 }
 0x43c   : > { %v2486_v40 = vadd.f32 %v5998_v29, %v2280_v10 }
 0x43d   : > { %v2446_v26 = vpop.f32.mrf.mxu0 }
 0x43e   : > { %v2485_v23 = vadd.f32 %v2446_v26, %v2279_v25  ;;  %v2677_v36 = vadd.f32 %v6040_v56, %v2486_v40  ;;  %v2286_v56 = vadd.f32 %v7576_v1, %v2140_v24 }
 0x43f   : > { %v6001_v22 = vpop.f32.mrf.mxu0 }
 0x440   : > { %v2733_v5 = vadd.f32 %v2700_v34, %v2677_v36  ;;  %v2488_v28 = vadd.f32 %v6001_v22, %v2282_v44  ;;  %v2676_v20 = vadd.f32 %v2637_v54, %v2485_v23  ;;  %v2285_v54 = vadd.f32 %v7578_v32, %v2139_v14 }
 0x441   : > { %v2456_v18 = vpop.f32.mrf.mxu0 }
 0x442   : > { %v2487_v63 = vadd.f32 %v2456_v18, %v2281_v37  ;;  %v2732_v46 = vadd.f32 %v2695_v48, %v2676_v20  ;;  %v2762_v12 = vsel %vm2761_vm5, %v2733_v5, -inf  ;;  %v2679_v34 = vadd.f32 %v6043_v31, %v2488_v28  ;;  %v6049_v37 = vpop.f32.mrf.mxu1 }
 0x443   : > { %v6004_v42 = vpop.f32.mrf.mxu0  ;;  %v2751_v41 = vsel %vm2750_vm10, %v2733_v5, -inf  ;;  %v2804_v61 = vsel %vm2803_vm6, %v2733_v5, -inf  ;;  %vm2788_vm6 = vcmask 15360  }
 0x444   : > { %v2741_v4 = vsel %vm2740_vm2, %v2732_v46, -inf  ;;  %v2749_v8 = vsel %vm2748_vm3, %v2732_v46, -inf  ;;  %v2760_v9 = vsel %vm2759_vm4, %v2732_v46, -inf  ;;  %v2490_v30 = vadd.f32 %v6004_v42, %v2284_v16  ;;  %v2730_v42 = vpop.permute.xlu1 %2729 }
 0x445   : > { %v2742_v6 = vrot.slane %v2741_v4, 4  ;;  %v2763_v45 = vmax.f32 %v2760_v9, %v2762_v12  ;;  %v2735_v50 = vadd.f32 %v2710_v7, %v2679_v34  ;;  %v2678_v39 = vadd.f32 %v2647_v51, %v2487_v63  ;;  %v2466_v1 = vpop.f32.mrf.mxu0 }
 0x446   : > { %v2489_v47 = vadd.f32 %v2466_v1, %v2283_v3  ;;  %v2681_v2 = vadd.f32 %v6046_v52, %v2490_v30  ;;  %v2752_v0 = vmax.f32 %v2749_v8, %v2751_v41 }
 0x447   : > { %v2743_v17 = vmax.f32 %v2741_v4, %v2742_v6  ;;  %v2764_v11 = vrot.slane %v2763_v45, 4  ;;  %v2817_v33 = vsel %vm2816_vm7, %v2735_v50, -inf  ;;  %v6007_v10 = vpop.f32.mrf.mxu0  ;;  %v2828_v15 = vsel %vm2827_vm8, %v2735_v50, -inf  ;;  %v2667_v6 = vpop.f32.mrf.mxu1 }
 0x448   : > { %v2860_v31 = vsel %vm2759_vm4, %v2735_v50, -inf  ;;  %v2734_v55 = vadd.f32 %v7585_v21, %v2678_v39  ;;  %v2737_v58 = vadd.f32 %v2720_v35, %v2681_v2  ;;  %v2492_v29 = vadd.f32 %v6007_v10, %v2286_v56 }
 0x449   : > { %v2744_v32 = vrot.slane %v2743_v17, 2  ;;  %v2765_v43 = vmax.f32 %v2763_v45, %v2764_v11  ;;  %v2680_v13 = vadd.f32 %v2657_v19, %v2489_v47  ;;  %v2476_v57 = vpop.f32.mrf.mxu0  ;;  %v2753_v59 = vrot.slane %v2752_v0, 4 }
 0x44a   : > { %v2806_v25 = vsel %vm2805_vm9, %v2734_v55, -inf  ;;  %v2815_v27 = vsel %vm2814_vm11, %v2734_v55, -inf  ;;  %v2826_v40 = vsel %vm2825_vm12, %v2734_v55, -inf  ;;  %v2880_v21 = vsel %vm2879_vm13, %v2737_v58, -inf }
 0x44b   : > { %v7607_v53 = vmax.f32 %v2743_v17, %v2744_v32  ;;  %v2766_v26 = vrot.slane %v2765_v43, 2  ;;  %v2807_v44 = vmax.f32 %v2804_v61, %v2806_v25  ;;  %v2818_v62 = vmax.f32 %v2815_v27, %v2817_v33 }
 0x44c   : > { %v2829_v23 = vmax.f32 %v2826_v40, %v2828_v15  ;;  %v2912_v36 = vsel %vm2825_vm12, %v2737_v58, -inf  ;;  %v2736_v51 = vadd.f32 %v7580_v60, %v2680_v13  ;;  %v2491_v48 = vadd.f32 %v2476_v57, %v2285_v54 }
 0x44d   : > { %v2746_v49 = vrot.slane %v7607_v53, 1  ;;  %v2808_v24 = vrot.slane %v2807_v44, 4  ;;  %v2819_v22 = vrot.slane %v2818_v62, 4  ;;  %v7616_v18 = vmax.f32 %v2765_v43, %v2766_v26 }
 0x44e   : > { %v2830_v5 = vrot.slane %v2829_v23, 4  ;;  %v2861_v28 = vsel %vm2761_vm5, %v2736_v51, -inf  ;;  %v2870_v20 = vsel %vm2869_vm14, %v2736_v51, -inf  ;;  %v2878_v16 = vsel %vm2877_vm15, %v2736_v51, -inf }
 0x44f   : > { %v2809_v7 = vmax.f32 %v2807_v44, %v2808_v24  ;;  %v2820_v3 = vmax.f32 %v2818_v62, %v2819_v22  ;;  %v2862_v14 = vmax.f32 %v2860_v31, %v2861_v28  ;;  %v2871_v60 = vrot.slane %v2870_v20, 4 }
 0x450   : > { %v2831_v63 = vmax.f32 %v2829_v23, %v2830_v5  ;;  %v2881_v46 = vmax.f32 %v2878_v16, %v2880_v21  ;;  %v2683_v52 = vadd.f32 %v6049_v37, %v2492_v29  ;;  %v2754_v41 = vmax.f32 %v2752_v0, %v2753_v59 }
 0x451   : > { %v2810_v56 = vrot.slane %v2809_v7, 2  ;;  %v2821_v12 = vrot.slane %v2820_v3, 2  ;;  %v2863_v34 = vrot.slane %v2862_v14, 4  ;;  %v2872_v8 = vmax.f32 %v2870_v20, %v2871_v60 }
 0x452   : > { %v2832_v4 = vrot.slane %v2831_v63, 2  ;;  %v2882_v9 = vrot.slane %v2881_v46, 4  ;;  %v2739_v30 = vadd.f32 %v2730_v42, %v2683_v52  ;;  %v2755_v1 = vrot.slane %v2754_v41, 2 }
 0x453   : > { %v2811_v45 = vmax.f32 %v2809_v7, %v2810_v56  ;;  %v2822_v50 = vmax.f32 %v2820_v3, %v2821_v12  ;;  %v2864_v39 = vmax.f32 %v2862_v14, %v2863_v34  ;;  %vm2778_vm4 = vcmask 75800  }
 0x454   : > { %v2833_v54 = vmax.f32 %v2831_v63, %v2832_v4  ;;  %v2873_v47 = vrot.slane %v2872_v8, 2  ;;  %v2883_v2 = vmax.f32 %v2881_v46, %v2882_v9  ;;  %v2929_v19 = vsel %vm2750_vm10, %v2739_v30, -inf }
 0x455   : > { %vm2774_vm5 = vcmask 51200   ;;  %v2865_v61 = vrot.slane %v2864_v39, 2  ;;  %v2756_v0 = vmax.f32 %v2754_v41, %v2755_v1  ;;  %v2682_v17 = vadd.f32 %v2667_v6, %v2491_v48 }
 0x456   : > { %v2812_v11 = vrot.slane %v2811_v45, 1  ;;  %v2874_v33 = vmax.f32 %v2872_v8, %v2873_v47  ;;  %v2884_v35 = vrot.slane %v2883_v2, 2  ;;  %v2823_v10 = vrot.slane %v2822_v50, 1 }
 0x457   : > { %v2834_v15 = vrot.slane %v2833_v54, 1  ;;  %v2866_v31 = vmax.f32 %v2864_v39, %v2865_v61  ;;  %v2757_v55 = vrot.slane %v2756_v0, 1  ;;  %v2738_v58 = vadd.f32 %v7582_v38, %v2682_v17 }
 0x458   : > { %v2813_v32 = vmax.f32 %v2811_v45, %v2812_v11  ;;  %v2875_v43 = vrot.slane %v2874_v33, 1  ;;  %v2824_v29 = vmax.f32 %v2822_v50, %v2823_v10  ;;  %v2885_v25 = vmax.f32 %v2883_v2, %v2884_v35 }
 0x459   : > { %v2835_v13 = vmax.f32 %v2833_v54, %v2834_v15  ;;  %v2913_v27 = vsel %vm2827_vm8, %v2738_v58, -inf  ;;  %v2921_v40 = vsel %vm2740_vm2, %v2738_v58, -inf  ;;  %v2928_v57 = vsel %vm2748_vm3, %v2738_v58, -inf }
 0x45a   : > { %v2867_v59 = vrot.slane %v2866_v31, 1  ;;  %v2914_v26 = vmax.f32 %v2912_v36, %v2913_v27  ;;  %v2922_v44 = vrot.slane %v2921_v40, 4  ;;  %v2930_v62 = vmax.f32 %v2928_v57, %v2929_v19 }
 0x45b   : > { %v2836_v23 = vsel %vm2770_vm0, %v2813_v32, %v2824_v29  ;;  %v2876_v51 = vmax.f32 %v2874_v33, %v2875_v43  ;;  %v2886_v24 = vrot.slane %v2885_v25, 1  ;;  %vm2782_vm2 = vcmask 100400  }
 0x45c   : > { %v2837_v21 = vsel %vm2772_vm1, %v2836_v23, %v2835_v13  ;;  %v2868_v38 = vmax.f32 %v2866_v31, %v2867_v59  ;;  %v2915_v22 = vrot.slane %v2914_v26, 4  ;;  %v2923_v48 = vmax.f32 %v2921_v40, %v2922_v44 }
 0x45d   : > { %v2931_v37 = vrot.slane %v2930_v62, 4  ;;  %v2841_v5 = vsel %vm2778_vm4, %v2837_v21, -inf  ;;  %v2838_v28 = vsel %vm2774_vm5, %v2837_v21, -inf  ;;  %v2887_v20 = vmax.f32 %v2885_v25, %v2886_v24 }
 0x45e   : > { %2842 = vmax.xlane.f32.xlu0 %v2841_v5  ;;  %v2888_v36 = vsel %vm2770_vm0, %v2868_v38, %v2876_v51  ;;  %v2916_v16 = vmax.f32 %v2914_v26, %v2915_v22  ;;  %v2924_v7 = vrot.slane %v2923_v48, 2  ;;  %2839 = vmax.xlane.f32.xlu1 %v2838_v28  ;;  %v2758_v14 = vmax.f32 %v2756_v0, %v2757_v55 }
 0x45f   : > { %v2932_v3 = vmax.f32 %v2930_v62, %v2931_v37  ;;  %v2747_v63 = vmax.f32 %v7607_v53, %v2746_v49  ;;  %v2844_v60 = vsel %vm2782_vm2, %v2837_v21, -inf  ;;  %v2889_v46 = vsel %vm2772_vm1, %v2888_v36, %v2887_v20 }
 0x460   : > { %v2768_v52 = vrot.slane %v7616_v18, 1  ;;  %v2917_v56 = vrot.slane %v2916_v16, 2  ;;  %v2925_v12 = vmax.f32 %v2923_v48, %v2924_v7  ;;  %v2893_v42 = vsel %vm2778_vm4, %v2889_v46, -inf }
 0x461   : > { %v2933_v34 = vrot.slane %v2932_v3, 2  ;;  %v2771_v4 = vsel %vm2770_vm0, %v2747_v63, %v2758_v14  ;;  %v2890_v30 = vsel %vm2774_vm5, %v2889_v46, -inf  ;;  %v2896_v50 = vsel %vm2782_vm2, %v2889_v46, -inf  ;;  %v5220_v46 = vld [vmem:[%s7957_s5 + $0x10] sm:$0xff] }
 0x462   : > { %2845 = vmax.xlane.f32.xlu0 %v2844_v60  ;;  %v2769_v41 = vmax.f32 %v7616_v18, %v2768_v52  ;;  %v2918_v8 = vmax.f32 %v2916_v16, %v2917_v56  ;;  %v2926_v9 = vrot.slane %v2925_v12, 1  ;;  %2894 = vmax.xlane.f32.xlu1 %v2893_v42  ;;  %vm2786_vm3 = vcmask 7168   ;;  %v5238_v52 = vld [vmem:[%s7957_s5 + $0x40] sm:$0xff] }
 0x463   : > { %v2934_v53 = vmax.f32 %v2932_v3, %v2933_v34  ;;  %vm2794_vm7 = vcmask 1043456   ;;  %vm2801_vm8 = vcmask 31744   ;;  %vm2990_vm9 = vcmask 162816  }
 0x464   : > { %v2773_v49 = vsel %vm2772_vm1, %v2771_v4, %v2769_v41  ;;  %v2919_v6 = vrot.slane %v2918_v8, 1  ;;  %v2927_v1 = vmax.f32 %v2925_v12, %v2926_v9  ;;  %6056 = vmatprep.mubr.msk.f32.mxu0 %vm2990_vm9, %v5220_v46  ;;  %6092 = vmatprep.mubr.msk.f32.mxu1 %vm2990_vm9, %v5238_v52  ;;  %vm2973_vm10 = vcmask 1046528  }
 0x465   : > { %v2935_v45 = vrot.slane %v2934_v53, 1  ;;  %v2775_v61 = vsel %vm2774_vm5, %v2773_v49, -inf  ;;  %v2783_v17 = vsel %vm2782_vm2, %v2773_v49, -inf  ;;  %v2779_v11 = vsel %vm2778_vm4, %v2773_v49, -inf }
 0x466   : > { %2891 = vmax.xlane.f32.xlu0 %v2890_v30  ;;  %2897 = vmax.xlane.f32.xlu1 %v2896_v50  ;;  %v2920_v39 = vmax.f32 %v2918_v8, %v2919_v6  ;;  %vm2970_vm11 = vcmask 1044480   ;;  %v3770_v50 = vld [vmem:[%s7958_s6 + $0x8] sm:$0xf]  ;;  %vm6197_vm12 = vmmov 0   ;;  %vm3784_vm13 = vcmask 97280  }
 0x467   : > { %v2936_v54 = vmax.f32 %v2934_v53, %v2935_v45  ;;  %vm3957_vm14 = vcmask 1042432   ;;  %vm3953_vm15 = vcmask 23552  }
 0x468   : > { %v2937_v18 = vsel %vm2770_vm0, %v2920_v39, %v2927_v1  ;;  %v3769_v39 = vld [vmem:[%s7958_s6] sm:$0xff] }
 0x469   : > { %v2938_v47 = vsel %vm2772_vm1, %v2937_v18, %v2936_v54 }
 0x46a   : > { %v2942_v2 = vsel %vm2778_vm4, %v2938_v47, -inf  ;;  %v2939_v19 = vsel %vm2774_vm5, %v2938_v47, -inf  ;;  %v2945_v0 = vsel %vm2782_vm2, %v2938_v47, -inf  ;;  %v5221_v47 = vld [vmem:[%s7957_s5 + $0x18] sm:$0xf] }
 0x46b   : > { %2943 = vmax.xlane.f32.xlu1 %v2942_v2  ;;  %2940 = vmax.xlane.f32.xlu0 %v2939_v19  ;;  %v5239_v2 = vld [vmem:[%s7957_s5 + $0x48] sm:$0xf]  ;;  %v2975_v19 = vld [vmem:[%s7957_s5] sm:$0xff] }
 0x46f   : > { %2776 = vmax.xlane.f32.xlu1 %v2775_v61  ;;  %2946 = vmax.xlane.f32.xlu0 %v2945_v0  ;;  %v5248_v61 = vld [vmem:[%s7957_s5 + $0x60] sm:$0xff] }
 0x473   : > { %2784 = vmax.xlane.f32.xlu1 %v2783_v17  ;;  %2780 = vmax.xlane.f32.xlu0 %v2779_v11  ;;  %v2976_v17 = vld [vmem:[%s7957_s5 + $0x8] sm:$0xf] }
 0x474   : > { %v5249_v11 = vld [vmem:[%s7957_s5 + $0x68] sm:$0xf] }
 0x4e7   : > { %v2843_v33 = vpop.xlane.xlu0 %2842  ;;  %v2840_v35 = vpop.xlane.xlu1 %2839 }
 0x4e8   : > { %v2847_v10 = vsel %vm2786_vm3, %v2840_v35, %v2843_v33 }
 0x4eb   : > { %v2846_v15 = vpop.xlane.xlu0 %2845  ;;  %v2895_v55 = vpop.xlane.xlu1 %2894 }
 0x4ec   : > { %v2848_v31 = vsel %vm2788_vm6, %v2847_v10, %v2846_v15  ;;  %v5228_v10 = vld [vmem:[%s7957_s5 + $0x20] sm:$0xff]  ;;  %v5229_v15 = vld [vmem:[%s7957_s5 + $0x28] sm:$0xf] }
 0x4ed   : > { %v2850_v58 = vrot.slane %v2848_v31, 7  ;;  %v5258_v31 = vld [vmem:[%s7957_s5 + $0x80] sm:$0xff] }
 0x4ef   : > { %v2852_v32 = vsel %vm2770_vm0, 0.0, %v2850_v58  ;;  %v2892_v43 = vpop.xlane.xlu0 %2891  ;;  %v2898_v29 = vpop.xlane.xlu1 %2897  ;;  %v5259_v58 = vld [vmem:[%s7957_s5 + $0x88] sm:$0xf] }
 0x4f0   : > { %v2899_v13 = vsel %vm2786_vm3, %v2892_v43, %v2895_v55  ;;  %v2853_v25 = vsel %vm2794_vm7, %v2852_v32, 0.0  ;;  %v5233_v55 = vld [vmem:[%s7957_s5 + $0x30] sm:$0xff]  ;;  %v5234_v32 = vld [vmem:[%s7957_s5 + $0x38] sm:$0xf]  ;;  %v7964_v43 = vmov 0.0  }
 0x4f1   : > { %v2900_v27 = vsel %vm2788_vm6, %v2899_v13, %v2898_v29  ;;  %2855 = vrot.lane.b32.xlu0 %v2853_v25, %s6194_s24  ;;  %v5243_v29 = vld [vmem:[%s7957_s5 + $0x50] sm:$0xff]  ;;  %v5244_v13 = vld [vmem:[%s7957_s5 + $0x58] sm:$0xf] }
 0x4f2   : > { %v2902_v40 = vrot.slane %v2900_v27, 7  ;;  %v5253_v25 = vld [vmem:[%s7957_s5 + $0x70] sm:$0xff]  ;;  %v5254_v27 = vld [vmem:[%s7957_s5 + $0x78] sm:$0xf] }
 0x4f4   : > { %v2904_v57 = vsel %vm2770_vm0, 0.0, %v2902_v40  ;;  %v2944_v59 = vpop.xlane.xlu1 %2943  ;;  %v2941_v26 = vpop.xlane.xlu0 %2940 }
 0x4f5   : > { %v2905_v44 = vsel %vm2794_vm7, %v2904_v57, 0.0  ;;  %v2948_v62 = vsel %vm2786_vm3, %v2941_v26, %v2944_v59 }
 0x4f6   : > { %2907 = vrot.lane.b32.xlu1 %v2905_v44, %s6194_s24 }
 0x4f8   : > { %v2777_v23 = vpop.xlane.xlu1 %2776  ;;  %v2947_v21 = vpop.xlane.xlu0 %2946 }
 0x4f9   : > { %v2949_v38 = vsel %vm2788_vm6, %v2948_v62, %v2947_v21 }
 0x4fa   : > { %v2951_v51 = vrot.slane %v2949_v38, 7 }
 0x4fc   : > { %v2953_v24 = vsel %vm2770_vm0, 0.0, %v2951_v51  ;;  %v2785_v22 = vpop.xlane.xlu1 %2784  ;;  %v2781_v48 = vpop.xlane.xlu0 %2780 }
 0x4fd   : > { %v2787_v37 = vsel %vm2786_vm3, %v2777_v23, %v2781_v48  ;;  %v2954_v5 = vsel %vm2794_vm7, %v2953_v24, 0.0 }
 0x4fe   : > { %v2789_v28 = vsel %vm2788_vm6, %v2787_v37, %v2785_v22  ;;  %2956 = vrot.lane.b32.xlu1 %v2954_v5, %s6194_s24 }
 0x4ff   : > { %v2791_v20 = vrot.slane %v2789_v28, 7 }
 0x501   : > { %v2793_v36 = vsel %vm2770_vm0, 0.0, %v2791_v20 }
 0x502   : > { %v2795_v16 = vsel %vm2794_vm7, %v2793_v36, 0.0 }
 0x503   : > { %2797 = vrot.lane.b32.xlu0 %v2795_v16, %s6194_s24  ;;  %s332_s24 = scalar_lea.vmem %s7961_s9, %s5318_s21 }
 0x563   : > { %v2856_v3 = vpop.permute.xlu0 %2855 }
 0x564   : > { %v2858_v63 = vsel %vm2786_vm3, 0.0, %v2856_v3 }
 0x565   : > { %v2859_v56 = vsel %vm2801_vm8, %v2858_v63, 0.0 }
 0x566   : > { %v2962_v41 = vrot.slane %v2859_v56, 3 }
 0x568   : > { %v2908_v7 = vpop.permute.xlu1 %2907 }
 0x569   : > { %v2910_v14 = vsel %vm2786_vm3, 0.0, %v2908_v7 }
 0x56a   : > { %v2911_v60 = vsel %vm2801_vm8, %v2910_v14, 0.0 }
 0x56b   : > { %v2965_v12 = vrot.slane %v2911_v60, 6 }
 0x56d   : > { %v2972_v9 = vsel %vm2772_vm1, %v2962_v41, %v2965_v12 }
 0x570   : > { %v2957_v34 = vpop.permute.xlu1 %2956 }
 0x571   : > { %v2959_v42 = vsel %vm2786_vm3, 0.0, %v2957_v34 }
 0x572   : > { %v2960_v4 = vsel %vm2801_vm8, %v2959_v42, 0.0 }
 0x573   : > { %v7678_v8 = vrot.slane %v2960_v4, 1 }
 0x575   : > { %2986 = vrot.lane.b32.xlu1 %v7678_v8, %s6195_s14  ;;  %v2798_v53 = vpop.permute.xlu0 %2797  ;;  %v7683_v49 = vsel %vm2973_vm10, %v2972_v9, %v7678_v8 }
 0x576   : > { %v2800_v30 = vsel %vm2786_vm3, 0.0, %v2798_v53  ;;  %2984 = vrot.lane.b32.xlu0 %v7683_v49, %s6195_s14 }
 0x577   : > { %v2802_v6 = vsel %vm2801_vm8, %v2800_v30, 0.0 }
 0x578   : > { %v7688_v45 = vsel %vm2970_vm11, %v2802_v6, %v2962_v41 }
 0x579   : > { %2982 = vrot.lane.b32.xlu1 %v7688_v45, %s6195_s14 }
 0x57a   : > { %3164 = vrot.lane.b32.xlu0 %v7678_v8, %s6196_s29 }
 0x57d   : > { %3162 = vrot.lane.b32.xlu1 %v7683_v49, %s6196_s29 }
 0x57e   : > { %3160 = vrot.lane.b32.xlu0 %v7688_v45, %s6196_s29 }
 0x581   : > { %3778 = vperm.xlu1 %6169, %v3770_v50   ;;  %v5265_v50 = vld [vmem:[%s7959_s7 + $0x4] sm:$0xf] }
 0x582   : > { %3773 = vperm.xlu0 %6168, %v3769_v39   ;;  %v5268_v39 = vld [vmem:[%s7960_s8 + $0x20] sm:$0x77] }
 0x5e7   : > { %v7700_v1 = vpop.permute.xlu1 %2986 }
 0x5e8   : > { %6050 = vmatprep.subr.msk.mxu0 %vm2794_vm7, %v7700_v1  ;;  %6086 = vmatprep.subr.msk.mxu1 %vm2794_vm7, %v7700_v1  ;;  %v7706_v54 = vpop.permute.xlu0 %2984 }
 0x5e9   : > { %6051 = vmatpush3.msk.msra.mxu0 %vm2794_vm7, %v7700_v1  ;;  %6087 = vmatpush3.msk.msra.mxu1 %vm2794_vm7, %v7700_v1 }
 0x5ea   : > { %6052 = vmatprep.subr.mxu0 %v7706_v54  ;;  %6088 = vmatprep.subr.mxu1 %v7706_v54 }
 0x5eb   : > { %v7714_v18 = vpop.permute.xlu1 %2982  ;;  %6053 = vmatpush3.msra.mxu0 %v7706_v54  ;;  %6089 = vmatpush3.msra.mxu1 %v7706_v54 }
 0x5ec   : > { %6054 = vmatprep.subr.mxu0 %v7714_v18  ;;  %6090 = vmatprep.subr.mxu1 %v7714_v18  ;;  %v3165_v0 = vpop.permute.xlu0 %3164 }
 0x5ed   : > { %6055 = vmatpush3.msra.mxu0 %v7714_v18  ;;  %6091 = vmatpush3.msra.mxu1 %v7714_v18 }
 0x5ee   : > { %6059 = vmatprep.subr.msk.mxu0 %vm2794_vm7, %v7678_v8  ;;  %6104 = vmatprep.subr.msk.mxu1 %vm2794_vm7, %v7678_v8 }
 0x5ef   : > { %6057 = vmatmul.mubr.msk.f32.vlgmr.msra.gmra.mxu0 %vm2990_vm9, %v5221_v47  ;;  %6093 = vmatmul.mubr.msk.f32.vlgmr.msra.gmra.mxu1 %vm2990_vm9, %v5239_v2  ;;  %v3163_v33 = vpop.permute.xlu1 %3162  ;;  %v5269_v47 = vld [vmem:[%s7960_s8 + $0x28] sm:$0x77] }
 0x5f0   : > { %6060 = vmatpush3.msk.msra.mxu0 %vm2794_vm7, %v7678_v8  ;;  %6105 = vmatpush3.msk.msra.mxu1 %vm2794_vm7, %v7678_v8  ;;  %v3161_v35 = vpop.permute.xlu0 %3160  ;;  %v3950_v2 = vcombine.high %v5269_v47, %v5269_v47 }
 0x5f1   : > { %6061 = vmatprep.subr.mxu0 %v7683_v49  ;;  %6106 = vmatprep.subr.mxu1 %v7683_v49 }
 0x5f2   : > { %6062 = vmatpush3.msra.mxu0 %v7683_v49  ;;  %6107 = vmatpush3.msra.mxu1 %v7683_v49 }
 0x5f3   : > { %6063 = vmatprep.subr.mxu0 %v7688_v45  ;;  %6108 = vmatprep.subr.mxu1 %v7688_v45 }
 0x5f4   : > { %6064 = vmatpush3.msra.mxu0 %v7688_v45  ;;  %6109 = vmatpush3.msra.mxu1 %v7688_v45 }
 0x5f5   : > { %6065 = vmatprep.mubr.msk.f32.mxu0 %vm2990_vm9, %v2975_v19  ;;  %6068 = vmatprep.subr.msk.mxu0 %vm2794_vm7, %v3165_v0  ;;  %v5271_v19 = vld [vmem:[%s7960_s8 + $0x38] sm:$0x77] }
 0x5f6   : > { %6110 = vmatprep.mubr.msk.f32.mxu1 %vm2990_vm9, %v5248_v61  ;;  %6122 = vmatprep.subr.msk.mxu1 %vm2794_vm7, %v3165_v0  ;;  %v3952_v61 = vcombine.high %v5271_v19, %v5271_v19 }
 0x5f7   : > { %6066 = vmatmul.mubr.msk.f32.vlgmr.msra.gmra.mxu0 %vm2990_vm9, %v2976_v17  ;;  %6111 = vmatmul.mubr.msk.f32.vlgmr.msra.gmra.mxu1 %vm2990_vm9, %v5249_v11  ;;  %v3861_v17 = vld [vmem:[%s7960_s8] sm:$0x77]  ;;  %v3862_v11 = vld [vmem:[%s7960_s8 + $0x8] sm:$0x77] }
 0x5f8   : > { %6069 = vmatpush3.msk.msra.mxu0 %vm2794_vm7, %v3165_v0  ;;  %6123 = vmatpush3.msk.msra.mxu1 %vm2794_vm7, %v3165_v0 }
 0x5f9   : > { %6070 = vmatprep.subr.mxu0 %v3163_v33  ;;  %6124 = vmatprep.subr.mxu1 %v3163_v33 }
 0x5fa   : > { %6071 = vmatpush3.msra.mxu0 %v3163_v33  ;;  %6125 = vmatpush3.msra.mxu1 %v3163_v33 }
 0x5fb   : > { %6072 = vmatprep.subr.mxu0 %v3161_v35  ;;  %6126 = vmatprep.subr.mxu1 %v3161_v35 }
 0x5fc   : > { %6073 = vmatpush3.msra.mxu0 %v3161_v35  ;;  %6127 = vmatpush3.msra.mxu1 %v3161_v35 }
 0x5fd   : > { %6074 = vmatprep.mubr.msk.f32.mxu0 %vm2990_vm9, %v5228_v10  ;;  %6077 = vmatprep.subr.msk.mxu0 %vm2794_vm7, %v7678_v8  ;;  %v3774_v30 = vpop.permute.xlu0 %3773 }
 0x5fe   : > { %6075 = vmatmul.mubr.msk.f32.vlgmr.msra.gmra.mxu0 %vm2990_vm9, %v5229_v15  ;;  %6128 = vmatprep.mubr.msk.f32.mxu1 %vm2990_vm9, %v5258_v31  ;;  %v3863_v15 = vld [vmem:[%s7960_s8 + $0x10] sm:$0x77]  ;;  %v4263_v31 = vcombine.high %v3862_v11, %v3862_v11 }
 0x5ff   : > { %6078 = vmatpush3.msk.msra.mxu0 %vm2794_vm7, %v7678_v8  ;;  %6083 = vmatprep.mubr.msk.f32.mxu0 %vm2990_vm9, %v5233_v55  ;;  %v3779_v8 = vpop.permute.xlu1 %3778  ;;  %v3864_v55 = vld [vmem:[%s7960_s8 + $0x18] sm:$0x77] }
 0x600   : > { %6079 = vmatprep.subr.mxu0 %v7683_v49  ;;  %6129 = vmatmul.mubr.msk.f32.vlgmr.msra.gmra.mxu1 %vm2990_vm9, %v5259_v58 }
 0x601   : > { %6080 = vmatpush3.msra.mxu0 %v7683_v49  ;;  %4038 = vmatprep.mubr.f32.mxu1 %v7964_v43 }
 0x602   : > { %6081 = vmatprep.subr.mxu0 %v7688_v45 }
 0x603   : > { %6082 = vmatpush3.msra.mxu0 %v7688_v45  ;;  %v3783_v45 = vld [vmem:[%s7959_s7] sm:$0xf] }
 0x604   : > { %6095 = vmatprep.subr.msk.mxu0 %vm2794_vm7, %v3165_v0  ;;  %6084 = vmatmul.mubr.msk.f32.vlgmr.msra.gmra.mxu0 %vm2990_vm9, %v5234_v32  ;;  %v4264_v32 = vcombine.high %v3863_v15, %v3863_v15 }
 0x605   : > { %6096 = vmatpush3.msk.msra.mxu0 %vm2794_vm7, %v3165_v0  ;;  %6101 = vmatprep.mubr.msk.f32.mxu0 %vm2990_vm9, %v5243_v29  ;;  %v4265_v29 = vcombine.high %v3864_v55, %v3864_v55 }
 0x606   : > { %6097 = vmatprep.subr.mxu0 %v3163_v33 }
 0x607   : > { %6098 = vmatpush3.msra.mxu0 %v3163_v33 }
 0x608   : > { %6099 = vmatprep.subr.mxu0 %v3161_v35 }
 0x609   : > { %6100 = vmatpush3.msra.mxu0 %v3161_v35  ;;  %v4262_v35 = vcombine.high %v3861_v17, %v3861_v17 }
 0x60a   : > { %6113 = vmatprep.subr.msk.mxu0 %vm2794_vm7, %v7700_v1  ;;  %6102 = vmatmul.mubr.msk.f32.vlgmr.msra.gmra.mxu0 %vm2990_vm9, %v5244_v13  ;;  %v5296_v13 = vld [vmem:[%s7959_s7 + $0x8] sm:$0xf] }
 0x60b   : > { %6114 = vmatpush3.msk.msra.mxu0 %vm2794_vm7, %v7700_v1  ;;  %6119 = vmatprep.mubr.msk.f32.mxu0 %vm2990_vm9, %v5253_v25  ;;  %v3949_v1 = vcombine.high %v5268_v39, %v5268_v39  ;;  %v5299_v25 = vld [vmem:[%s7960_s8 + $0x40] sm:$0x77] }
 0x60c   : > { %6115 = vmatprep.subr.mxu0 %v7706_v54 }
 0x60d   : > { %6116 = vmatpush3.msra.mxu0 %v7706_v54  ;;  %5272 = vmatprep.subr.msk.mxu1 %vm3957_vm14, %v3949_v1  ;;  %v5270_v54 = vld [vmem:[%s7960_s8 + $0x30] sm:$0x77] }
 0x60e   : > { %6117 = vmatprep.subr.mxu0 %v7714_v18  ;;  %5273 = vmatpush1.msk.msra.mxu1 %vm3957_vm14, %v5268_v39 }
 0x60f   : > { %6118 = vmatpush3.msra.mxu0 %v7714_v18  ;;  %v3951_v18 = vcombine.high %v5270_v54, %v5270_v54 }
 0x610   : > { %6120 = vmatmul.mubr.msk.f32.vlgmr.msra.gmra.mxu0 %vm2990_vm9, %v5254_v27  ;;  %6131 = vmatprep.subr.mxu0 %v7964_v43  ;;  %v5300_v27 = vld [vmem:[%s7960_s8 + $0x48] sm:$0x77] }
 0x611   : > { %6135 = vmatprep.mubr.msk.f32.mxu0 %vm6197_vm12, %v7964_v43  ;;  %5278 = vmatprep.subr.msk.mxu1 %vm3957_vm14, %v3951_v18 }
 0x6af   : > { %v6058_v40 = vpop.f32.mrf.mxu0  ;;  %v6094_v21 = vpop.f32.mrf.mxu1 }
 0x6b1   : > { %v3065_v57 = vpop.f32.mrf.mxu0  ;;  %v3414_v5 = vpop.f32.mrf.mxu1 }
 0x6b7   : > { %v6067_v59 = vpop.f32.mrf.mxu0  ;;  %v6112_v20 = vpop.f32.mrf.mxu1 }
 0x6b8   : > { %v3154_v62 = vadd.f32 %v6067_v59, %v6058_v40  ;;  %v4653_v40 = vcombine.high %v5299_v25, %v5299_v25  ;;  %v5301_v59 = vld [vmem:[%s7960_s8 + $0x50] sm:$0x77] }
 0x6b9   : > { %v3148_v26 = vpop.f32.mrf.mxu0  ;;  %v3586_v63 = vpop.f32.mrf.mxu1 }
 0x6ba   : > { %v3149_v38 = vadd.f32 %v3148_v26, %v3065_v57  ;;  %v4654_v57 = vcombine.high %v5300_v27, %v5300_v27  ;;  %v5302_v26 = vld [vmem:[%s7960_s8 + $0x58] sm:$0x77] }
 0x6be   : > { %v6076_v44 = vpop.f32.mrf.mxu0 }
 0x6bf   : > { %v3252_v51 = vadd.f32 %v6076_v44, %v3154_v62  ;;  %v4655_v44 = vcombine.high %v5301_v59, %v5301_v59  ;;  %v4656_v62 = vcombine.high %v5302_v26, %v5302_v26 }
 0x6c0   : > { %v3242_v23 = vpop.f32.mrf.mxu0  ;;  %v6130_v56 = vpop.f32.mrf.mxu1 }
 0x6c1   : > { %v3251_v22 = vadd.f32 %v3242_v23, %v3149_v38 }
 0x6c2   : > { %v3758_v9 = vpop.f32.mrf.mxu1 }
 0x6c4   : > { %v6085_v24 = vpop.f32.mrf.mxu0 }
 0x6c5   : > { %v3338_v48 = vadd.f32 %v6085_v24, %v3252_v51 }
 0x6c6   : > { %v3328_v37 = vpop.f32.mrf.mxu0 }
 0x6c7   : > { %v3337_v28 = vadd.f32 %v3328_v37, %v3251_v22  ;;  %v3424_v36 = vadd.f32 %v6094_v21, %v3338_v48 }
 0x6c9   : > { %v3423_v7 = vadd.f32 %v3414_v5, %v3337_v28 }
 0x6ca   : > { %v6103_v16 = vpop.f32.mrf.mxu0 }
 0x6cb   : > { %v3510_v3 = vadd.f32 %v6103_v16, %v3424_v36 }
 0x6cc   : > { %v3500_v14 = vpop.f32.mrf.mxu0 }
 0x6cd   : > { %v3509_v60 = vadd.f32 %v3500_v14, %v3423_v7  ;;  %v3596_v46 = vadd.f32 %v6112_v20, %v3510_v3 }
 0x6cf   : > { %v3595_v12 = vadd.f32 %v3586_v63, %v3509_v60 }
 0x6d0   : > { %v6121_v52 = vpop.f32.mrf.mxu0 }
 0x6d1   : > { %v3682_v34 = vadd.f32 %v6121_v52, %v3596_v46 }
 0x6d2   : > { %v3672_v42 = vpop.f32.mrf.mxu0 }
 0x6d3   : > { %v3681_v41 = vadd.f32 %v3672_v42, %v3595_v12  ;;  %v3768_v4 = vadd.f32 %v6130_v56, %v3682_v34 }
 0x6d5   : > { %v7828_v53 = vadd.f32 %v3779_v8, %v3768_v4  ;;  %v3767_v49 = vadd.f32 %v3758_v9, %v3681_v41 }
 0x6d7   : > { %v7830_v6 = vadd.f32 %v3774_v30, %v3767_v49  ;;  %6132 = vmatpush3.msk.msra.mxu0 %vm2794_vm7, %v7828_v53 }
 0x6d8   : > { %6133 = vmatprep.subr.mxu0 %v7964_v43 }
 0x6d9   : > { %6134 = vmatpush3.msra.mxu0 %v7830_v6 }
 0x6da   : > { %6136 = vmatmul.mubr.msk.f32.vlgmr.msra.gmra.mxu0 %vm3784_vm13, %v3783_v45  ;;  %6138 = vmatprep.subr.mxu0 %v7964_v43 }
 0x6db   : > { %6139 = vmatpush3.msk.msra.mxu0 %vm2794_vm7, %v7828_v53  ;;  %6142 = vmatprep.mubr.msk.f32.mxu0 %vm6197_vm12, %v7964_v43 }
 0x6dc   : > { %6140 = vmatprep.subr.mxu0 %v7964_v43 }
 0x6dd   : > { %6141 = vmatpush3.msra.mxu0 %v7830_v6 }
 0x6de   : > { %6143 = vmatmul.mubr.msk.f32.vlgmr.msra.gmra.mxu0 %vm3784_vm13, %v5265_v50  ;;  %5275 = vmatprep.subr.msk.mxu0 %vm3957_vm14, %v3950_v2 }
 0x6df   : > { %4109 = vmatprep.mubr.f32.mxu0 %v7964_v43  ;;  %5276 = vmatpush1.msk.msra.mxu0 %vm3957_vm14, %v5269_v47 }
 0x6e0   : > { %5281 = vmatprep.subr.msk.mxu0 %vm3957_vm14, %v3952_v61 }
 0x79a   : > { %v3857_v0 = vpop.f32.mrf.mxu0 }
 0x79c   : > { %v6137_v33 = vpop.f32.mrf.mxu0 }
 0x79e   : > { %v3936_v10 = vpop.f32.mrf.mxu0 }
 0x79f   : > { %5274 = vmatmul.mubr.msk.f32.vlgmr.msra.gmra.mxu1 %vm3953_vm15, %v3936_v10  ;;  %5277 = vmatmul.mubr.msk.f32.vlgmr.msra.gmra.mxu0 %vm3953_vm15, %v3936_v10 }
 0x7a0   : > { %5279 = vmatpush1.msk.msra.mxu1 %vm3957_vm14, %v5270_v54  ;;  %4180 = vmatprep.mubr.f32.mxu1 %v7964_v43  ;;  %v6144_v58 = vpop.f32.mrf.mxu0 }
 0x7a1   : > { %5284 = vmatprep.subr.msk.mxu1 %vm3957_vm14, %v4262_v35  ;;  %5282 = vmatpush1.msk.msra.mxu0 %vm3957_vm14, %v5271_v19 }
 0x7a2   : > { %4251 = vmatprep.mubr.f32.mxu0 %v7964_v43  ;;  %5287 = vmatprep.subr.msk.mxu0 %vm3957_vm14, %v4263_v31 }
 0x7a3   : > { %5280 = vmatmul.mubr.msk.f32.vlgmr.msra.gmra.mxu1 %vm3953_vm15, %v3936_v10  ;;  %5283 = vmatmul.mubr.msk.f32.vlgmr.msra.gmra.mxu0 %vm3953_vm15, %v3936_v10 }
 0x7a4   : > { %5285 = vmatpush1.msk.msra.mxu1 %vm3957_vm14, %v3861_v17  ;;  %4349 = vmatprep.mubr.f32.mxu1 %v7964_v43 }
 0x7a5   : > { %5290 = vmatprep.subr.msk.mxu1 %vm3957_vm14, %v4264_v32  ;;  %5288 = vmatpush1.msk.msra.mxu0 %vm3957_vm14, %v3862_v11 }
 0x7a6   : > { %4420 = vmatprep.mubr.f32.mxu0 %v7964_v43  ;;  %5293 = vmatprep.subr.msk.mxu0 %vm3957_vm14, %v4265_v29 }
 0x7a7   : > { %5286 = vmatmul.mubr.msk.f32.vlgmr.msra.gmra.mxu1 %vm3953_vm15, %v3857_v0  ;;  %5289 = vmatmul.mubr.msk.f32.vlgmr.msra.gmra.mxu0 %vm3953_vm15, %v3857_v0 }
 0x7a8   : > { %5291 = vmatpush1.msk.msra.mxu1 %vm3957_vm14, %v3863_v15  ;;  %4491 = vmatprep.mubr.f32.mxu1 %v7964_v43 }
 0x7a9   : > { %6145 = vmatprep.subr.mxu1 %v7964_v43  ;;  %5294 = vmatpush1.msk.msra.mxu0 %vm3957_vm14, %v3864_v55 }
 0x7aa   : > { %4562 = vmatprep.mubr.f32.mxu0 %v7964_v43  ;;  %5303 = vmatprep.subr.msk.mxu0 %vm3957_vm14, %v4653_v40 }
 0x7ab   : > { %5292 = vmatmul.mubr.msk.f32.vlgmr.msra.gmra.mxu1 %vm3953_vm15, %v3857_v0  ;;  %5295 = vmatmul.mubr.msk.f32.vlgmr.msra.gmra.mxu0 %vm3953_vm15, %v3857_v0 }
 0x7ac   : > { %6146 = vmatpush3.msk.msra.mxu1 %vm2794_vm7, %v7828_v53  ;;  %6149 = vmatprep.mubr.msk.f32.mxu1 %vm6197_vm12, %v7964_v43 }
 0x7ad   : > { %6147 = vmatprep.subr.mxu1 %v7964_v43  ;;  %4740 = vmatprep.mubr.f32.mxu0 %v7964_v43 }
 0x7ae   : > { %6148 = vmatpush3.msra.mxu1 %v7830_v6  ;;  %5304 = vmatpush1.msk.msra.mxu0 %vm3957_vm14, %v5299_v25 }
 0x7af   : > { %6150 = vmatmul.mubr.msk.f32.vlgmr.msra.gmra.mxu1 %vm3784_vm13, %v5296_v13  ;;  %5306 = vmatprep.subr.msk.mxu1 %vm3957_vm14, %v4654_v57 }
 0x7b0   : > { %4811 = vmatprep.mubr.f32.mxu1 %v7964_v43  ;;  %5307 = vmatpush1.msk.msra.mxu1 %vm3957_vm14, %v5300_v27 }
 0x7b1   : > { %5309 = vmatprep.subr.msk.mxu0 %vm3957_vm14, %v4655_v44  ;;  %5312 = vmatprep.subr.msk.mxu1 %vm3957_vm14, %v4656_v62 }
 0x85f   : > { %v4040_v23 = vpop.f32.mrf.mxu1  ;;  %v4111_v3 = vpop.f32.mrf.mxu0 }
 0x861   : > { %v4042_v21 = vpop.f32.mrf.mxu1  ;;  %v4113_v14 = vpop.f32.mrf.mxu0 }
 0x863   : > { %v4182_v38 = vpop.f32.mrf.mxu1  ;;  %v4253_v63 = vpop.f32.mrf.mxu0 }
 0x865   : > { %v4184_v51 = vpop.f32.mrf.mxu1  ;;  %v4255_v60 = vpop.f32.mrf.mxu0 }
 0x867   : > { %v4351_v24 = vpop.f32.mrf.mxu1  ;;  %v4422_v46 = vpop.f32.mrf.mxu0 }
 0x868   : > { %v4352_v22 = vadd.f32 %v4351_v24, %v4040_v23  ;;  %v4423_v41 = vadd.f32 %v4422_v46, %v4111_v3 }
 0x869   : > { %v4353_v48 = vpop.f32.mrf.mxu1  ;;  %v4424_v52 = vpop.f32.mrf.mxu0 }
 0x86a   : > { %v4354_v37 = vadd.f32 %v4353_v48, %v4042_v21  ;;  %v4425_v4 = vadd.f32 %v4424_v52, %v4113_v14 }
 0x86b   : > { %v4493_v5 = vpop.f32.mrf.mxu1  ;;  %v4564_v56 = vpop.f32.mrf.mxu0 }
 0x86c   : > { %v4494_v28 = vadd.f32 %v4493_v5, %v4182_v38  ;;  %v4565_v50 = vadd.f32 %v4564_v56, %v4253_v63 }
 0x86d   : > { %v4495_v20 = vpop.f32.mrf.mxu1  ;;  %v4566_v12 = vpop.f32.mrf.mxu0 }
 0x86e   : > { %v4496_v36 = vadd.f32 %v4495_v20, %v4184_v51  ;;  %v4567_v39 = vadd.f32 %v4566_v12, %v4255_v60 }
 0x86f   : > { %v4640_v16 = vpop.f32.mrf.mxu1 }
 0x870   : > { %5305 = vmatmul.mubr.msk.f32.vlgmr.msra.gmra.mxu0 %vm3953_vm15, %v4640_v16  ;;  %5308 = vmatmul.mubr.msk.f32.vlgmr.msra.gmra.mxu1 %vm3953_vm15, %v4640_v16 }
 0x871   : > { %5310 = vmatpush1.msk.msra.mxu0 %vm3957_vm14, %v5301_v59  ;;  %4882 = vmatprep.mubr.f32.mxu0 %v7964_v43  ;;  %v6151_v7 = vpop.f32.mrf.mxu1 }
 0x872   : > { %5313 = vmatpush1.msk.msra.mxu1 %vm3957_vm14, %v5302_v26  ;;  %4953 = vmatprep.mubr.f32.mxu1 %v7964_v43 }
 0x874   : > { %5311 = vmatmul.mubr.msk.f32.vlgmr.msra.gmra.mxu0 %vm3953_vm15, %v4640_v16  ;;  %5314 = vmatmul.mubr.msk.f32.vlgmr.msra.gmra.mxu1 %vm3953_vm15, %v4640_v16 }
 0x930   : > { %v4742_v34 = vpop.f32.mrf.mxu0  ;;  %v4813_v42 = vpop.f32.mrf.mxu1 }
 0x931   : > { %v4960_v43 = vadd.f32 %v4742_v34, %v4352_v22  ;;  %v4962_v53 = vadd.f32 %v4813_v42, %v4423_v41 }
 0x932   : > { %v4744_v8 = vpop.f32.mrf.mxu0  ;;  %v4815_v9 = vpop.f32.mrf.mxu1 }
 0x933   : > { %v4961_v49 = vadd.f32 %v4744_v8, %v4354_v37  ;;  %v4963_v30 = vadd.f32 %v4815_v9, %v4425_v4 }
 0x934   : > { %v4884_v6 = vpop.f32.mrf.mxu0  ;;  %v4955_v45 = vpop.f32.mrf.mxu1 }
 0x935   : > { %v4976_v1 = vcombine.low %v4960_v43, %v4961_v49  ;;  %v4977_v54 = vcombine.low %v4962_v53, %v4963_v30  ;;  %v4964_v2 = vadd.f32 %v4884_v6, %v4494_v28  ;;  %v4966_v19 = vadd.f32 %v4955_v45, %v4565_v50 }
 0x936   : > { %v4886_v18 = vpop.f32.mrf.mxu0  ;;  %v4957_v47 = vpop.f32.mrf.mxu1 }
 0x937   : > { %4984 = vst [vmem:[%s332_s24] sm:$0xff] %v4976_v1  ;;  %4985 = vst [vmem:[%s332_s24 + $0x8] sm:$0xff] %v4977_v54  ;;  %v4965_v61 = vadd.f32 %v4886_v18, %v4496_v36  ;;  %v4967_v0 = vadd.f32 %v4957_v47, %v4567_v39 }
 0x939   : > { %v4978_v17 = vcombine.low %v4964_v2, %v4965_v61  ;;  %v4979_v11 = vcombine.low %v4966_v19, %v4967_v0 }
 0x93b   : > { %4986 = vst [vmem:[%s332_s24 + $0x10] sm:$0xff] %v4978_v17  ;;  %4987 = vst [vmem:[%s332_s24 + $0x18] sm:$0xff] %v4979_v11 }
 0x93c PF: > { %s19_s30 = sadd.s32 1, %s6188_s30  }
 0x93d   : > { %p16_p4 = scmp.ge.s32.totalorder %s19_s30, 4  }
 0x93f   :  { %18 = sbr.rel (!%p16_p4) target bundleno = 1 (0x1), region = 106 }

</bundles_post_ra>
